<compile_context>
chip_gen: v7x
topology: tpu7x:2x2x1
jax: 0.10.0
libtpu: 0.0.40
codegen_flags: <defaults>
</compile_context>

<pallas_src>
import jax
import jax.numpy as jnp
from jax.experimental import pallas as pl
from jax.experimental.pallas import tpu as pltpu

# ----------------------------- configuration --------------------------------
IMG_SIZE = 32          # image_encoder.img_size (synthetic, small)
PATCH = 8
GRID = IMG_SIZE // PATCH          # 4x4 token grid
EMBED_DIM = 32
LOW_RES = 16           # decoder low-res mask resolution (folded into A below)
OUT_RES = 512          # Sam.postprocess_masks hardcodes (512, 512)
N_HEADS = 2            # mask head + edge head

PIXEL_MEAN = jnp.array([123.675, 116.28, 103.53], jnp.float32)   # (3,)
PIXEL_STD = jnp.array([58.395, 57.12, 57.375], jnp.float32)      # (3,)


# ----------------------- resampling matrices (glue) --------------------------
def nearest_matrix(out_size: int, in_size: int) -> jnp.ndarray:
    """PyTorch F.interpolate(mode='nearest') as a (out, in) one-hot matrix."""
    dst = jnp.arange(out_size)
    src = jnp.floor(dst.astype(jnp.float32) * (in_size / out_size)).astype(jnp.int32)
    src = jnp.clip(src, 0, in_size - 1)
    return jax.nn.one_hot(src, in_size, dtype=jnp.float32)


def bilinear_matrix(out_size: int, in_size: int) -> jnp.ndarray:
    """PyTorch F.interpolate(mode='bilinear', align_corners=False) as matrix."""
    dst = jnp.arange(out_size, dtype=jnp.float32)
    src = (dst + 0.5) * (in_size / out_size) - 0.5
    src = jnp.clip(src, 0.0, in_size - 1.0)
    lo = jnp.floor(src).astype(jnp.int32)
    hi = jnp.minimum(lo + 1, in_size - 1)
    frac = src - lo.astype(jnp.float32)
    return (jax.nn.one_hot(lo, in_size, dtype=jnp.float32) * (1.0 - frac)[:, None]
            + jax.nn.one_hot(hi, in_size, dtype=jnp.float32) * frac[:, None])


# --------------------- prompt encoder (no prompts) ---------------------------
def get_dense_pe(gauss: jnp.ndarray) -> jnp.ndarray:
    """PositionEmbeddingRandom-style dense PE, flattened to (D, GRID*GRID)."""
    coords = (jnp.arange(GRID, dtype=jnp.float32) + 0.5) / GRID
    grid = jnp.stack(jnp.meshgrid(coords, coords, indexing="ij"), axis=-1)  # (g, g, 2)
    proj = ((2.0 * grid - 1.0) @ gauss) * (2.0 * jnp.pi)                    # (g, g, D/2)
    pe = jnp.concatenate([jnp.sin(proj), jnp.cos(proj)], axis=-1)           # (g, g, D)
    return jnp.transpose(pe, (2, 0, 1)).reshape(EMBED_DIM, GRID * GRID)


# -------------- kernel 1: fused preprocess + encoder + head logits -----------
# TODO(synk): the real ImageEncoderViT / MaskDecoder transformer are not
# defined in the provided module; a deterministic linear stand-in (patch-embed
# matmul + dense-PE add + 1xD head) is folded into Mt / bias.
def _logits_kernel(x_ref, mt_ref, b_ref, o_ref):
    o_ref[...] = (jnp.dot(x_ref[...], mt_ref[...],
                          preferred_element_type=jnp.float32) + b_ref[...])


# ---------- kernel 2: mask/edge decoder + bilinear upsample (fused) ----------
# Algebraic fusion of postprocess: mask512 = A @ L @ A.T with
# A = bilinear(512,16) @ bilinear(16,4); only at = A.T (4,512, lane-dense,
# bf16) is shipped.  Both heads computed per grid step; two separate outputs.
def _decoder_kernel(l_ref, at_ref, mask_ref, edge_ref):
    at = at_ref[...]                                            # (4, 512) bf16

    def upsample(L):                                            # L: (4, 4) f32
        t = jnp.dot(L.astype(jnp.bfloat16), at,
                    preferred_element_type=jnp.float32)         # (4, 512)
        # out = A @ t  ==  contract(at, t) over dim 0 of both (no A materialized)
        return jax.lax.dot_general(
            at, t.astype(jnp.bfloat16),
            dimension_numbers=(((0,), (0,)), ((), ())),
            preferred_element_type=jnp.float32)                 # (512, 512)

    mask_ref[0, 0] = upsample(l_ref[0, 0])
    edge_ref[0, 0] = upsample(l_ref[0, 1])


# ------------------------------- Sam forward ---------------------------------
def init_params(key):
    k1, k2, k3, k4, k5, k6 = jax.random.split(key, 6)
    return {
        "w_patch_img": jax.random.normal(k1, (3 * PATCH * PATCH, EMBED_DIM), jnp.float32) * 0.02,
        "w_patch_edge": jax.random.normal(k2, (3 * PATCH * PATCH, EMBED_DIM), jnp.float32) * 0.02,
        "no_mask_embed": jax.random.normal(k3, (EMBED_DIM,), jnp.float32) * 0.02,
        "pe_gaussian": jax.random.normal(k4, (2, EMBED_DIM // 2), jnp.float32),
        "w_mask": jax.random.normal(k5, (1, EMBED_DIM), jnp.float32) * 0.1,
        "w_edge": jax.random.normal(k6, (1, EMBED_DIM), jnp.float32) * 0.1,
    }


def _sam_forward_impl(images, params):
    B, C, Hin, Win = images.shape

    # ---- fold the whole pre-decoder pipeline into (Mt, bias_row): exact, linear ----
    # densepe is added to both image and edge features (matches the prior stand-in).
    densepe = get_dense_pe(params["pe_gaussian"]) + params["no_mask_embed"][:, None]  # (D, 16)
    w_heads = jnp.concatenate([params["w_mask"], params["w_edge"]], axis=0)           # (2, D)
    # per-head folded patch filter v[h, c, py, px] = patch_embed_w @ head_w
    v = jnp.stack([params["w_patch_img"] @ params["w_mask"][0],
                   params["w_patch_edge"] @ params["w_edge"][0]], axis=0)             # (2, 192)
    v = v.reshape(N_HEADS, C, PATCH, PATCH)
    # nearest-resize matrices, split into (grid, patch, in) blocks
    RH = nearest_matrix(IMG_SIZE, Hin).reshape(GRID, PATCH, Hin)
    RW = nearest_matrix(IMG_SIZE, Win).reshape(GRID, PATCH, Win)
    v_scaled = v / PIXEL_STD[None, :, None, None]                                     # fold 1/std
    K = jnp.einsum("ayh,bxw,ncyx->nabchw", RH, RW, v_scaled)       # (2, 4, 4, C, Hin, Win)
    Mt = K.reshape(N_HEADS * GRID * GRID, C * Hin * Win).T          # (C*Hin*Win, 32)
    pe_contrib = w_heads @ densepe                                  # (2, 16)
    bias_fold = jnp.einsum("ncyx,c->n", v, -PIXEL_MEAN / PIXEL_STD)  # (2,)  fold -mean/std
    bias_row = (pe_contrib + bias_fold[:, None]).reshape(1, N_HEADS * GRID * GRID)

    # ---- kernel 1: one matmul over the whole batch -> (B, 2*16) logits ----
    img_flat = images.reshape(B, C * Hin * Win)                     # bitcast reshape
    logits = pl.pallas_call(
        _logits_kernel,
        out_shape=jax.ShapeDtypeStruct((B, N_HEADS * GRID * GRID), jnp.float32),
    )(img_flat, Mt, bias_row)
    logits4 = logits.reshape(B, N_HEADS, GRID, GRID)                # bitcast reshape

    # fused upsample matrix: bilinear(512<-16) o bilinear(16<-4), shipped transposed
    a_mat = bilinear_matrix(OUT_RES, LOW_RES) @ bilinear_matrix(LOW_RES, GRID)  # (512, 4)
    at = a_mat.T.astype(jnp.bfloat16)                                            # (4, 512)

    # ---- kernel 2: decoder + postprocess, grid over images, two outputs ----
    # TODO(synk): if B == 1 on v7x, a second parallel axis over output-row
    # blocks would be needed to keep both TensorCores busy.
    masks, edges = pl.pallas_call(
        _decoder_kernel,
        out_shape=(jax.ShapeDtypeStruct((B, 1, OUT_RES, OUT_RES), jnp.float32),
                   jax.ShapeDtypeStruct((B, 1, OUT_RES, OUT_RES), jnp.float32)),
        grid=(B,),
        in_specs=[
            pl.BlockSpec((1, N_HEADS, GRID, GRID), lambda b: (b, 0, 0, 0)),
            pl.BlockSpec((GRID, OUT_RES), lambda b: (0, 0)),
        ],
        out_specs=[
            pl.BlockSpec((1, 1, OUT_RES, OUT_RES), lambda b: (b, 0, 0, 0)),
            pl.BlockSpec((1, 1, OUT_RES, OUT_RES), lambda b: (b, 0, 0, 0)),
        ],
        compiler_params=pltpu.CompilerParams(dimension_semantics=("parallel",)),
    )(logits4, at)
    return masks, edges


_sam_forward_jit = jax.jit(_sam_forward_impl)


def sam_forward(batched_input, params):
    images = jnp.stack([x["image"] for x in batched_input], axis=0)
    return _sam_forward_jit(images, params)


if __name__ == "__main__":
    key = jax.random.PRNGKey(0)
    k_img, k_par = jax.random.split(key)
    # two small "already-transformed" 3xHxW images
    raw = jax.random.uniform(k_img, (2, 3, 24, 24), jnp.float32) * 255.0
    batched_input = [
        {"image": raw[0], "original_size": (24, 24)},
        {"image": raw[1], "original_size": (24, 24)},
    ]
    params = init_params(k_par)
    masks, edges = sam_forward(batched_input, params)
    jax.block_until_ready((masks, edges))
    assert masks.shape == (2, 1, OUT_RES, OUT_RES)
    assert edges.shape == (2, 1, OUT_RES, OUT_RES)
    assert jnp.all(jnp.isfinite(masks)) and jnp.all(jnp.isfinite(edges))
    print("KERNEL_OK")
</pallas_src>

<mosaic_0001>
module attributes {stable_mosaic.version = 11 : i64} {
  func.func @_logits_kernel(%arg0: memref<2x1728xf32, #tpu.memory_space<vmem>>, %arg1: memref<1728x32xf32, #tpu.memory_space<vmem>>, %arg2: memref<1x32xf32, #tpu.memory_space<vmem>>, %arg3: memref<2x32xf32, #tpu.memory_space<vmem>>) attributes {dimension_semantics = [], scalar_prefetch = 0 : i64, scratch_operands = 0 : i64, tpu.core_type = #tpu.core_type<tc>} {
    %c0 = arith.constant 0 : index
    %c0_0 = arith.constant 0 : index
    %0 = vector.load %arg0[%c0, %c0_0] : memref<2x1728xf32, #tpu.memory_space<vmem>>, vector<2x1728xf32>
    %c0_1 = arith.constant 0 : index
    %c0_2 = arith.constant 0 : index
    %1 = vector.load %arg1[%c0_1, %c0_2] : memref<1728x32xf32, #tpu.memory_space<vmem>>, vector<1728x32xf32>
    %cst = arith.constant dense<0.000000e+00> : vector<2x32xf32>
    %2 = tpu.matmul %0, %1, %cst {dimension_numbers = #tpu.dot_dimension_numbers<[1], [0], [0], [1], [0, 0, 1, 1], [], []>} : vector<2x1728xf32>, vector<1728x32xf32>, vector<2x32xf32> -> vector<2x32xf32>
    %c0_3 = arith.constant 0 : index
    %c0_4 = arith.constant 0 : index
    %3 = vector.load %arg2[%c0_3, %c0_4] : memref<1x32xf32, #tpu.memory_space<vmem>>, vector<1x32xf32>
    %4 = vector.broadcast %3 : vector<1x32xf32> to vector<2x32xf32>
    %5 = arith.addf %2, %4 : vector<2x32xf32>
    %c0_5 = arith.constant 0 : index
    %c0_6 = arith.constant 0 : index
    %6 = vector.load %arg3[%c0_5, %c0_6] : memref<2x32xf32, #tpu.memory_space<vmem>>, vector<2x32xf32>
    tpu.vector_store %arg3[%c0_5, %c0_6], %5 {strides = array<i32>} : memref<2x32xf32, #tpu.memory_space<vmem>>, vector<2x32xf32>,
    return
  }
}

module attributes {stable_mosaic.version = 11 : i64} {
  func.func @_decoder_kernel(%arg0: i32, %arg1: memref<1x2x4x4xf32, #tpu.memory_space<vmem>>, %arg2: memref<4x512xbf16, #tpu.memory_space<vmem>>, %arg3: memref<1x1x512x512xf32, #tpu.memory_space<vmem>>, %arg4: memref<1x1x512x512xf32, #tpu.memory_space<vmem>>) attributes {dimension_semantics = [#tpu.dimension_semantics<parallel>], iteration_bounds = array<i64: 2>, scalar_prefetch = 0 : i64, scratch_operands = 0 : i64, tpu.core_type = #tpu.core_type<tc>, window_params = [{transform_indices = @transform_0, window_bounds = array<i64: 1, 2, 4, 4>}, {pipeline_mode = #tpu.pipeline_mode<synchronous>, transform_indices = @transform_1, window_bounds = array<i64: 4, 512>}, {transform_indices = @transform_2, window_bounds = array<i64: 1, 1, 512, 512>}, {transform_indices = @transform_3, window_bounds = array<i64: 1, 1, 512, 512>}]} {
    %c0 = arith.constant 0 : index
    %c0_0 = arith.constant 0 : index
    %0 = vector.load %arg2[%c0, %c0_0] : memref<4x512xbf16, #tpu.memory_space<vmem>>, vector<4x512xbf16>
    %c0_1 = arith.constant 0 : index
    %c0_2 = arith.constant 0 : index
    %c0_3 = arith.constant 0 : index
    %c0_4 = arith.constant 0 : index
    %1 = vector.load %arg1[%c0_1, %c0_2, %c0_3, %c0_4] : memref<1x2x4x4xf32, #tpu.memory_space<vmem>>, vector<1x1x4x4xf32>
    %2 = vector.shape_cast %1 : vector<1x1x4x4xf32> to vector<4x4xf32>
    %3 = arith.truncf %2 : vector<4x4xf32> to vector<4x4xbf16>
    %cst = arith.constant dense<0.000000e+00> : vector<4x512xf32>
    %4 = tpu.matmul %3, %0, %cst {dimension_numbers = #tpu.dot_dimension_numbers<[1], [0], [0], [1], [0, 0, 1, 1], [], []>} : vector<4x4xbf16>, vector<4x512xbf16>, vector<4x512xf32> -> vector<4x512xf32>
    %5 = arith.truncf %4 : vector<4x512xf32> to vector<4x512xbf16>
    %cst_5 = arith.constant dense<0.000000e+00> : vector<512x512xf32>
    %6 = tpu.matmul %0, %5, %cst_5 {dimension_numbers = #tpu.dot_dimension_numbers<[0], [0], [1], [1], [0, 1, 1, 1], [], []>} : vector<4x512xbf16>, vector<4x512xbf16>, vector<512x512xf32> -> vector<512x512xf32>
    %c0_6 = arith.constant 0 : index
    %c0_7 = arith.constant 0 : index
    %c0_8 = arith.constant 0 : index
    %c0_9 = arith.constant 0 : index
    %7 = vector.load %arg3[%c0_6, %c0_7, %c0_8, %c0_9] : memref<1x1x512x512xf32, #tpu.memory_space<vmem>>, vector<1x1x512x512xf32>
    %8 = vector.shape_cast %7 : vector<1x1x512x512xf32> to vector<512x512xf32>
    %9 = vector.shape_cast %6 : vector<512x512xf32> to vector<1x1x512x512xf32>
    tpu.vector_store %arg3[%c0_6, %c0_7, %c0_8, %c0_9], %9 {strides = array<i32>} : memref<1x1x512x512xf32, #tpu.memory_space<vmem>>, vector<1x1x512x512xf32>,
    %c0_10 = arith.constant 0 : index
    %c1 = arith.constant 1 : index
    %c0_11 = arith.constant 0 : index
    %c0_12 = arith.constant 0 : index
    %10 = vector.load %arg1[%c0_10, %c1, %c0_11, %c0_12] : memref<1x2x4x4xf32, #tpu.memory_space<vmem>>, vector<1x1x4x4xf32>
    %11 = vector.shape_cast %10 : vector<1x1x4x4xf32> to vector<4x4xf32>
    %12 = arith.truncf %11 : vector<4x4xf32> to vector<4x4xbf16>
    %cst_13 = arith.constant dense<0.000000e+00> : vector<4x512xf32>
    %13 = tpu.matmul %12, %0, %cst_13 {dimension_numbers = #tpu.dot_dimension_numbers<[1], [0], [0], [1], [0, 0, 1, 1], [], []>} : vector<4x4xbf16>, vector<4x512xbf16>, vector<4x512xf32> -> vector<4x512xf32>
    %14 = arith.truncf %13 : vector<4x512xf32> to vector<4x512xbf16>
    %cst_14 = arith.constant dense<0.000000e+00> : vector<512x512xf32>
    %15 = tpu.matmul %0, %14, %cst_14 {dimension_numbers = #tpu.dot_dimension_numbers<[0], [0], [1], [1], [0, 1, 1, 1], [], []>} : vector<4x512xbf16>, vector<4x512xbf16>, vector<512x512xf32> -> vector<512x512xf32>
    %c0_15 = arith.constant 0 : index
    %c0_16 = arith.constant 0 : index
    %c0_17 = arith.constant 0 : index
    %c0_18 = arith.constant 0 : index
    %16 = vector.load %arg4[%c0_15, %c0_16, %c0_17, %c0_18] : memref<1x1x512x512xf32, #tpu.memory_space<vmem>>, vector<1x1x512x512xf32>
    %17 = vector.shape_cast %16 : vector<1x1x512x512xf32> to vector<512x512xf32>
    %18 = vector.shape_cast %15 : vector<512x512xf32> to vector<1x1x512x512xf32>
    tpu.vector_store %arg4[%c0_15, %c0_16, %c0_17, %c0_18], %18 {strides = array<i32>} : memref<1x1x512x512xf32, #tpu.memory_space<vmem>>, vector<1x1x512x512xf32>,
    return
  }
  func.func @transform_0(%arg0: i32) -> (i32, i32, i32, i32) {
    %c0_i32 = arith.constant 0 : i32
    %c0_i32_0 = arith.constant 0 : i32
    %c0_i32_1 = arith.constant 0 : i32
    %c0_i32_2 = arith.constant 0 : i32
    return %arg0, %c0_i32, %c0_i32_0, %c0_i32_1 : i32, i32, i32, i32
  }
  func.func @transform_1(%arg0: i32) -> (i32, i32) {
    %c0_i32 = arith.constant 0 : i32
    %c0_i32_0 = arith.constant 0 : i32
    %c0_i32_1 = arith.constant 0 : i32
    return %c0_i32, %c0_i32_0 : i32, i32
  }
  func.func @transform_2(%arg0: i32) -> (i32, i32, i32, i32) {
    %c0_i32 = arith.constant 0 : i32
    %c0_i32_0 = arith.constant 0 : i32
    %c0_i32_1 = arith.constant 0 : i32
    %c0_i32_2 = arith.constant 0 : i32
    return %arg0, %c0_i32, %c0_i32_0, %c0_i32_1 : i32, i32, i32, i32
  }
  func.func @transform_3(%arg0: i32) -> (i32, i32, i32, i32) {
    %c0_i32 = arith.constant 0 : i32
    %c0_i32_0 = arith.constant 0 : i32
    %c0_i32_1 = arith.constant 0 : i32
    %c0_i32_2 = arith.constant 0 : i32
    return %arg0, %c0_i32, %c0_i32_0, %c0_i32_1 : i32, i32, i32, i32
  }
}

</mosaic_0001>

<bundles_post_ra>
// kernel: _sam_forward_impl.2
= control target key start
LH: loop header
LB: loop body
LE: loop exit
PB: predicated region body
PF: predicated region fallthrough
CT: control target
= control target key end

     0   :  { %v1262_v13 = vmov 1983009808   ;;  %v249_v15 = vlaneseq  ;;  %vm317_vm0 = vcmask 523264   ;;  %vm810_vm1 = vcmask 254976   ;;  %s2015_s1 = inlined_call_operand.vmem [shape: f32[1728,32], index: 1, kind: input, shape index: {}]   ;;  %s2016_s0 = inlined_call_operand.vmem [shape: f32[2,1728], index: 0, kind: input, shape index: {}]   ;;  %s2017_s2 = inlined_call_operand.vmem [shape: f32[1,32], index: 2, kind: input, shape index: {}]   ;;  %s2018_s3 = inlined_call_operand.vmem [shape: f32[2,32], index: 3, kind: output, shape index: {}]  }
   0x1   :  { %v34_v0 = vld [vmem:[%s2015_s1 + $0x80] sm:$0xff]  ;;  %v35_v1 = vld [vmem:[%s2015_s1 + $0x88] sm:$0xff]  ;;  %v36_v5 = vld [vmem:[%s2015_s1 + $0x90] sm:$0xff]  ;;  %v247_v14 = vunpack.c.l.s4 %v1262_v13 }
   0x2   :  { %v18_v2 = vld [vmem:[%s2015_s1] sm:$0xff]  ;;  %v1029_v3 = vpack.c.bf16 %v35_v1, %v34_v0  ;;  %v19_v4 = vld [vmem:[%s2015_s1 + $0x8] sm:$0xff]  ;;  %v37_v6 = vld [vmem:[%s2015_s1 + $0x98] sm:$0xff]  ;;  %v250_v25 = vshrl.u32 %v249_v15, 7 }
   0x3   :  { %v1031_v7 = vpack.c.bf16 %v19_v4, %v18_v2  ;;  %v1033_v8 = vpack.c.bf16 %v37_v6, %v36_v5  ;;  %v20_v9 = vld [vmem:[%s2015_s1 + $0x10] sm:$0xff]  ;;  %v21_v10 = vld [vmem:[%s2015_s1 + $0x18] sm:$0xff]  ;;  %v38_v11 = vld [vmem:[%s2015_s1 + $0xa0] sm:$0xff]  ;;  %v248_v24 = vunpack.c.0.s8 %v247_v14 }
   0x4   :  { %1030 = vmatprep.subr.bf16.mxu1 %v1029_v3  ;;  %v39_v12 = vld [vmem:[%s2015_s1 + $0xa8] sm:$0xff]  ;;  %v1035_v16 = vpack.c.bf16 %v21_v10, %v20_v9  ;;  %v22_v18 = vld [vmem:[%s2015_s1 + $0x20] sm:$0xff]  ;;  %v40_v20 = vld [vmem:[%s2015_s1 + $0xb0] sm:$0xff] }
   0x5   :  { %1032 = vmatpush3.bf16.msra.mxu1 %v1031_v7  ;;  %v1037_v17 = vpack.c.bf16 %v39_v12, %v38_v11  ;;  %v23_v19 = vld [vmem:[%s2015_s1 + $0x28] sm:$0xff]  ;;  %v41_v21 = vld [vmem:[%s2015_s1 + $0xb8] sm:$0xff]  ;;  %v98_v22 = vld [vmem:[%s2015_s1 + $0x280] sm:$0xff]  ;;  %v1362_v41 = vsub.s32 %v248_v24, %v250_v25 }
   0x6   :  { %1034 = vmatprep.subr.bf16.mxu1 %v1033_v8  ;;  %v99_v23 = vld [vmem:[%s2015_s1 + $0x288] sm:$0xff]  ;;  %v1039_v26 = vpack.c.bf16 %v23_v19, %v22_v18  ;;  %v24_v27 = vld [vmem:[%s2015_s1 + $0x30] sm:$0xff]  ;;  %v82_v29 = vld [vmem:[%s2015_s1 + $0x200] sm:$0xff]  ;;  %v1041_v30 = vpack.c.bf16 %v41_v21, %v40_v20 }
   0x7   :  { %v1093_v28 = vpack.c.bf16 %v99_v23, %v98_v22  ;;  %v25_v31 = vld [vmem:[%s2015_s1 + $0x38] sm:$0xff]  ;;  %v42_v32 = vld [vmem:[%s2015_s1 + $0xc0] sm:$0xff]  ;;  %v83_v33 = vld [vmem:[%s2015_s1 + $0x208] sm:$0xff] }
   0x8   :  { %v43_v34 = vld [vmem:[%s2015_s1 + $0xc8] sm:$0xff]  ;;  %v1095_v35 = vpack.c.bf16 %v83_v33, %v82_v29  ;;  %v100_v36 = vld [vmem:[%s2015_s1 + $0x290] sm:$0xff]  ;;  %v101_v37 = vld [vmem:[%s2015_s1 + $0x298] sm:$0xff]  ;;  %v1043_v42 = vpack.c.bf16 %v25_v31, %v24_v27 }
   0x9   :  { %1036 = vmatpush3.bf16.msra.mxu1 %v1035_v16  ;;  %1094 = vmatprep.subr.bf16.mxu0 %v1093_v28  ;;  %v1097_v38 = vpack.c.bf16 %v101_v37, %v100_v36  ;;  %v84_v39 = vld [vmem:[%s2015_s1 + $0x210] sm:$0xff]  ;;  %v85_v40 = vld [vmem:[%s2015_s1 + $0x218] sm:$0xff]  ;;  %v26_v43 = vld [vmem:[%s2015_s1 + $0x40] sm:$0xff]  ;;  %v1045_v47 = vpack.c.bf16 %v43_v34, %v42_v32 }
   0xa   :  { %1038 = vmatprep.subr.bf16.mxu1 %v1037_v17  ;;  %v27_v44 = vld [vmem:[%s2015_s1 + $0x48] sm:$0xff]  ;;  %1096 = vmatpush3.bf16.msra.mxu0 %v1095_v35  ;;  %v1099_v45 = vpack.c.bf16 %v85_v40, %v84_v39  ;;  %v102_v46 = vld [vmem:[%s2015_s1 + $0x2a0] sm:$0xff]  ;;  %v44_v48 = vld [vmem:[%s2015_s1 + $0xd0] sm:$0xff] }
   0xb   :  { %v45_v49 = vld [vmem:[%s2015_s1 + $0xd8] sm:$0xff]  ;;  %1098 = vmatprep.subr.bf16.mxu0 %v1097_v38  ;;  %v103_v50 = vld [vmem:[%s2015_s1 + $0x2a8] sm:$0xff]  ;;  %v86_v52 = vld [vmem:[%s2015_s1 + $0x220] sm:$0xff]  ;;  %v1047_v57 = vpack.c.bf16 %v27_v44, %v26_v43 }
   0xc   :  { %v1101_v51 = vpack.c.bf16 %v103_v50, %v102_v46  ;;  %v87_v53 = vld [vmem:[%s2015_s1 + $0x228] sm:$0xff]  ;;  %v1391_v54 = vld [vmem:[%s2016_s0] sm:$0xff]  ;;  %v104_v56 = vld [vmem:[%s2015_s1 + $0x2b0] sm:$0xff]  ;;  %v1049_v62 = vpack.c.bf16 %v45_v49, %v44_v48 }
   0xd   :  { %1040 = vmatpush3.bf16.msra.mxu1 %v1039_v26  ;;  %v1395_v55 = vrot.slane %v1391_v54, %v1362_v41  ;;  %v28_v58 = vld [vmem:[%s2015_s1 + $0x50] sm:$0xff]  ;;  %v29_v59 = vld [vmem:[%s2015_s1 + $0x58] sm:$0xff]  ;;  %v1103_v60 = vpack.c.bf16 %v87_v53, %v86_v52  ;;  %v46_v63 = vld [vmem:[%s2015_s1 + $0xe0] sm:$0xff]  ;;  %v245_v28 = vcombine.high %v1391_v54, %v1391_v54 }
   0xe   :  { %1042 = vmatprep.subr.bf16.mxu1 %v1041_v30  ;;  %1100 = vmatpush3.bf16.msra.mxu0 %v1099_v45  ;;  %v105_v61 = vld [vmem:[%s2015_s1 + $0x2b8] sm:$0xff]  ;;  %v88_v2 = vld [vmem:[%s2015_s1 + $0x230] sm:$0xff]  ;;  %v47_v4 = vld [vmem:[%s2015_s1 + $0xe8] sm:$0xff]  ;;  %v1051_v7 = vpack.c.bf16 %v29_v59, %v28_v58 }
   0xf   :  { %1102 = vmatprep.subr.bf16.mxu0 %v1101_v51  ;;  %v260_v0 = vcombine.high %v1395_v55, %v1395_v55  ;;  %v1105_v1 = vpack.c.bf16 %v105_v61, %v104_v56  ;;  %v89_v3 = vld [vmem:[%s2015_s1 + $0x238] sm:$0xff]  ;;  %v106_v5 = vld [vmem:[%s2015_s1 + $0x2c0] sm:$0xff]  ;;  %v107_v6 = vld [vmem:[%s2015_s1 + $0x2c8] sm:$0xff]  ;;  %v1053_v11 = vpack.c.bf16 %v47_v4, %v46_v63 }
  0x10   :  { %v30_v8 = vld [vmem:[%s2015_s1 + $0x60] sm:$0xff]  ;;  %v31_v9 = vld [vmem:[%s2015_s1 + $0x68] sm:$0xff]  ;;  %v1107_v10 = vpack.c.bf16 %v89_v3, %v88_v2  ;;  %v48_v12 = vld [vmem:[%s2015_s1 + $0xf0] sm:$0xff]  ;;  %v1109_v13 = vpack.c.bf16 %v107_v6, %v106_v5 }
  0x11   :  { %1044 = vmatpush3.bf16.msra.mxu1 %v1043_v42  ;;  %384 = vmatprep.mubr.f32.mxu1 %v260_v0  ;;  %v90_v14 = vld [vmem:[%s2015_s1 + $0x240] sm:$0xff]  ;;  %v91_v15 = vld [vmem:[%s2015_s1 + $0x248] sm:$0xff]  ;;  %v49_v16 = vld [vmem:[%s2015_s1 + $0xf8] sm:$0xff]  ;;  %v1055_v19 = vpack.c.bf16 %v31_v9, %v30_v8 }
  0x12   :  { %1046 = vmatprep.subr.bf16.mxu1 %v1045_v47  ;;  %1104 = vmatpush3.bf16.msra.mxu0 %v1103_v60  ;;  %v108_v17 = vld [vmem:[%s2015_s1 + $0x2d0] sm:$0xff]  ;;  %v109_v18 = vld [vmem:[%s2015_s1 + $0x2d8] sm:$0xff]  ;;  %v1111_v22 = vpack.c.bf16 %v91_v15, %v90_v14  ;;  %v1057_v23 = vpack.c.bf16 %v49_v16, %v48_v12  ;;  %v66_v24 = vld [vmem:[%s2015_s1 + $0x180] sm:$0xff]  ;;  %v1511_v47 = vrot.slane %v245_v28, %v1362_v41 }
  0x13   :  { %1106 = vmatprep.subr.bf16.mxu0 %v1105_v1  ;;  %v32_v20 = vld [vmem:[%s2015_s1 + $0x70] sm:$0xff]  ;;  %v33_v21 = vld [vmem:[%s2015_s1 + $0x78] sm:$0xff]  ;;  %v1113_v25 = vpack.c.bf16 %v109_v18, %v108_v17  ;;  %v67_v29 = vld [vmem:[%s2015_s1 + $0x188] sm:$0xff] }
  0x14   :  { %v92_v26 = vld [vmem:[%s2015_s1 + $0x250] sm:$0xff]  ;;  %v93_v27 = vld [vmem:[%s2015_s1 + $0x258] sm:$0xff]  ;;  %v110_v30 = vld [vmem:[%s2015_s1 + $0x2e0] sm:$0xff]  ;;  %v1059_v32 = vpack.c.bf16 %v33_v21, %v32_v20  ;;  %v1061_v37 = vpack.c.bf16 %v67_v29, %v66_v24 }
  0x15   :  { %1048 = vmatpush3.bf16.msra.mxu1 %v1047_v57  ;;  %v111_v31 = vld [vmem:[%s2015_s1 + $0x2e8] sm:$0xff]  ;;  %v50_v33 = vld [vmem:[%s2015_s1 + $0x100] sm:$0xff]  ;;  %v68_v35 = vld [vmem:[%s2015_s1 + $0x190] sm:$0xff]  ;;  %v1115_v36 = vpack.c.bf16 %v93_v27, %v92_v26 }
  0x16   :  { %1050 = vmatprep.subr.bf16.mxu1 %v1049_v62  ;;  %1108 = vmatpush3.bf16.msra.mxu0 %v1107_v10  ;;  %v51_v34 = vld [vmem:[%s2015_s1 + $0x108] sm:$0xff]  ;;  %v1117_v38 = vpack.c.bf16 %v111_v31, %v110_v30  ;;  %v94_v39 = vld [vmem:[%s2015_s1 + $0x260] sm:$0xff]  ;;  %v69_v43 = vld [vmem:[%s2015_s1 + $0x198] sm:$0xff]  ;;  %v261_v62 = vcombine.high %v1511_v47, %v1511_v47 }
  0x17   :  { %1110 = vmatprep.subr.bf16.mxu0 %v1109_v13  ;;  %v95_v40 = vld [vmem:[%s2015_s1 + $0x268] sm:$0xff]  ;;  %v112_v44 = vld [vmem:[%s2015_s1 + $0x2f0] sm:$0xff]  ;;  %v113_v45 = vld [vmem:[%s2015_s1 + $0x2f8] sm:$0xff]  ;;  %v1063_v48 = vpack.c.bf16 %v51_v34, %v50_v33  ;;  %v1065_v53 = vpack.c.bf16 %v69_v43, %v68_v35 }
  0x18   :  { %v1497_v42 = vld [vmem:[%s2016_s0 + $0x8] sm:$0xff]  ;;  %v52_v49 = vld [vmem:[%s2015_s1 + $0x110] sm:$0xff]  ;;  %v53_v50 = vld [vmem:[%s2015_s1 + $0x118] sm:$0xff]  ;;  %v1119_v51 = vpack.c.bf16 %v95_v40, %v94_v39  ;;  %v1121_v56 = vpack.c.bf16 %v113_v45, %v112_v44 }
  0x19   :  { %1052 = vmatpush3.bf16.msra.mxu1 %v1051_v7  ;;  %v269_v46 = vrot.slane %v1497_v42, %v1362_v41  ;;  %v70_v54 = vld [vmem:[%s2015_s1 + $0x1a0] sm:$0xff]  ;;  %v96_v57 = vld [vmem:[%s2015_s1 + $0x270] sm:$0xff]  ;;  %v97_v58 = vld [vmem:[%s2015_s1 + $0x278] sm:$0xff]  ;;  %v1067_v63 = vpack.c.bf16 %v53_v50, %v52_v49 }
  0x1a   :  { %1054 = vmatprep.subr.bf16.mxu1 %v1053_v11  ;;  %1112 = vmatpush3.bf16.msra.mxu0 %v1111_v22  ;;  %v71_v59 = vld [vmem:[%s2015_s1 + $0x1a8] sm:$0xff]  ;;  %v162_v60 = vld [vmem:[%s2015_s1 + $0x480] sm:$0xff]  ;;  %v1123_v2 = vpack.c.bf16 %v97_v58, %v96_v57  ;;  %v72_v4 = vld [vmem:[%s2015_s1 + $0x1b0] sm:$0xff] }
  0x1b   :  { %1114 = vmatprep.subr.bf16.mxu0 %v1113_v25  ;;  %v277_v52 = vcombine.high %v269_v46, %v269_v46  ;;  %v163_v61 = vld [vmem:[%s2015_s1 + $0x488] sm:$0xff]  ;;  %v54_v0 = vld [vmem:[%s2015_s1 + $0x120] sm:$0xff]  ;;  %v1069_v3 = vpack.c.bf16 %v71_v59, %v70_v54  ;;  %v73_v7 = vld [vmem:[%s2015_s1 + $0x1b8] sm:$0xff] }
  0x1c   :  { %v55_v1 = vld [vmem:[%s2015_s1 + $0x128] sm:$0xff]  ;;  %v146_v5 = vld [vmem:[%s2015_s1 + $0x400] sm:$0xff]  ;;  %v164_v8 = vld [vmem:[%s2015_s1 + $0x490] sm:$0xff]  ;;  %v1073_v14 = vpack.c.bf16 %v73_v7, %v72_v4 }
  0x1d   :  { %1056 = vmatpush3.bf16.msra.mxu1 %v1055_v19  ;;  %524 = vmatprep.mubr.f32.mxu0 %v277_v52  ;;  %v147_v6 = vld [vmem:[%s2015_s1 + $0x408] sm:$0xff]  ;;  %v165_v9 = vld [vmem:[%s2015_s1 + $0x498] sm:$0xff]  ;;  %v1071_v10 = vpack.c.bf16 %v55_v1, %v54_v0  ;;  %v56_v11 = vld [vmem:[%s2015_s1 + $0x130] sm:$0xff] }
  0x1e   :  { %1058 = vmatprep.subr.bf16.mxu1 %v1057_v23  ;;  %1116 = vmatpush3.bf16.msra.mxu0 %v1115_v36  ;;  %v57_v12 = vld [vmem:[%s2015_s1 + $0x138] sm:$0xff]  ;;  %v1159_v13 = vpack.c.bf16 %v147_v6, %v146_v5  ;;  %v74_v15 = vld [vmem:[%s2015_s1 + $0x1c0] sm:$0xff]  ;;  %v1161_v16 = vpack.c.bf16 %v165_v9, %v164_v8  ;;  %v148_v17 = vld [vmem:[%s2015_s1 + $0x410] sm:$0xff]  ;;  %v262_v9 = vcombine.high %v1497_v42, %v1497_v42 }
  0x1f   :  { %1118 = vmatprep.subr.bf16.mxu0 %v1117_v38  ;;  %v149_v18 = vld [vmem:[%s2015_s1 + $0x418] sm:$0xff]  ;;  %v75_v19 = vld [vmem:[%s2015_s1 + $0x1c8] sm:$0xff]  ;;  %v166_v20 = vld [vmem:[%s2015_s1 + $0x4a0] sm:$0xff]  ;;  %v1075_v22 = vpack.c.bf16 %v57_v12, %v56_v11 }
  0x20   :  { %v167_v21 = vld [vmem:[%s2015_s1 + $0x4a8] sm:$0xff]  ;;  %v58_v23 = vld [vmem:[%s2015_s1 + $0x140] sm:$0xff]  ;;  %v1163_v25 = vpack.c.bf16 %v149_v18, %v148_v17  ;;  %v1077_v26 = vpack.c.bf16 %v75_v19, %v74_v15  ;;  %v76_v27 = vld [vmem:[%s2015_s1 + $0x1d0] sm:$0xff] }
  0x21   :  { %1060 = vmatpush3.bf16.msra.mxu1 %v1059_v32  ;;  %v59_v24 = vld [vmem:[%s2015_s1 + $0x148] sm:$0xff]  ;;  %v1165_v28 = vpack.c.bf16 %v167_v21, %v166_v20  ;;  %v150_v29 = vld [vmem:[%s2015_s1 + $0x420] sm:$0xff]  ;;  %v77_v31 = vld [vmem:[%s2015_s1 + $0x1d8] sm:$0xff] }
  0x22   :  { %1062 = vmatprep.subr.bf16.mxu1 %v1061_v37  ;;  %1120 = vmatpush3.bf16.msra.mxu0 %v1119_v51  ;;  %v151_v30 = vld [vmem:[%s2015_s1 + $0x428] sm:$0xff]  ;;  %v168_v32 = vld [vmem:[%s2015_s1 + $0x4b0] sm:$0xff]  ;;  %v169_v33 = vld [vmem:[%s2015_s1 + $0x4b8] sm:$0xff]  ;;  %v1079_v34 = vpack.c.bf16 %v59_v24, %v58_v23  ;;  %v1081_v39 = vpack.c.bf16 %v77_v31, %v76_v27  ;;  %v1722_v24 = vrot.slane %v262_v9, %v1362_v41 }
  0x23   :  { %1122 = vmatprep.subr.bf16.mxu0 %v1121_v56  ;;  %v60_v35 = vld [vmem:[%s2015_s1 + $0x150] sm:$0xff]  ;;  %v61_v36 = vld [vmem:[%s2015_s1 + $0x158] sm:$0xff]  ;;  %v78_v37 = vld [vmem:[%s2015_s1 + $0x1e0] sm:$0xff]  ;;  %v1167_v38 = vpack.c.bf16 %v151_v30, %v150_v29  ;;  %v1169_v43 = vpack.c.bf16 %v169_v33, %v168_v32 }
  0x24   :  { %385 = vmatmul.mubr.f32.vlgmr.msra.gmra.mrb[0].mxu1 %v1395_v55  ;;  %v1157_v55 = vpack.c.bf16 %v163_v61, %v162_v60  ;;  %v79_v40 = vld [vmem:[%s2015_s1 + $0x1e8] sm:$0xff]  ;;  %v152_v44 = vld [vmem:[%s2015_s1 + $0x430] sm:$0xff]  ;;  %v153_v45 = vld [vmem:[%s2015_s1 + $0x438] sm:$0xff]  ;;  %v1083_v51 = vpack.c.bf16 %v61_v36, %v60_v35  ;;  %v278_v35 = vcombine.high %v1722_v24, %v1722_v24 }
  0x25   :  { %1064 = vmatpush3.bf16.msra.mxu1 %v1063_v48  ;;  %454 = vmatprep.mubr.f32.mxu1 %v261_v62  ;;  %v171_v48 = vld [vmem:[%s2015_s1 + $0x4c8] sm:$0xff]  ;;  %v1639_v49 = vld [vmem:[%s2016_s0 + $0x10] sm:$0xff]  ;;  %v62_v52 = vld [vmem:[%s2015_s1 + $0x160] sm:$0xff]  ;;  %v1171_v54 = vpack.c.bf16 %v153_v45, %v152_v44  ;;  %v1085_v56 = vpack.c.bf16 %v79_v40, %v78_v37 }
  0x26   :  { %1066 = vmatprep.subr.bf16.mxu1 %v1065_v53  ;;  %1124 = vmatpush3.bf16.msra.mxu0 %v1123_v2  ;;  %v1643_v50 = vrot.slane %v1639_v49, %v1362_v41  ;;  %v63_v53 = vld [vmem:[%s2015_s1 + $0x168] sm:$0xff]  ;;  %v80_v57 = vld [vmem:[%s2015_s1 + $0x1f0] sm:$0xff]  ;;  %v154_v59 = vld [vmem:[%s2015_s1 + $0x440] sm:$0xff] }
  0x27   :  { %1158 = vmatprep.subr.bf16.mxu0 %v1157_v55  ;;  %v155_v60 = vld [vmem:[%s2015_s1 + $0x448] sm:$0xff]  ;;  %v81_v62 = vld [vmem:[%s2015_s1 + $0x1f8] sm:$0xff]  ;;  %v1087_v1 = vpack.c.bf16 %v63_v53, %v62_v52  ;;  %v64_v2 = vld [vmem:[%s2015_s1 + $0x170] sm:$0xff] }
  0x28   :  { %v294_v61 = vcombine.high %v1643_v50, %v1643_v50  ;;  %v173_v0 = vld [vmem:[%s2015_s1 + $0x4d8] sm:$0xff]  ;;  %v1175_v4 = vpack.c.bf16 %v155_v60, %v154_v59  ;;  %v1089_v55 = vpack.c.bf16 %v81_v62, %v80_v57  ;;  %v130_v5 = vld [vmem:[%s2015_s1 + $0x380] sm:$0xff]  ;;  %v156_v7 = vld [vmem:[%s2015_s1 + $0x450] sm:$0xff] }
  0x29   :  { %1068 = vmatpush3.bf16.msra.mxu1 %v1067_v63  ;;  %525 = vmatmul.mubr.f32.vlgmr.msra.gmra.mrb[0].mxu0 %v269_v46  ;;  %v170_v46 = vld [vmem:[%s2015_s1 + $0x4c0] sm:$0xff]  ;;  %v172_v63 = vld [vmem:[%s2015_s1 + $0x4d0] sm:$0xff]  ;;  %v157_v8 = vld [vmem:[%s2015_s1 + $0x458] sm:$0xff] }
  0x2a   :  { %1070 = vmatprep.subr.bf16.mxu1 %v1069_v3  ;;  %1160 = vmatpush3.bf16.msra.mxu0 %v1159_v13  ;;  %v1173_v58 = vpack.c.bf16 %v171_v48, %v170_v46  ;;  %v65_v3 = vld [vmem:[%s2015_s1 + $0x178] sm:$0xff]  ;;  %v1177_v6 = vpack.c.bf16 %v173_v0, %v172_v63  ;;  %v174_v11 = vld [vmem:[%s2015_s1 + $0x4e0] sm:$0xff]  ;;  %v175_v12 = vld [vmem:[%s2015_s1 + $0x4e8] sm:$0xff]  ;;  %v1179_v15 = vpack.c.bf16 %v157_v8, %v156_v7 }
  0x2b   :  { %1162 = vmatprep.subr.bf16.mxu0 %v1161_v16  ;;  %664 = vmatprep.mubr.f32.mxu0 %v294_v61  ;;  %v1091_v13 = vpack.c.bf16 %v65_v3, %v64_v2  ;;  %v115_v42 = vld [vmem:[%s2015_s1 + $0x308] sm:$0xff]  ;;  %v132_v17 = vld [vmem:[%s2015_s1 + $0x390] sm:$0xff]  ;;  %v1181_v18 = vpack.c.bf16 %v175_v12, %v174_v11  ;;  %v158_v19 = vld [vmem:[%s2015_s1 + $0x460] sm:$0xff] }
  0x2c   :  { %v159_v20 = vld [vmem:[%s2015_s1 + $0x468] sm:$0xff]  ;;  %v133_v21 = vld [vmem:[%s2015_s1 + $0x398] sm:$0xff]  ;;  %v160_v31 = vld [vmem:[%s2015_s1 + $0x470] sm:$0xff] }
  0x2d   :  { %1072 = vmatpush3.bf16.msra.mxu1 %v1071_v10  ;;  %v131_v10 = vld [vmem:[%s2015_s1 + $0x388] sm:$0xff]  ;;  %v177_v23 = vld [vmem:[%s2015_s1 + $0x4f8] sm:$0xff]  ;;  %v1183_v27 = vpack.c.bf16 %v159_v20, %v158_v19  ;;  %v134_v33 = vld [vmem:[%s2015_s1 + $0x3a0] sm:$0xff] }
  0x2e   :  { %1074 = vmatprep.subr.bf16.mxu1 %v1073_v14  ;;  %1164 = vmatpush3.bf16.msra.mxu0 %v1163_v25  ;;  %v114_v14 = vld [vmem:[%s2015_s1 + $0x300] sm:$0xff]  ;;  %v1125_v16 = vpack.c.bf16 %v131_v10, %v130_v5  ;;  %v117_v29 = vld [vmem:[%s2015_s1 + $0x318] sm:$0xff]  ;;  %v119_v40 = vld [vmem:[%s2015_s1 + $0x328] sm:$0xff] }
  0x2f   :  { %1166 = vmatprep.subr.bf16.mxu0 %v1165_v28  ;;  %v1127_v25 = vpack.c.bf16 %v115_v42, %v114_v14  ;;  %v1129_v28 = vpack.c.bf16 %v133_v21, %v132_v17  ;;  %v161_v32 = vld [vmem:[%s2015_s1 + $0x478] sm:$0xff]  ;;  %v118_v37 = vld [vmem:[%s2015_s1 + $0x320] sm:$0xff]  ;;  %v136_v44 = vld [vmem:[%s2015_s1 + $0x3b0] sm:$0xff] }
  0x30   :  { %v137_v45 = vld [vmem:[%s2015_s1 + $0x3b8] sm:$0xff]  ;;  %v1135_v46 = vpack.c.bf16 %v119_v40, %v118_v37  ;;  %v120_v48 = vld [vmem:[%s2015_s1 + $0x330] sm:$0xff]  ;;  %v138_v59 = vld [vmem:[%s2015_s1 + $0x3c0] sm:$0xff] }
  0x31   :  { %1076 = vmatpush3.bf16.msra.mxu1 %v1075_v22  ;;  %v176_v22 = vld [vmem:[%s2015_s1 + $0x4f0] sm:$0xff]  ;;  %v1137_v53 = vpack.c.bf16 %v137_v45, %v136_v44  ;;  %v213_v57 = vld [vmem:[%s2015_s1 + $0x618] sm:$0xff]  ;;  %v139_v60 = vld [vmem:[%s2015_s1 + $0x3c8] sm:$0xff] }
  0x32   :  { %1078 = vmatprep.subr.bf16.mxu1 %v1077_v26  ;;  %1168 = vmatpush3.bf16.msra.mxu0 %v1167_v38  ;;  %v116_v26 = vld [vmem:[%s2015_s1 + $0x310] sm:$0xff]  ;;  %v1185_v30 = vpack.c.bf16 %v177_v23, %v176_v22  ;;  %v1187_v38 = vpack.c.bf16 %v161_v32, %v160_v31  ;;  %v122_v63 = vld [vmem:[%s2015_s1 + $0x340] sm:$0xff]  ;;  %v123_v2 = vld [vmem:[%s2015_s1 + $0x348] sm:$0xff]  ;;  %v279_v32 = vcombine.high %v1639_v49, %v1639_v49 }
  0x33   :  { %1170 = vmatprep.subr.bf16.mxu0 %v1169_v43  ;;  %v1131_v36 = vpack.c.bf16 %v117_v29, %v116_v26  ;;  %v210_v43 = vld [vmem:[%s2015_s1 + $0x600] sm:$0xff]  ;;  %v215_v3 = vld [vmem:[%s2015_s1 + $0x628] sm:$0xff]  ;;  %v1143_v5 = vpack.c.bf16 %v123_v2, %v122_v63  ;;  %v125_v9 = vld [vmem:[%s2015_s1 + $0x358] sm:$0xff] }
  0x34   :  { %v216_v10 = vld [vmem:[%s2015_s1 + $0x630] sm:$0xff]  ;;  %v217_v11 = vld [vmem:[%s2015_s1 + $0x638] sm:$0xff]  ;;  %v142_v12 = vld [vmem:[%s2015_s1 + $0x3e0] sm:$0xff] }
  0x35   :  { %1080 = vmatpush3.bf16.msra.mxu1 %v1079_v34  ;;  %v135_v34 = vld [vmem:[%s2015_s1 + $0x3a8] sm:$0xff]  ;;  %v126_v42 = vld [vmem:[%s2015_s1 + $0x360] sm:$0xff]  ;;  %v144_v20 = vld [vmem:[%s2015_s1 + $0x3f0] sm:$0xff] }
  0x36   :  { %1082 = vmatprep.subr.bf16.mxu1 %v1081_v39  ;;  %1172 = vmatpush3.bf16.msra.mxu0 %v1171_v54  ;;  %v1133_v39 = vpack.c.bf16 %v135_v34, %v134_v33  ;;  %v1263_v54 = vmov 0.0|0.0   ;;  %v127_v17 = vld [vmem:[%s2015_s1 + $0x368] sm:$0xff]  ;;  %v145_v21 = vld [vmem:[%s2015_s1 + $0x3f8] sm:$0xff]  ;;  %v128_v23 = vld [vmem:[%s2015_s1 + $0x370] sm:$0xff] }
  0x37   :  { %1174 = vmatprep.subr.bf16.mxu0 %v1173_v58  ;;  %v1779_v58 = vld.sshfl [vmem:[%s2016_s0 + $0x18] sm:$0x33 pattern:$0x76325410]  ;;  %v219_v19 = vld [vmem:[%s2015_s1 + $0x648] sm:$0xff]  ;;  %v1151_v22 = vpack.c.bf16 %v127_v17, %v126_v42  ;;  %v1153_v26 = vpack.c.bf16 %v145_v21, %v144_v20  ;;  %v178_v34 = vld [vmem:[%s2015_s1 + $0x500] sm:$0xff] }
  0x38   :  { %v303_v61 = vcombine.high %v1779_v58, %v1779_v58  ;;  %v221_v29 = vld [vmem:[%s2015_s1 + $0x658] sm:$0xff]  ;;  %v195_v31 = vld [vmem:[%s2015_s1 + $0x588] sm:$0xff]  ;;  %v222_v49 = vld [vmem:[%s2015_s1 + $0x660] sm:$0xff] }
  0x39   :  { %1084 = vmatpush3.bf16.msra.mxu1 %v1083_v51  ;;  %v121_v51 = vld [vmem:[%s2015_s1 + $0x338] sm:$0xff]  ;;  %v179_v37 = vld [vmem:[%s2015_s1 + $0x508] sm:$0xff]  ;;  %v180_v44 = vld [vmem:[%s2015_s1 + $0x510] sm:$0xff] }
  0x3a   :  { %1086 = vmatprep.subr.bf16.mxu1 %v1085_v56  ;;  %1176 = vmatpush3.bf16.msra.mxu0 %v1175_v4  ;;  %v212_v56 = vld [vmem:[%s2015_s1 + $0x610] sm:$0xff]  ;;  %v1139_v62 = vpack.c.bf16 %v121_v51, %v120_v48  ;;  %v197_v40 = vld [vmem:[%s2015_s1 + $0x598] sm:$0xff]  ;;  %v227_v63 = vld [vmem:[%s2015_s1 + $0x688] sm:$0xff] }
  0x3b   :  { %1178 = vmatprep.subr.bf16.mxu0 %v1177_v6  ;;  %v1225_v0 = vpack.c.bf16 %v213_v57, %v212_v56  ;;  %v140_v4 = vld [vmem:[%s2015_s1 + $0x3d0] sm:$0xff]  ;;  %v181_v48 = vld [vmem:[%s2015_s1 + $0x518] sm:$0xff]  ;;  %v231_v42 = vld [vmem:[%s2015_s1 + $0x6a8] sm:$0xff] }
  0x3c   :  { %v124_v6 = vld [vmem:[%s2015_s1 + $0x350] sm:$0xff]  ;;  %v225_v51 = vld [vmem:[%s2015_s1 + $0x678] sm:$0xff]  ;;  %v1195_v57 = vpack.c.bf16 %v181_v48, %v180_v44 }
  0x3d   :  { %1088 = vmatpush3.bf16.msra.mxu1 %v1087_v1  ;;  %v1141_v1 = vpack.c.bf16 %v139_v60, %v138_v59  ;;  %v1147_v14 = vpack.c.bf16 %v125_v9, %v124_v6  ;;  %v182_v59 = vld [vmem:[%s2015_s1 + $0x520] sm:$0xff]  ;;  %v229_v6 = vld [vmem:[%s2015_s1 + $0x698] sm:$0xff] }
  0x3e   :  { %1090 = vmatprep.subr.bf16.mxu1 %v1089_v55  ;;  %1180 = vmatpush3.bf16.msra.mxu0 %v1179_v15  ;;  %v141_v55 = vld [vmem:[%s2015_s1 + $0x3d8] sm:$0xff]  ;;  %v1231_v15 = vpack.c.bf16 %v217_v11, %v216_v10  ;;  %v186_v10 = vld [vmem:[%s2015_s1 + $0x540] sm:$0xff] }
  0x3f   :  { %1182 = vmatprep.subr.bf16.mxu0 %v1181_v18  ;;  %v1145_v8 = vpack.c.bf16 %v141_v55, %v140_v4  ;;  %v218_v18 = vld [vmem:[%s2015_s1 + $0x640] sm:$0xff]  ;;  %v185_v55 = vld [vmem:[%s2015_s1 + $0x538] sm:$0xff] }
  0x40   :  { %v189_v21 = vld [vmem:[%s2015_s1 + $0x558] sm:$0xff] }
  0x41   :  { %1092 = vmatpush3.bf16.msra.mxu1 %v1091_v13  ;;  %v143_v13 = vld [vmem:[%s2015_s1 + $0x3e8] sm:$0xff] }
  0x42   :  { %1126 = vmatprep.subr.bf16.mxu1 %v1125_v16  ;;  %1184 = vmatpush3.bf16.msra.mxu0 %v1183_v27  ;;  %v1149_v16 = vpack.c.bf16 %v143_v13, %v142_v12  ;;  %v129_v27 = vld [vmem:[%s2015_s1 + $0x378] sm:$0xff]  ;;  %v187_v13 = vld [vmem:[%s2015_s1 + $0x548] sm:$0xff] }
  0x43   :  { %1186 = vmatprep.subr.bf16.mxu0 %v1185_v30  ;;  %v194_v30 = vld [vmem:[%s2015_s1 + $0x580] sm:$0xff]  ;;  %v1155_v33 = vpack.c.bf16 %v129_v27, %v128_v23  ;;  %v1207_v17 = vpack.c.bf16 %v187_v13, %v186_v10  ;;  %v233_v23 = vld [vmem:[%s2015_s1 + $0x6b8] sm:$0xff] }
  0x44   :  { %455 = vmatmul.mubr.f32.vlgmr.msra.gmra.mrb[2].mxu1 %v1511_v47  ;;  %v211_v47 = vld [vmem:[%s2015_s1 + $0x608] sm:$0xff] }
  0x45   :  { %1128 = vmatpush3.bf16.msra.mxu1 %v1127_v25  ;;  %594 = vmatprep.mubr.f32.mxu1 %v278_v35  ;;  %v1222_v52 = vpack.c.bf16 %v211_v47, %v210_v43  ;;  %v1234_v25 = vpack.c.bf16 %v219_v19, %v218_v18  ;;  %v1888_v43 = vrot.slane %v279_v32, %v1362_v41  ;;  %v224_v41 = vld [vmem:[%s2015_s1 + $0x670] sm:$0xff] }
  0x46   :  { %1130 = vmatprep.subr.bf16.mxu1 %v1129_v28  ;;  %1188 = vmatpush3.bf16.msra.mxu0 %v1187_v38  ;;  %v220_v28 = vld [vmem:[%s2015_s1 + $0x650] sm:$0xff]  ;;  %v223_v38 = vld [vmem:[%s2015_s1 + $0x668] sm:$0xff]  ;;  %v1191_v47 = vpack.c.bf16 %v179_v37, %v178_v34  ;;  %v1243_v60 = vpack.c.bf16 %v225_v51, %v224_v41 }
  0x47   :  { %1221 = vmatprep.subr.bf16.mxu0 %v1263_v54  ;;  %v1237_v35 = vpack.c.bf16 %v221_v29, %v220_v28  ;;  %v1240_v45 = vpack.c.bf16 %v223_v38, %v222_v49  ;;  %v295_v56 = vcombine.high %v1888_v43, %v1888_v43  ;;  %v188_v18 = vld [vmem:[%s2015_s1 + $0x550] sm:$0xff] }
  0x48   :  { %v1211_v27 = vpack.c.bf16 %v189_v21, %v188_v18  ;;  %v208_v32 = vld [vmem:[%s2015_s1 + $0x5f0] sm:$0xff] }
  0x49   :  { %1132 = vmatpush3.bf16.msra.mxu1 %v1131_v36  ;;  %665 = vmatmul.mubr.f32.vlgmr.msra.gmra.mrb[2].mxu0 %v1643_v50  ;;  %v214_v50 = vld [vmem:[%s2015_s1 + $0x620] sm:$0xff]  ;;  %v1189_v36 = vpack.c.bf16 %v195_v31, %v194_v30  ;;  %v191_v31 = vld [vmem:[%s2015_s1 + $0x568] sm:$0xff] }
  0x4a   :  { %1134 = vmatprep.subr.bf16.mxu1 %v1133_v39  ;;  %1223 = vmatpush1.bf16.msra.mxu0 %v1222_v52  ;;  %v1228_v7 = vpack.c.bf16 %v215_v3, %v214_v50  ;;  %v196_v39 = vld [vmem:[%s2015_s1 + $0x590] sm:$0xff]  ;;  %v198_v52 = vld [vmem:[%s2015_s1 + $0x5a0] sm:$0xff] }
  0x4b   :  { %1224 = vmatprep.subr.bf16.mxu0 %v1263_v54  ;;  %818 = vmatprep.mubr.msk.f32.mxu0 %vm317_vm0, %v303_v61  ;;  %v184_v50 = vld [vmem:[%s2015_s1 + $0x530] sm:$0xff]  ;;  %v190_v30 = vld [vmem:[%s2015_s1 + $0x560] sm:$0xff] }
  0x4c   :  { %v1203_v9 = vpack.c.bf16 %v185_v55, %v184_v50  ;;  %v1215_v34 = vpack.c.bf16 %v191_v31, %v190_v30 }
  0x4d   :  { %1136 = vmatpush3.bf16.msra.mxu1 %v1135_v46  ;;  %v1193_v46 = vpack.c.bf16 %v197_v40, %v196_v39 }
  0x4e   :  { %1138 = vmatprep.subr.bf16.mxu1 %v1137_v53  ;;  %1226 = vmatpush1.bf16.msra.mxu0 %v1225_v0  ;;  %v199_v53 = vld [vmem:[%s2015_s1 + $0x5a8] sm:$0xff]  ;;  %v200_v0 = vld [vmem:[%s2015_s1 + $0x5b0] sm:$0xff] }
  0x4f   :  { %1227 = vmatprep.subr.bf16.mxu0 %v1263_v54  ;;  %v1197_v61 = vpack.c.bf16 %v199_v53, %v198_v52 }
  0x51   :  { %1140 = vmatpush3.bf16.msra.mxu1 %v1139_v62  ;;  %v183_v62 = vld [vmem:[%s2015_s1 + $0x528] sm:$0xff] }
  0x52   :  { %1142 = vmatprep.subr.bf16.mxu1 %v1141_v1  ;;  %1229 = vmatpush1.bf16.msra.mxu0 %v1228_v7  ;;  %v201_v1 = vld [vmem:[%s2015_s1 + $0x5b8] sm:$0xff]  ;;  %v1199_v2 = vpack.c.bf16 %v183_v62, %v182_v59  ;;  %v202_v7 = vld [vmem:[%s2015_s1 + $0x5c0] sm:$0xff] }
  0x53   :  { %1230 = vmatprep.subr.bf16.mxu0 %v1263_v54  ;;  %v1201_v4 = vpack.c.bf16 %v201_v1, %v200_v0 }
  0x55   :  { %1144 = vmatpush3.bf16.msra.mxu1 %v1143_v5  ;;  %v228_v5 = vld [vmem:[%s2015_s1 + $0x690] sm:$0xff] }
  0x56   :  { %1146 = vmatprep.subr.bf16.mxu1 %v1145_v8  ;;  %1232 = vmatpush1.bf16.msra.mxu0 %v1231_v15  ;;  %v203_v8 = vld [vmem:[%s2015_s1 + $0x5c8] sm:$0xff]  ;;  %v1249_v11 = vpack.c.bf16 %v229_v6, %v228_v5  ;;  %v204_v15 = vld [vmem:[%s2015_s1 + $0x5d0] sm:$0xff] }
  0x57   :  { %1233 = vmatprep.subr.bf16.mxu0 %v1263_v54  ;;  %v1205_v12 = vpack.c.bf16 %v203_v8, %v202_v7 }
  0x59   :  { %1148 = vmatpush3.bf16.msra.mxu1 %v1147_v14  ;;  %v230_v14 = vld [vmem:[%s2015_s1 + $0x6a0] sm:$0xff] }
  0x5a   :  { %1150 = vmatprep.subr.bf16.mxu1 %v1149_v16  ;;  %1235 = vmatpush1.bf16.msra.mxu0 %v1234_v25  ;;  %v205_v16 = vld [vmem:[%s2015_s1 + $0x5d8] sm:$0xff]  ;;  %v1252_v19 = vpack.c.bf16 %v231_v42, %v230_v14  ;;  %v206_v25 = vld [vmem:[%s2015_s1 + $0x5e0] sm:$0xff] }
  0x5b   :  { %1236 = vmatprep.subr.bf16.mxu0 %v1263_v54  ;;  %v1209_v20 = vpack.c.bf16 %v205_v16, %v204_v15 }
  0x5d   :  { %1152 = vmatpush3.bf16.msra.mxu1 %v1151_v22  ;;  %v232_v22 = vld [vmem:[%s2015_s1 + $0x6b0] sm:$0xff] }
  0x5e   :  { %1154 = vmatprep.subr.bf16.mxu1 %v1153_v26  ;;  %1238 = vmatpush1.bf16.msra.mxu0 %v1237_v35  ;;  %v207_v26 = vld [vmem:[%s2015_s1 + $0x5e8] sm:$0xff]  ;;  %v1255_v28 = vpack.c.bf16 %v233_v23, %v232_v22 }
  0x5f   :  { %1239 = vmatprep.subr.bf16.mxu0 %v1263_v54  ;;  %v1213_v29 = vpack.c.bf16 %v207_v26, %v206_v25 }
  0x61   :  { %1156 = vmatpush3.bf16.msra.mxu1 %v1155_v33  ;;  %v209_v33 = vld [vmem:[%s2015_s1 + $0x5f8] sm:$0xff] }
  0x62   :  { %1190 = vmatprep.subr.bf16.mxu1 %v1189_v36  ;;  %1241 = vmatpush1.bf16.msra.mxu0 %v1240_v45  ;;  %v1217_v35 = vpack.c.bf16 %v209_v33, %v208_v32  ;;  %v192_v36 = vld [vmem:[%s2015_s1 + $0x570] sm:$0xff]  ;;  %v816_v45 = vld [vmem:[%s2017_s2] ss:$0 sm:$0xff] }
  0x63   :  { %1242 = vmatprep.subr.bf16.mxu0 %v1263_v54 }
  0x64   :  { %595 = vmatmul.mubr.f32.vlgmr.msra.gmra.mrb[4].mxu1 %v1722_v24  ;;  %v226_v24 = vld [vmem:[%s2015_s1 + $0x680] sm:$0xff] }
  0x65   :  { %1192 = vmatpush3.bf16.msra.mxu1 %v1191_v47  ;;  %734 = vmatprep.mubr.f32.mxu1 %v295_v56  ;;  %v1246_v3 = vpack.c.bf16 %v227_v63, %v226_v24 }
  0x66   :  { %1194 = vmatprep.subr.bf16.mxu1 %v1193_v46  ;;  %1244 = vmatpush1.bf16.msra.mxu0 %v1243_v60 }
  0x67   :  { %1245 = vmatprep.subr.bf16.mxu0 %v1263_v54 }
  0x69   :  { %1196 = vmatpush3.bf16.msra.mxu1 %v1195_v57 }
  0x6a   :  { %1198 = vmatprep.subr.bf16.mxu1 %v1197_v61  ;;  %1247 = vmatpush1.bf16.msra.mxu0 %v1246_v3 }
  0x6b   :  { %1248 = vmatprep.subr.bf16.mxu0 %v1263_v54 }
  0x6d   :  { %1200 = vmatpush3.bf16.msra.mxu1 %v1199_v2 }
  0x6e   :  { %1202 = vmatprep.subr.bf16.mxu1 %v1201_v4  ;;  %1250 = vmatpush1.bf16.msra.mxu0 %v1249_v11 }
  0x6f   :  { %1251 = vmatprep.subr.bf16.mxu0 %v1263_v54 }
  0x71   :  { %1204 = vmatpush3.bf16.msra.mxu1 %v1203_v9 }
  0x72   :  { %1206 = vmatprep.subr.bf16.mxu1 %v1205_v12  ;;  %1253 = vmatpush1.bf16.msra.mxu0 %v1252_v19 }
  0x73   :  { %1254 = vmatprep.subr.bf16.mxu0 %v1263_v54  ;;  %v193_v54 = vld [vmem:[%s2015_s1 + $0x578] sm:$0xff] }
  0x74   :  { %v1219_v37 = vpack.c.bf16 %v193_v54, %v192_v36 }
  0x75   :  { %1208 = vmatpush3.bf16.msra.mxu1 %v1207_v17 }
  0x76   :  { %1210 = vmatprep.subr.bf16.mxu1 %v1209_v20  ;;  %1256 = vmatpush1.bf16.msra.mxu0 %v1255_v28 }
  0x79   :  { %1212 = vmatpush3.bf16.msra.mxu1 %v1211_v27  ;;  %805 = vmatmul.mubr.f32.vlgmr.msra.gmra.mrb[4].mxu0 %v1779_v58 }
  0x7a   :  { %1214 = vmatprep.subr.bf16.mxu1 %v1213_v29 }
  0x7d   :  { %1216 = vmatpush3.bf16.msra.mxu1 %v1215_v34 }
  0x7e   :  { %1218 = vmatprep.subr.bf16.mxu1 %v1217_v35 }
  0x81   :  { %1220 = vmatpush3.bf16.msra.mxu1 %v1219_v37 }
  0x84   :  { %735 = vmatmul.mubr.f32.vlgmr.msra.gmra.mrb[6].mxu1 %v1888_v43 }
  0xf7   :  { %v851_v49 = vpop.f32.mrb[0].mxu1 }
  0xf8   :  { %v852_v38 = vpop.f32.mrb[1].mxu1 }
  0xf9   :  { %v853_v39 = vadd.f32 %v852_v38, %v851_v49 }
  0xfb   :  { %v387_v41 = vadd.f32 %v853_v39, %v816_v45 }
  0xfc   :  { %v921_v40 = vpop.f32.mrb[0].mxu0 }
  0xfd   :  { %v922_v47 = vpop.f32.mrb[1].mxu0 }
  0xfe   :  { %v923_v44 = vadd.f32 %v922_v47, %v921_v40 }
 0x117   :  { %v886_v46 = vpop.f32.mrb[2].mxu1 }
 0x118   :  { %v887_v48 = vpop.f32.mrb[3].mxu1 }
 0x119   :  { %v888_v58 = vadd.f32 %v887_v48, %v886_v46 }
 0x11b   :  { %v457_v51 = vadd.f32 %v888_v58, %v387_v41 }
 0x11c   :  { %v991_v53 = vpop.f32.mrb[2].mxu0 }
 0x11d   :  { %v527_v52 = vadd.f32 %v923_v44, %v457_v51  ;;  %v992_v56 = vpop.f32.mrb[3].mxu0 }
 0x11e   :  { %v993_v57 = vadd.f32 %v992_v56, %v991_v53 }
 0x137   :  { %v956_v43 = vpop.f32.mrb[4].mxu1 }
 0x138   :  { %v957_v59 = vpop.f32.mrb[5].mxu1 }
 0x139   :  { %v958_v60 = vadd.f32 %v957_v59, %v956_v43 }
 0x13b   :  { %v597_v61 = vadd.f32 %v958_v60, %v527_v52 }
 0x13d   :  { %v667_v62 = vadd.f32 %v993_v57, %v597_v61 }
 0x14c   :  { %v806_v24 = vpop.f32.mrb[4].mxu0 }
 0x14d   :  { %v808_v63 = vpop.f32.mrb[5].mxu0 }
 0x157   :  { %v1026_v0 = vpop.f32.mrb[6].mxu1 }
 0x158   :  { %v1027_v1 = vpop.f32.mrb[7].mxu1 }
 0x159   :  { %v1028_v2 = vadd.f32 %v1027_v1, %v1026_v0 }
 0x15b   :  { %v737_v50 = vadd.f32 %v1028_v2, %v667_v62 }
 0x15d   :  { %v807_v3 = vadd.f32 %v806_v24, %v737_v50 }
 0x15f   :  { %811 = vst.msk [vmem:[%s2018_s3] sm:$0x3] %vm810_vm1, %v807_v3 }

// kernel: _sam_forward_impl.3
= control target key start
LH: loop header
LB: loop body
LE: loop exit
PB: predicated region body
PF: predicated region fallthrough
CT: control target
= control target key end

     0   :  { %9 = vsyncpa [#allocation3], 0  ;;  %s4115_s0 = inlined_call_operand.vmem [shape: f32[2,2,4,4], index: 0, kind: input, shape index: {}]   ;;  %s4116_s1 = inlined_call_operand.vmem [shape: bf16[4,512], index: 1, kind: input, shape index: {}]   ;;  %s4117_s2 = inlined_call_operand.hbm [shape: f32[2,1,512,512], index: 2, kind: output, shape index: {0}]   ;;  %s4118_s3 = inlined_call_operand.hbm [shape: f32[2,1,512,512], index: 3, kind: output, shape index: {1}]  }
   0x1   :  { %11 = vsyncpa [#allocation3 + $0x1], 0 }
   0x2   :  { %12 = vsyncpa [#allocation5], 0 }
   0x3   :  { %14 = vsyncpa [#allocation5 + $0x1], 0  ;;  %s2969_s12 = smov 0   ;;  %s2971_s13 = smov 0  }
   0x4   :  { %s2973_s14 = smov 0   ;;  %s2975_s15 = smov 0  }
   0x5 LB: > { %s2990_s16 = sadd.s32 4294967295, %s2941_s15   ;;  %s2638_s17 = sadd.s32 4294967294, %s2941_s15   ;;  %s2941_s15 = sphi %s2975_s15, %s4124_s15   ;;  %s2937_s14 = sphi %s2973_s14, %s4123_s14   ;;  %s2933_s13 = sphi %s2971_s13, %s4122_s13   ;;  %s2929_s12 = sphi %s2969_s12, %s4121_s12  }
   0x6   : > { %s2994_s18 = sadd.s32 1, %s2941_s15   ;;  %s74_s19 = sadd.s32 1, %s2937_s14 }
   0x7   : > { %s71_s20 = ssub.s32 %s2941_s15, %s2994_s18  ;;  %p84_p0 = scmp.ne.s32.totalorder %s2937_s14, %s2933_s13 }
   0x8   : > { %p72_p1 = scmp.eq.s32.totalorder %s71_s20, 0  ;;  %p85_p2 = scmp.eq.s32.totalorder %s2990_s16, 1 }
   0x9   : > { %p90_p3 = scmp.ne.s32.totalorder %s2933_s13, %s2929_s12  ;;  %p91_p4 = scmp.eq.s32.totalorder %s2638_s17, 1 }
   0xa   : > { %s3005_s21 = scalar_select %p72_p1, %s2937_s14, %s74_s19  }
   0xb   : > { %p3007_p5 = por %p85_p2, %p84_p0  ;;  %p3011_p6 = por %p91_p4, %p90_p3 }
   0xc   : > { %p2641_p7 = scmp.ge.s32.totalorder %s2941_s15, 1  ;;  %p146_p8 = scmp.lt.s32.totalorder %s2941_s15, 3 }
   0xe   : > { %p147_p9 = pnand %p2641_p7, %p146_p8 }
   0xf   : > { %v181_v0 = vld [vmem:[%s4116_s1] sm:$0xff] (!%p147_p9)  ;;  %v189_v1 = vlaneseq (!%p147_p9)  ;;  %p175_p10 = scmp.lt.s32.totalorder (!%p147_p9), %s2990_s16, 1  ;;  %v2943_v2 = vmov (!%p147_p9), 1983009808   ;;  %v2944_v4 = vmov (!%p147_p9), 0   ;;  %vm206_vm0 = vcmask (!%p147_p9), 1041408  }
  0x10   : > { %150 = sbr.rel (%p147_p9) target bundleno = 1201 (0x4b1), region = 28  ;;  %v187_v3 = vunpack.c.l.s4 (!%p147_p9), %v2943_v2  ;;  %251 = vmatprep.mubr.bf16.mxu0 (!%p147_p9), %v2944_v4  ;;  %292 = vmatprep.mubr.bf16.mxu1 (!%p147_p9), %v2944_v4  ;;  %v185_v7 = vcombine.high (!%p147_p9), %v181_v0, %v181_v0  ;;  %vm202_vm1 = vcmask (!%p147_p9), 31744   ;;  %s3253_s4 = sand.u32 (!%p147_p9), 1, %s2933_s13  }
  0x11   : > { %v190_v5 = vshrl.u32 (!%p147_p9), %v189_v1, 7  ;;  %s2642_s5 = sshll.u32 (!%p147_p9), %s3253_s4, 11  ;;  %s2796_s8 = sshll.u32 (!%p147_p9), %s2990_s16, 15 }
  0x12   : > { %v188_v6 = vunpack.c.0.s8 (!%p147_p9), %v187_v3  ;;  %s3268_s6 = scalar_lea.vmem (!%p147_p9), [#allocation2], %s2642_s5  ;;  %s3737_s7 = scalar_lea.vmem (!%p147_p9), [#allocation4], %s2642_s5 }
  0x13   : > { %s2528_s9 = sshll.u32 (!%p147_p9), %s3268_s6, 4  ;;  %s3902_s17 = scalar_lea.hbm (!%p147_p9), %s4117_s2, %s2796_s8  ;;  %s3904_s9 = int_to_ptr.vmem [resolvable:$true] %s2528_s9 }
  0x14   : > { %v191_v8 = vsub.s32 (!%p147_p9), %v188_v6, %v190_v5  ;;  %s2510_s19 = scalar_lea.sflag (!%p147_p9), [#allocation3], %s3253_s4  ;;  %s2847_s20 = scalar_lea.vmem (!%p147_p9), %s3904_s9, 32768 }
  0x15   : > { %p2848_p11 = scmp.ne.s32.totalorder (!%p147_p9), %s3904_s9, %s2847_s20  ;;  %s2945_s24 = smov (!%p147_p9), [#allocation2]  }
  0x16   : > { %v192_v9 = vrot.slane (!%p147_p9), %v181_v0, %v191_v8  ;;  %v199_v10 = vrot.slane (!%p147_p9), %v185_v7, %v191_v8  ;;  %s2851_s25 = sshll.u32 (!%p147_p9), %s2945_s24, 4  ;;  %s2852_s25 = int_to_ptr.vmem [resolvable:$false] %s2851_s25 }
  0x17   : > { %s176_s26 = scalar_select %p175_p10, %s2990_s16, 1 }
  0x18   : > { %v200_v12 = vcombine.high %v192_v9, %v192_v9  ;;  %v201_v13 = vcombine.high %v199_v10, %v199_v10  ;;  %v208_v14 = vsel %vm206_vm0, %v192_v9, 0  ;;  %v214_v15 = vsel %vm206_vm0, %v199_v10, 0  ;;  %309 = vxpose.xlu0.c.b16.start.end [1/1] (short) %v192_v9, 128  ;;  %341 = vxpose.xlu1.c.b16.start.end [1/1] (short) %v199_v10, 128  ;;  %p2849_p12 = pnand %p2848_p11, %p3007_p5  ;;  %p2854_p0 = scmp.lt.s32.totalorder %s3904_s9, %s2852_s25 }
  0x19   : > { %s2795_s27 = sshll.u32 %s176_s26, 3  ;;  %s2853_s26 = scalar_lea.vmem %s2852_s25, 65536 }
  0x1a   : > { %s3027_s30 = scalar_lea.vmem %s4115_s0, %s2795_s27  ;;  %2646 = vmatprep.subr.msk.bf16.mxu0 %vm206_vm0, %v200_v12  ;;  %2648 = vmatprep.subr.msk.bf16.mxu1 %vm206_vm0, %v201_v13  ;;  %p2850_p13 = pneg %p2849_p12 }
  0x1b   : > { %v182_v11 = vld [vmem:[%s3027_s30] sm:$0xf]  ;;  %220 = vmatpush1.bf16.msra.mxu0 %v208_v14  ;;  %261 = vmatpush1.bf16.msra.mxu1 %v214_v15  ;;  %p2855_p1 = scmp.lt.s32.totalorder %s2853_s26, %s2847_s20 }
  0x1c   : > { %v183_v16 = vpack.c.bf16 %v182_v11, %v182_v11 }
  0x1d   : > { %p2856_p2 = por %p2855_p1, %p2854_p0 }
  0x1e   : > { %2647 = vmatmul.mubr.msk.bf16.vlgmr.msra.gmra.mrb[0].mxu0 %vm202_vm1, %v183_v16  ;;  %2649 = vmatmul.mubr.msk.bf16.vlgmr.msra.gmra.mrb[0].mxu1 %vm202_vm1, %v183_v16 }
  0x1f   : > { %513 = vmatprep.mubr.bf16.mxu0 %v2944_v4  ;;  %866 = vmatprep.mubr.bf16.mxu1 %v2944_v4  ;;  %p2857_p3 = pnand %p2856_p2, %p2850_p13 }
  0x35   : > { %325 = vxpose.xlu0.c.b16.start.end [1/1] (short) %v200_v12, 128  ;;  %357 = vxpose.xlu1.c.b16.start.end [1/1] (short) %v201_v13, 128 }
  0x7e   : > { %v3042_v31 = vpop.trf.xlu0  ;;  %v3172_v47 = vpop.trf.xlu1 }
  0x82   : > { %v3052_v32 = vpop.trf.xlu0  ;;  %v3180_v48 = vpop.trf.xlu1 }
  0x86   : > { %v3060_v33 = vpop.trf.xlu0  ;;  %v3188_v49 = vpop.trf.xlu1 }
  0x8a   : > { %v3068_v34 = vpop.trf.xlu0  ;;  %v3196_v50 = vpop.trf.xlu1 }
  0x8e   : > { %v3076_v35 = vpop.trf.xlu0  ;;  %v3204_v51 = vpop.trf.xlu1 }
  0x92   : > { %v3084_v36 = vpop.trf.xlu0  ;;  %v3212_v52 = vpop.trf.xlu1 }
  0x96   : > { %v3092_v37 = vpop.trf.xlu0  ;;  %v3220_v53 = vpop.trf.xlu1 }
  0x9a   : > { %v3100_v38 = vpop.trf.xlu0  ;;  %v3228_v54 = vpop.trf.xlu1 }
  0x9e   : > { %v3108_v39 = vpop.trf.xlu0  ;;  %v3236_v55 = vpop.trf.xlu1 }
  0xa2   : > { %v3116_v40 = vpop.trf.xlu0  ;;  %v3244_v56 = vpop.trf.xlu1 }
  0xa6   : > { %v3124_v41 = vpop.trf.xlu0  ;;  %v3255_v57 = vpop.trf.xlu1 }
  0xaa   : > { %v3132_v42 = vpop.trf.xlu0  ;;  %v3264_v58 = vpop.trf.xlu1 }
  0xae   : > { %v3140_v43 = vpop.trf.xlu0  ;;  %v3284_v3 = vpop.trf.xlu1 }
  0xb2   : > { %v3148_v44 = vpop.trf.xlu0 }
  0xb6   : > { %v3156_v45 = vpop.trf.xlu0 }
  0xba   : > { %v3164_v46 = vpop.trf.xlu0 }
  0xf1   : > { %v253_v17 = vpop.f32.mrb[0].mxu0  ;;  %v294_v18 = vpop.f32.mrb[0].mxu1 }
  0xf2   : > { %v301_v19 = vpack.c.bf16 %v253_v17, %v253_v17  ;;  %v303_v20 = vpack.c.bf16 %v294_v18, %v294_v18  ;;  %v255_v21 = vpop.f32.mrb[1].mxu0  ;;  %v296_v22 = vpop.f32.mrb[1].mxu1 }
  0xf3   : > { %v302_v23 = vpack.c.bf16 %v255_v21, %v255_v21  ;;  %v304_v24 = vpack.c.bf16 %v296_v22, %v296_v22  ;;  %v257_v25 = vpop.f32.mrb[2].mxu0  ;;  %v298_v26 = vpop.f32.mrb[2].mxu1 }
  0xf4   : > { %v258_v27 = vpop.f32.mrb[3].mxu0  ;;  %v299_v28 = vpop.f32.mrb[3].mxu1  ;;  %v470_v29 = vsel %vm206_vm0, %v301_v19, 0  ;;  %v476_v30 = vsel %vm206_vm0, %v303_v20, 0 }
  0xf5   : > { %2650 = vmatprep.subr.msk.bf16.mxu0 %vm206_vm0, %v302_v23  ;;  %2683 = vmatprep.subr.msk.bf16.mxu1 %vm206_vm0, %v304_v24 }
  0xf6   : > { %482 = vmatpush1.bf16.msra.mxu0 %v470_v29  ;;  %835 = vmatpush1.bf16.msra.mxu1 %v476_v30 }
  0xf7   : > { %2717 = vmatprep.subr.msk.bf16.mxu0 %vm206_vm0, %v200_v12  ;;  %2719 = vmatprep.subr.msk.bf16.mxu1 %vm206_vm0, %v201_v13  ;;  %v3300_v13 = vpop.trf.xlu1 }
  0xf9   : > { %2651 = vmatmul.mubr.msk.bf16.vlgmr.msra.gmra.mrb[4].mxu0 %vm202_vm1, %v3042_v31  ;;  %2684 = vmatmul.mubr.msk.bf16.vlgmr.msra.gmra.mrb[4].mxu1 %vm202_vm1, %v3042_v31 }
  0xfa   : > { %1450 = vmatpush1.bf16.msra.mxu0 %v208_v14  ;;  %1491 = vmatpush1.bf16.msra.mxu1 %v214_v15 }
  0xfb   : > { %523 = vmatprep.mubr.bf16.mxu0 %v2944_v4  ;;  %876 = vmatprep.mubr.bf16.mxu1 %v2944_v4  ;;  %v3316_v22 = vpop.trf.xlu1 }
 0x101   : > { %2652 = vmatmul.mubr.msk.bf16.gmra.mrb[8].mxu0 %vm202_vm1, %v3052_v32  ;;  %2685 = vmatmul.mubr.msk.bf16.gmra.mrb[8].mxu1 %vm202_vm1, %v3052_v32 }
 0x102   : > { %533 = vmatprep.mubr.bf16.mxu0 %v2944_v4  ;;  %886 = vmatprep.mubr.bf16.mxu1 %v2944_v4 }
 0x109   : > { %2653 = vmatmul.mubr.msk.bf16.gmra.mrb[12].mxu0 %vm202_vm1, %v3060_v33  ;;  %2686 = vmatmul.mubr.msk.bf16.gmra.mrb[12].mxu1 %vm202_vm1, %v3060_v33 }
 0x10a   : > { %543 = vmatprep.mubr.bf16.mxu0 %v2944_v4  ;;  %896 = vmatprep.mubr.bf16.mxu1 %v2944_v4 }
 0x111   : > { %2654 = vmatmul.mubr.msk.bf16.gmra.mrb[16].mxu0 %vm202_vm1, %v3068_v34  ;;  %2687 = vmatmul.mubr.msk.bf16.gmra.mrb[16].mxu1 %vm202_vm1, %v3068_v34 }
 0x112   : > { %553 = vmatprep.mubr.bf16.mxu0 %v2944_v4  ;;  %906 = vmatprep.mubr.bf16.mxu1 %v2944_v4 }
 0x119   : > { %2655 = vmatmul.mubr.msk.bf16.gmra.mrb[20].mxu0 %vm202_vm1, %v3076_v35  ;;  %2688 = vmatmul.mubr.msk.bf16.gmra.mrb[20].mxu1 %vm202_vm1, %v3076_v35 }
 0x11a   : > { %563 = vmatprep.mubr.bf16.mxu0 %v2944_v4  ;;  %916 = vmatprep.mubr.bf16.mxu1 %v2944_v4 }
 0x121   : > { %2656 = vmatmul.mubr.msk.bf16.gmra.mrb[24].mxu0 %vm202_vm1, %v3084_v36  ;;  %2689 = vmatmul.mubr.msk.bf16.gmra.mrb[24].mxu1 %vm202_vm1, %v3084_v36 }
 0x122   : > { %573 = vmatprep.mubr.bf16.mxu0 %v2944_v4  ;;  %926 = vmatprep.mubr.bf16.mxu1 %v2944_v4 }
 0x129   : > { %2657 = vmatmul.mubr.msk.bf16.gmra.mrb[28].mxu0 %vm202_vm1, %v3092_v37  ;;  %2690 = vmatmul.mubr.msk.bf16.gmra.mrb[28].mxu1 %vm202_vm1, %v3092_v37 }
 0x12a   : > { %583 = vmatprep.mubr.bf16.mxu0 %v2944_v4  ;;  %936 = vmatprep.mubr.bf16.mxu1 %v2944_v4 }
 0x131   : > { %2658 = vmatmul.mubr.msk.bf16.gmra.mrb[32].mxu0 %vm202_vm1, %v3100_v38  ;;  %2691 = vmatmul.mubr.msk.bf16.gmra.mrb[32].mxu1 %vm202_vm1, %v3100_v38 }
 0x132   : > { %593 = vmatprep.mubr.bf16.mxu0 %v2944_v4  ;;  %946 = vmatprep.mubr.bf16.mxu1 %v2944_v4 }
 0x139   : > { %2659 = vmatmul.mubr.msk.bf16.gmra.mrb[36].mxu0 %vm202_vm1, %v3108_v39  ;;  %2692 = vmatmul.mubr.msk.bf16.gmra.mrb[36].mxu1 %vm202_vm1, %v3108_v39 }
 0x13a   : > { %603 = vmatprep.mubr.bf16.mxu0 %v2944_v4  ;;  %956 = vmatprep.mubr.bf16.mxu1 %v2944_v4 }
 0x141   : > { %2660 = vmatmul.mubr.msk.bf16.gmra.mrb[40].mxu0 %vm202_vm1, %v3116_v40  ;;  %2693 = vmatmul.mubr.msk.bf16.gmra.mrb[40].mxu1 %vm202_vm1, %v3116_v40 }
 0x142   : > { %613 = vmatprep.mubr.bf16.mxu0 %v2944_v4  ;;  %966 = vmatprep.mubr.bf16.mxu1 %v2944_v4 }
 0x149   : > { %2661 = vmatmul.mubr.msk.bf16.gmra.mrb[44].mxu0 %vm202_vm1, %v3124_v41  ;;  %2694 = vmatmul.mubr.msk.bf16.gmra.mrb[44].mxu1 %vm202_vm1, %v3124_v41 }
 0x14a   : > { %623 = vmatprep.mubr.bf16.mxu0 %v2944_v4  ;;  %976 = vmatprep.mubr.bf16.mxu1 %v2944_v4 }
 0x151   : > { %2662 = vmatmul.mubr.msk.bf16.gmra.mrb[48].mxu0 %vm202_vm1, %v3132_v42  ;;  %2695 = vmatmul.mubr.msk.bf16.gmra.mrb[48].mxu1 %vm202_vm1, %v3132_v42 }
 0x152   : > { %633 = vmatprep.mubr.bf16.mxu0 %v2944_v4  ;;  %986 = vmatprep.mubr.bf16.mxu1 %v2944_v4 }
 0x159   : > { %2663 = vmatmul.mubr.msk.bf16.gmra.mrb[52].mxu0 %vm202_vm1, %v3140_v43  ;;  %2696 = vmatmul.mubr.msk.bf16.gmra.mrb[52].mxu1 %vm202_vm1, %v3140_v43 }
 0x15a   : > { %643 = vmatprep.mubr.bf16.mxu0 %v2944_v4  ;;  %996 = vmatprep.mubr.bf16.mxu1 %v2944_v4 }
 0x161   : > { %2664 = vmatmul.mubr.msk.bf16.gmra.mrb[56].mxu0 %vm202_vm1, %v3148_v44  ;;  %2697 = vmatmul.mubr.msk.bf16.gmra.mrb[56].mxu1 %vm202_vm1, %v3148_v44 }
 0x162   : > { %653 = vmatprep.mubr.bf16.mxu0 %v2944_v4  ;;  %1006 = vmatprep.mubr.bf16.mxu1 %v2944_v4 }
 0x169   : > { %2665 = vmatmul.mubr.msk.bf16.gmra.mrb[60].mxu0 %vm202_vm1, %v3156_v45  ;;  %2698 = vmatmul.mubr.msk.bf16.gmra.mrb[60].mxu1 %vm202_vm1, %v3156_v45 }
 0x16a   : > { %663 = vmatprep.mubr.bf16.mxu0 %v2944_v4  ;;  %1016 = vmatprep.mubr.bf16.mxu1 %v2944_v4 }
 0x171   : > { %2666 = vmatmul.mubr.msk.bf16.gmra.mrb[64].mxu0 %vm202_vm1, %v3164_v46  ;;  %2699 = vmatmul.mubr.msk.bf16.gmra.mrb[64].mxu1 %vm202_vm1, %v3164_v46 }
 0x172   : > { %673 = vmatprep.mubr.bf16.mxu0 %v2944_v4  ;;  %1026 = vmatprep.mubr.bf16.mxu1 %v2944_v4 }
 0x179   : > { %2667 = vmatmul.mubr.msk.bf16.gmra.mrb[68].mxu0 %vm202_vm1, %v3172_v47  ;;  %2700 = vmatmul.mubr.msk.bf16.gmra.mrb[68].mxu1 %vm202_vm1, %v3172_v47 }
 0x17a   : > { %683 = vmatprep.mubr.bf16.mxu0 %v2944_v4  ;;  %1036 = vmatprep.mubr.bf16.mxu1 %v2944_v4 }
 0x181   : > { %2668 = vmatmul.mubr.msk.bf16.gmra.mrb[72].mxu0 %vm202_vm1, %v3180_v48  ;;  %2701 = vmatmul.mubr.msk.bf16.gmra.mrb[72].mxu1 %vm202_vm1, %v3180_v48 }
 0x182   : > { %693 = vmatprep.mubr.bf16.mxu0 %v2944_v4  ;;  %1046 = vmatprep.mubr.bf16.mxu1 %v2944_v4 }
 0x189   : > { %2669 = vmatmul.mubr.msk.bf16.gmra.mrb[76].mxu0 %vm202_vm1, %v3188_v49  ;;  %2702 = vmatmul.mubr.msk.bf16.gmra.mrb[76].mxu1 %vm202_vm1, %v3188_v49 }
 0x18a   : > { %703 = vmatprep.mubr.bf16.mxu0 %v2944_v4  ;;  %1056 = vmatprep.mubr.bf16.mxu1 %v2944_v4 }
 0x191   : > { %2670 = vmatmul.mubr.msk.bf16.gmra.mrb[80].mxu0 %vm202_vm1, %v3196_v50  ;;  %2703 = vmatmul.mubr.msk.bf16.gmra.mrb[80].mxu1 %vm202_vm1, %v3196_v50 }
 0x192   : > { %713 = vmatprep.mubr.bf16.mxu0 %v2944_v4  ;;  %1066 = vmatprep.mubr.bf16.mxu1 %v2944_v4 }
 0x199   : > { %2671 = vmatmul.mubr.msk.bf16.gmra.mrb[84].mxu0 %vm202_vm1, %v3204_v51  ;;  %2704 = vmatmul.mubr.msk.bf16.gmra.mrb[84].mxu1 %vm202_vm1, %v3204_v51 }
 0x19a   : > { %723 = vmatprep.mubr.bf16.mxu0 %v2944_v4  ;;  %1076 = vmatprep.mubr.bf16.mxu1 %v2944_v4 }
 0x1a1   : > { %2672 = vmatmul.mubr.msk.bf16.gmra.mrb[88].mxu0 %vm202_vm1, %v3212_v52  ;;  %2705 = vmatmul.mubr.msk.bf16.gmra.mrb[88].mxu1 %vm202_vm1, %v3212_v52 }
 0x1a2   : > { %733 = vmatprep.mubr.bf16.mxu0 %v2944_v4  ;;  %1086 = vmatprep.mubr.bf16.mxu1 %v2944_v4 }
 0x1a9   : > { %2673 = vmatmul.mubr.msk.bf16.gmra.mrb[92].mxu0 %vm202_vm1, %v3220_v53  ;;  %2706 = vmatmul.mubr.msk.bf16.gmra.mrb[92].mxu1 %vm202_vm1, %v3220_v53 }
 0x1aa   : > { %743 = vmatprep.mubr.bf16.mxu0 %v2944_v4  ;;  %1096 = vmatprep.mubr.bf16.mxu1 %v2944_v4 }
 0x1b1   : > { %2674 = vmatmul.mubr.msk.bf16.gmra.mrb[96].mxu0 %vm202_vm1, %v3228_v54  ;;  %2707 = vmatmul.mubr.msk.bf16.gmra.mrb[96].mxu1 %vm202_vm1, %v3228_v54 }
 0x1b2   : > { %753 = vmatprep.mubr.bf16.mxu0 %v2944_v4  ;;  %1106 = vmatprep.mubr.bf16.mxu1 %v2944_v4 }
 0x1b9   : > { %2675 = vmatmul.mubr.msk.bf16.gmra.mrb[100].mxu0 %vm202_vm1, %v3236_v55  ;;  %2708 = vmatmul.mubr.msk.bf16.gmra.mrb[100].mxu1 %vm202_vm1, %v3236_v55 }
 0x1ba   : > { %763 = vmatprep.mubr.bf16.mxu0 %v2944_v4  ;;  %1116 = vmatprep.mubr.bf16.mxu1 %v2944_v4 }
 0x1c1   : > { %2676 = vmatmul.mubr.msk.bf16.gmra.mrb[104].mxu0 %vm202_vm1, %v3244_v56  ;;  %2709 = vmatmul.mubr.msk.bf16.gmra.mrb[104].mxu1 %vm202_vm1, %v3244_v56 }
 0x1c2   : > { %773 = vmatprep.mubr.bf16.mxu0 %v2944_v4  ;;  %1126 = vmatprep.mubr.bf16.mxu1 %v2944_v4 }
 0x1c9   : > { %2677 = vmatmul.mubr.msk.bf16.gmra.mrb[108].mxu0 %vm202_vm1, %v3255_v57  ;;  %2710 = vmatmul.mubr.msk.bf16.gmra.mrb[108].mxu1 %vm202_vm1, %v3255_v57 }
 0x1ca   : > { %783 = vmatprep.mubr.bf16.mxu0 %v2944_v4  ;;  %1136 = vmatprep.mubr.bf16.mxu1 %v2944_v4 }
 0x1cc   : > { %v515_v59 = vpop.f32.mrb[4].mxu0  ;;  %v868_v60 = vpop.f32.mrb[4].mxu1 }
 0x1cd   : > { %1187 = vst [vmem:[%s3268_s6] sm:$0xff] %v515_v59  ;;  %1189 = vst [vmem:[%s3268_s6 + $0x10] sm:$0xff] %v868_v60  ;;  %v517_v61 = vpop.f32.mrb[5].mxu0  ;;  %v870_v62 = vpop.f32.mrb[5].mxu1 }
 0x1ce   : > { %1188 = vst [vmem:[%s3268_s6 + $0x8] sm:$0xff] %v517_v61  ;;  %1190 = vst [vmem:[%s3268_s6 + $0x18] sm:$0xff] %v870_v62  ;;  %v519_v63 = vpop.f32.mrb[6].mxu0  ;;  %v872_v0 = vpop.f32.mrb[6].mxu1 }
 0x1cf   : > { %1191 = vst [vmem:[%s3268_s6 + $0x20] sm:$0xff] %v519_v63  ;;  %1193 = vst [vmem:[%s3268_s6 + $0x30] sm:$0xff] %v872_v0  ;;  %v521_v1 = vpop.f32.mrb[7].mxu0  ;;  %v874_v2 = vpop.f32.mrb[7].mxu1 }
 0x1d0   : > { %1192 = vst [vmem:[%s3268_s6 + $0x28] sm:$0xff] %v521_v1  ;;  %1194 = vst [vmem:[%s3268_s6 + $0x38] sm:$0xff] %v874_v2  ;;  %v3332_v59 = vpop.trf.xlu1 }
 0x1d1   : > { %2678 = vmatmul.mubr.msk.bf16.gmra.mrb[112].mxu0 %vm202_vm1, %v3264_v58  ;;  %2711 = vmatmul.mubr.msk.bf16.gmra.mrb[112].mxu1 %vm202_vm1, %v3264_v58 }
 0x1d2   : > { %793 = vmatprep.mubr.bf16.mxu0 %v2944_v4  ;;  %1146 = vmatprep.mubr.bf16.mxu1 %v2944_v4 }
 0x1d4   : > { %v525_v5 = vpop.f32.mrb[8].mxu0  ;;  %v878_v6 = vpop.f32.mrb[8].mxu1 }
 0x1d5   : > { %1195 = vst [vmem:[%s3268_s6 + $0x40] sm:$0xff] %v525_v5  ;;  %1197 = vst [vmem:[%s3268_s6 + $0x50] sm:$0xff] %v878_v6  ;;  %v527_v7 = vpop.f32.mrb[9].mxu0  ;;  %v880_v8 = vpop.f32.mrb[9].mxu1  ;;  %v2716_v6 = vld [vmem:[%s3027_s30 + $0x4] sm:$0xf] }
 0x1d6   : > { %1196 = vst [vmem:[%s3268_s6 + $0x48] sm:$0xff] %v527_v7  ;;  %1198 = vst [vmem:[%s3268_s6 + $0x58] sm:$0xff] %v880_v8  ;;  %v529_v9 = vpop.f32.mrb[10].mxu0  ;;  %v882_v10 = vpop.f32.mrb[10].mxu1 }
 0x1d7   : > { %1199 = vst [vmem:[%s3268_s6 + $0x60] sm:$0xff] %v529_v9  ;;  %1201 = vst [vmem:[%s3268_s6 + $0x70] sm:$0xff] %v882_v10  ;;  %v531_v11 = vpop.f32.mrb[11].mxu0  ;;  %v884_v12 = vpop.f32.mrb[11].mxu1  ;;  %v1445_v9 = vpack.c.bf16 %v2716_v6, %v2716_v6 }
 0x1d8   : > { %1200 = vst [vmem:[%s3268_s6 + $0x68] sm:$0xff] %v531_v11  ;;  %1202 = vst [vmem:[%s3268_s6 + $0x78] sm:$0xff] %v884_v12 }
 0x1d9   : > { %2679 = vmatmul.mubr.msk.bf16.gmra.mrb[116].mxu0 %vm202_vm1, %v3284_v3  ;;  %2712 = vmatmul.mubr.msk.bf16.gmra.mrb[116].mxu1 %vm202_vm1, %v3284_v3 }
 0x1da   : > { %803 = vmatprep.mubr.bf16.mxu0 %v2944_v4  ;;  %1156 = vmatprep.mubr.bf16.mxu1 %v2944_v4 }
 0x1dc   : > { %v535_v14 = vpop.f32.mrb[12].mxu0  ;;  %v888_v15 = vpop.f32.mrb[12].mxu1 }
 0x1dd   : > { %1203 = vst [vmem:[%s3268_s6 + $0x80] sm:$0xff] %v535_v14  ;;  %1205 = vst [vmem:[%s3268_s6 + $0x90] sm:$0xff] %v888_v15  ;;  %v537_v16 = vpop.f32.mrb[13].mxu0  ;;  %v890_v17 = vpop.f32.mrb[13].mxu1 }
 0x1de   : > { %1204 = vst [vmem:[%s3268_s6 + $0x88] sm:$0xff] %v537_v16  ;;  %1206 = vst [vmem:[%s3268_s6 + $0x98] sm:$0xff] %v890_v17  ;;  %v539_v18 = vpop.f32.mrb[14].mxu0  ;;  %v892_v19 = vpop.f32.mrb[14].mxu1 }
 0x1df   : > { %1207 = vst [vmem:[%s3268_s6 + $0xa0] sm:$0xff] %v539_v18  ;;  %1209 = vst [vmem:[%s3268_s6 + $0xb0] sm:$0xff] %v892_v19  ;;  %v541_v20 = vpop.f32.mrb[15].mxu0  ;;  %v894_v21 = vpop.f32.mrb[15].mxu1 }
 0x1e0   : > { %1208 = vst [vmem:[%s3268_s6 + $0xa8] sm:$0xff] %v541_v20  ;;  %1210 = vst [vmem:[%s3268_s6 + $0xb8] sm:$0xff] %v894_v21 }
 0x1e1   : > { %2680 = vmatmul.mubr.msk.bf16.gmra.mrb[120].mxu0 %vm202_vm1, %v3300_v13  ;;  %2713 = vmatmul.mubr.msk.bf16.gmra.mrb[120].mxu1 %vm202_vm1, %v3300_v13 }
 0x1e2   : > { %813 = vmatprep.mubr.bf16.mxu0 %v2944_v4  ;;  %1166 = vmatprep.mubr.bf16.mxu1 %v2944_v4 }
 0x1e4   : > { %v545_v23 = vpop.f32.mrb[16].mxu0  ;;  %v898_v24 = vpop.f32.mrb[16].mxu1 }
 0x1e5   : > { %1211 = vst [vmem:[%s3268_s6 + $0xc0] sm:$0xff] %v545_v23  ;;  %1213 = vst [vmem:[%s3268_s6 + $0xd0] sm:$0xff] %v898_v24  ;;  %v547_v25 = vpop.f32.mrb[17].mxu0  ;;  %v900_v26 = vpop.f32.mrb[17].mxu1 }
 0x1e6   : > { %1212 = vst [vmem:[%s3268_s6 + $0xc8] sm:$0xff] %v547_v25  ;;  %1214 = vst [vmem:[%s3268_s6 + $0xd8] sm:$0xff] %v900_v26  ;;  %v549_v27 = vpop.f32.mrb[18].mxu0  ;;  %v902_v28 = vpop.f32.mrb[18].mxu1 }
 0x1e7   : > { %1215 = vst [vmem:[%s3268_s6 + $0xe0] sm:$0xff] %v549_v27  ;;  %1217 = vst [vmem:[%s3268_s6 + $0xf0] sm:$0xff] %v902_v28  ;;  %v551_v29 = vpop.f32.mrb[19].mxu0  ;;  %v904_v30 = vpop.f32.mrb[19].mxu1 }
 0x1e8   : > { %1216 = vst [vmem:[%s3268_s6 + $0xe8] sm:$0xff] %v551_v29  ;;  %1218 = vst [vmem:[%s3268_s6 + $0xf8] sm:$0xff] %v904_v30 }
 0x1e9   : > { %2681 = vmatmul.mubr.msk.bf16.gmra.mrb[124].mxu0 %vm202_vm1, %v3316_v22  ;;  %2714 = vmatmul.mubr.msk.bf16.gmra.mrb[124].mxu1 %vm202_vm1, %v3316_v22 }
 0x1ea   : > { %823 = vmatprep.mubr.bf16.mxu0 %v2944_v4  ;;  %1176 = vmatprep.mubr.bf16.mxu1 %v2944_v4 }
 0x1ec   : > { %v555_v60 = vpop.f32.mrb[20].mxu0  ;;  %v908_v61 = vpop.f32.mrb[20].mxu1 }
 0x1ed   : > { %1219 = vst [vmem:[%s3268_s6 + $0x100] sm:$0xff] %v555_v60  ;;  %1221 = vst [vmem:[%s3268_s6 + $0x110] sm:$0xff] %v908_v61  ;;  %v557_v62 = vpop.f32.mrb[21].mxu0  ;;  %v910_v63 = vpop.f32.mrb[21].mxu1 }
 0x1ee   : > { %1220 = vst [vmem:[%s3268_s6 + $0x108] sm:$0xff] %v557_v62  ;;  %1222 = vst [vmem:[%s3268_s6 + $0x118] sm:$0xff] %v910_v63  ;;  %v559_v0 = vpop.f32.mrb[22].mxu0  ;;  %v912_v1 = vpop.f32.mrb[22].mxu1 }
 0x1ef   : > { %1223 = vst [vmem:[%s3268_s6 + $0x120] sm:$0xff] %v559_v0  ;;  %1225 = vst [vmem:[%s3268_s6 + $0x130] sm:$0xff] %v912_v1  ;;  %v561_v2 = vpop.f32.mrb[23].mxu0  ;;  %v914_v5 = vpop.f32.mrb[23].mxu1 }
 0x1f0   : > { %1224 = vst [vmem:[%s3268_s6 + $0x128] sm:$0xff] %v561_v2  ;;  %1226 = vst [vmem:[%s3268_s6 + $0x138] sm:$0xff] %v914_v5 }
 0x1f1   : > { %2682 = vmatmul.mubr.msk.bf16.gmra.mrb[128].mxu0 %vm202_vm1, %v3332_v59  ;;  %2715 = vmatmul.mubr.msk.bf16.gmra.mrb[128].mxu1 %vm202_vm1, %v3332_v59 }
 0x1f2   : > { %1481 = vmatprep.mubr.bf16.mxu0 %v2944_v4  ;;  %1522 = vmatprep.mubr.bf16.mxu1 %v2944_v4 }
 0x1f4   : > { %v565_v7 = vpop.f32.mrb[24].mxu0  ;;  %v918_v8 = vpop.f32.mrb[24].mxu1 }
 0x1f5   : > { %1227 = vst [vmem:[%s3268_s6 + $0x140] sm:$0xff] %v565_v7  ;;  %1229 = vst [vmem:[%s3268_s6 + $0x150] sm:$0xff] %v918_v8  ;;  %v567_v10 = vpop.f32.mrb[25].mxu0  ;;  %v920_v11 = vpop.f32.mrb[25].mxu1 }
 0x1f6   : > { %1228 = vst [vmem:[%s3268_s6 + $0x148] sm:$0xff] %v567_v10  ;;  %1230 = vst [vmem:[%s3268_s6 + $0x158] sm:$0xff] %v920_v11  ;;  %v569_v12 = vpop.f32.mrb[26].mxu0  ;;  %v922_v14 = vpop.f32.mrb[26].mxu1 }
 0x1f7   : > { %1231 = vst [vmem:[%s3268_s6 + $0x160] sm:$0xff] %v569_v12  ;;  %1233 = vst [vmem:[%s3268_s6 + $0x170] sm:$0xff] %v922_v14  ;;  %v571_v15 = vpop.f32.mrb[27].mxu0  ;;  %v924_v16 = vpop.f32.mrb[27].mxu1 }
 0x1f8   : > { %1232 = vst [vmem:[%s3268_s6 + $0x168] sm:$0xff] %v571_v15  ;;  %1234 = vst [vmem:[%s3268_s6 + $0x178] sm:$0xff] %v924_v16 }
 0x1f9   : > { %2718 = vmatmul.mubr.msk.bf16.vlgmr.msra.gmra.mrb[132].mxu0 %vm202_vm1, %v1445_v9  ;;  %2720 = vmatmul.mubr.msk.bf16.vlgmr.msra.gmra.mrb[132].mxu1 %vm202_vm1, %v1445_v9 }
 0x1fa   : > { %1579 = vmatprep.mubr.bf16.mxu0 %v2944_v4  ;;  %1932 = vmatprep.mubr.bf16.mxu1 %v2944_v4 }
 0x1fc   : > { %v575_v17 = vpop.f32.mrb[28].mxu0  ;;  %v928_v18 = vpop.f32.mrb[28].mxu1 }
 0x1fd   : > { %1235 = vst [vmem:[%s3268_s6 + $0x180] sm:$0xff] %v575_v17  ;;  %1237 = vst [vmem:[%s3268_s6 + $0x190] sm:$0xff] %v928_v18  ;;  %v577_v19 = vpop.f32.mrb[29].mxu0  ;;  %v930_v20 = vpop.f32.mrb[29].mxu1 }
 0x1fe   : > { %1236 = vst [vmem:[%s3268_s6 + $0x188] sm:$0xff] %v577_v19  ;;  %1238 = vst [vmem:[%s3268_s6 + $0x198] sm:$0xff] %v930_v20  ;;  %v579_v21 = vpop.f32.mrb[30].mxu0  ;;  %v932_v23 = vpop.f32.mrb[30].mxu1 }
 0x1ff   : > { %1239 = vst [vmem:[%s3268_s6 + $0x1a0] sm:$0xff] %v579_v21  ;;  %1241 = vst [vmem:[%s3268_s6 + $0x1b0] sm:$0xff] %v932_v23  ;;  %v581_v24 = vpop.f32.mrb[31].mxu0  ;;  %v934_v25 = vpop.f32.mrb[31].mxu1 }
 0x200   : > { %1240 = vst [vmem:[%s3268_s6 + $0x1a8] sm:$0xff] %v581_v24  ;;  %1242 = vst [vmem:[%s3268_s6 + $0x1b8] sm:$0xff] %v934_v25 }
 0x204   : > { %v585_v26 = vpop.f32.mrb[32].mxu0  ;;  %v938_v27 = vpop.f32.mrb[32].mxu1 }
 0x205   : > { %1243 = vst [vmem:[%s3268_s6 + $0x1c0] sm:$0xff] %v585_v26  ;;  %1245 = vst [vmem:[%s3268_s6 + $0x1d0] sm:$0xff] %v938_v27  ;;  %v587_v28 = vpop.f32.mrb[33].mxu0  ;;  %v940_v29 = vpop.f32.mrb[33].mxu1 }
 0x206   : > { %1244 = vst [vmem:[%s3268_s6 + $0x1c8] sm:$0xff] %v587_v28  ;;  %1246 = vst [vmem:[%s3268_s6 + $0x1d8] sm:$0xff] %v940_v29  ;;  %v589_v30 = vpop.f32.mrb[34].mxu0  ;;  %v942_v60 = vpop.f32.mrb[34].mxu1 }
 0x207   : > { %1247 = vst [vmem:[%s3268_s6 + $0x1e0] sm:$0xff] %v589_v30  ;;  %1249 = vst [vmem:[%s3268_s6 + $0x1f0] sm:$0xff] %v942_v60  ;;  %v591_v61 = vpop.f32.mrb[35].mxu0  ;;  %v944_v62 = vpop.f32.mrb[35].mxu1 }
 0x208   : > { %1248 = vst [vmem:[%s3268_s6 + $0x1e8] sm:$0xff] %v591_v61  ;;  %1250 = vst [vmem:[%s3268_s6 + $0x1f8] sm:$0xff] %v944_v62 }
 0x20c   : > { %v595_v63 = vpop.f32.mrb[36].mxu0  ;;  %v948_v0 = vpop.f32.mrb[36].mxu1 }
 0x20d   : > { %1251 = vst [vmem:[%s3268_s6 + $0x200] sm:$0xff] %v595_v63  ;;  %1253 = vst [vmem:[%s3268_s6 + $0x210] sm:$0xff] %v948_v0  ;;  %v597_v1 = vpop.f32.mrb[37].mxu0  ;;  %v950_v2 = vpop.f32.mrb[37].mxu1 }
 0x20e   : > { %1252 = vst [vmem:[%s3268_s6 + $0x208] sm:$0xff] %v597_v1  ;;  %1254 = vst [vmem:[%s3268_s6 + $0x218] sm:$0xff] %v950_v2  ;;  %v599_v5 = vpop.f32.mrb[38].mxu0  ;;  %v952_v6 = vpop.f32.mrb[38].mxu1 }
 0x20f   : > { %1255 = vst [vmem:[%s3268_s6 + $0x220] sm:$0xff] %v599_v5  ;;  %1257 = vst [vmem:[%s3268_s6 + $0x230] sm:$0xff] %v952_v6  ;;  %v601_v7 = vpop.f32.mrb[39].mxu0  ;;  %v954_v8 = vpop.f32.mrb[39].mxu1 }
 0x210   : > { %1256 = vst [vmem:[%s3268_s6 + $0x228] sm:$0xff] %v601_v7  ;;  %1258 = vst [vmem:[%s3268_s6 + $0x238] sm:$0xff] %v954_v8 }
 0x214   : > { %v605_v9 = vpop.f32.mrb[40].mxu0  ;;  %v958_v10 = vpop.f32.mrb[40].mxu1 }
 0x215   : > { %1259 = vst [vmem:[%s3268_s6 + $0x240] sm:$0xff] %v605_v9  ;;  %1261 = vst [vmem:[%s3268_s6 + $0x250] sm:$0xff] %v958_v10  ;;  %v607_v11 = vpop.f32.mrb[41].mxu0  ;;  %v960_v12 = vpop.f32.mrb[41].mxu1 }
 0x216   : > { %1260 = vst [vmem:[%s3268_s6 + $0x248] sm:$0xff] %v607_v11  ;;  %1262 = vst [vmem:[%s3268_s6 + $0x258] sm:$0xff] %v960_v12  ;;  %v609_v14 = vpop.f32.mrb[42].mxu0  ;;  %v962_v15 = vpop.f32.mrb[42].mxu1 }
 0x217   : > { %1263 = vst [vmem:[%s3268_s6 + $0x260] sm:$0xff] %v609_v14  ;;  %1265 = vst [vmem:[%s3268_s6 + $0x270] sm:$0xff] %v962_v15  ;;  %v611_v16 = vpop.f32.mrb[43].mxu0  ;;  %v964_v17 = vpop.f32.mrb[43].mxu1 }
 0x218   : > { %1264 = vst [vmem:[%s3268_s6 + $0x268] sm:$0xff] %v611_v16  ;;  %1266 = vst [vmem:[%s3268_s6 + $0x278] sm:$0xff] %v964_v17 }
 0x21c   : > { %v615_v18 = vpop.f32.mrb[44].mxu0  ;;  %v968_v19 = vpop.f32.mrb[44].mxu1 }
 0x21d   : > { %1267 = vst [vmem:[%s3268_s6 + $0x280] sm:$0xff] %v615_v18  ;;  %1269 = vst [vmem:[%s3268_s6 + $0x290] sm:$0xff] %v968_v19  ;;  %v617_v20 = vpop.f32.mrb[45].mxu0  ;;  %v970_v21 = vpop.f32.mrb[45].mxu1 }
 0x21e   : > { %1268 = vst [vmem:[%s3268_s6 + $0x288] sm:$0xff] %v617_v20  ;;  %1270 = vst [vmem:[%s3268_s6 + $0x298] sm:$0xff] %v970_v21  ;;  %v619_v23 = vpop.f32.mrb[46].mxu0  ;;  %v972_v24 = vpop.f32.mrb[46].mxu1 }
 0x21f   : > { %1271 = vst [vmem:[%s3268_s6 + $0x2a0] sm:$0xff] %v619_v23  ;;  %1273 = vst [vmem:[%s3268_s6 + $0x2b0] sm:$0xff] %v972_v24  ;;  %v621_v25 = vpop.f32.mrb[47].mxu0  ;;  %v974_v26 = vpop.f32.mrb[47].mxu1 }
 0x220   : > { %1272 = vst [vmem:[%s3268_s6 + $0x2a8] sm:$0xff] %v621_v25  ;;  %1274 = vst [vmem:[%s3268_s6 + $0x2b8] sm:$0xff] %v974_v26 }
 0x224   : > { %v625_v27 = vpop.f32.mrb[48].mxu0  ;;  %v978_v28 = vpop.f32.mrb[48].mxu1 }
 0x225   : > { %1275 = vst [vmem:[%s3268_s6 + $0x2c0] sm:$0xff] %v625_v27  ;;  %1277 = vst [vmem:[%s3268_s6 + $0x2d0] sm:$0xff] %v978_v28  ;;  %v627_v29 = vpop.f32.mrb[49].mxu0  ;;  %v980_v30 = vpop.f32.mrb[49].mxu1 }
 0x226   : > { %1276 = vst [vmem:[%s3268_s6 + $0x2c8] sm:$0xff] %v627_v29  ;;  %1278 = vst [vmem:[%s3268_s6 + $0x2d8] sm:$0xff] %v980_v30  ;;  %v629_v60 = vpop.f32.mrb[50].mxu0  ;;  %v982_v61 = vpop.f32.mrb[50].mxu1 }
 0x227   : > { %1279 = vst [vmem:[%s3268_s6 + $0x2e0] sm:$0xff] %v629_v60  ;;  %1281 = vst [vmem:[%s3268_s6 + $0x2f0] sm:$0xff] %v982_v61  ;;  %v631_v62 = vpop.f32.mrb[51].mxu0  ;;  %v984_v63 = vpop.f32.mrb[51].mxu1 }
 0x228   : > { %1280 = vst [vmem:[%s3268_s6 + $0x2e8] sm:$0xff] %v631_v62  ;;  %1282 = vst [vmem:[%s3268_s6 + $0x2f8] sm:$0xff] %v984_v63 }
 0x22c   : > { %v635_v0 = vpop.f32.mrb[52].mxu0  ;;  %v988_v1 = vpop.f32.mrb[52].mxu1 }
 0x22d   : > { %1283 = vst [vmem:[%s3268_s6 + $0x300] sm:$0xff] %v635_v0  ;;  %1285 = vst [vmem:[%s3268_s6 + $0x310] sm:$0xff] %v988_v1  ;;  %v637_v2 = vpop.f32.mrb[53].mxu0  ;;  %v990_v5 = vpop.f32.mrb[53].mxu1 }
 0x22e   : > { %1284 = vst [vmem:[%s3268_s6 + $0x308] sm:$0xff] %v637_v2  ;;  %1286 = vst [vmem:[%s3268_s6 + $0x318] sm:$0xff] %v990_v5  ;;  %v639_v6 = vpop.f32.mrb[54].mxu0  ;;  %v992_v7 = vpop.f32.mrb[54].mxu1 }
 0x22f   : > { %1287 = vst [vmem:[%s3268_s6 + $0x320] sm:$0xff] %v639_v6  ;;  %1289 = vst [vmem:[%s3268_s6 + $0x330] sm:$0xff] %v992_v7  ;;  %v641_v8 = vpop.f32.mrb[55].mxu0  ;;  %v994_v9 = vpop.f32.mrb[55].mxu1 }
 0x230   : > { %1288 = vst [vmem:[%s3268_s6 + $0x328] sm:$0xff] %v641_v8  ;;  %1290 = vst [vmem:[%s3268_s6 + $0x338] sm:$0xff] %v994_v9 }
 0x234   : > { %v645_v10 = vpop.f32.mrb[56].mxu0  ;;  %v998_v11 = vpop.f32.mrb[56].mxu1 }
 0x235   : > { %1291 = vst [vmem:[%s3268_s6 + $0x340] sm:$0xff] %v645_v10  ;;  %1293 = vst [vmem:[%s3268_s6 + $0x350] sm:$0xff] %v998_v11  ;;  %v647_v12 = vpop.f32.mrb[57].mxu0  ;;  %v1000_v14 = vpop.f32.mrb[57].mxu1 }
 0x236   : > { %1292 = vst [vmem:[%s3268_s6 + $0x348] sm:$0xff] %v647_v12  ;;  %1294 = vst [vmem:[%s3268_s6 + $0x358] sm:$0xff] %v1000_v14  ;;  %v649_v15 = vpop.f32.mrb[58].mxu0  ;;  %v1002_v16 = vpop.f32.mrb[58].mxu1 }
 0x237   : > { %1295 = vst [vmem:[%s3268_s6 + $0x360] sm:$0xff] %v649_v15  ;;  %1297 = vst [vmem:[%s3268_s6 + $0x370] sm:$0xff] %v1002_v16  ;;  %v651_v17 = vpop.f32.mrb[59].mxu0  ;;  %v1004_v18 = vpop.f32.mrb[59].mxu1 }
 0x238   : > { %1296 = vst [vmem:[%s3268_s6 + $0x368] sm:$0xff] %v651_v17  ;;  %1298 = vst [vmem:[%s3268_s6 + $0x378] sm:$0xff] %v1004_v18 }
 0x23c   : > { %v655_v19 = vpop.f32.mrb[60].mxu0  ;;  %v1008_v20 = vpop.f32.mrb[60].mxu1 }
 0x23d   : > { %1299 = vst [vmem:[%s3268_s6 + $0x380] sm:$0xff] %v655_v19  ;;  %1301 = vst [vmem:[%s3268_s6 + $0x390] sm:$0xff] %v1008_v20  ;;  %v657_v21 = vpop.f32.mrb[61].mxu0  ;;  %v1010_v23 = vpop.f32.mrb[61].mxu1 }
 0x23e   : > { %1300 = vst [vmem:[%s3268_s6 + $0x388] sm:$0xff] %v657_v21  ;;  %1302 = vst [vmem:[%s3268_s6 + $0x398] sm:$0xff] %v1010_v23  ;;  %v659_v24 = vpop.f32.mrb[62].mxu0  ;;  %v1012_v25 = vpop.f32.mrb[62].mxu1 }
 0x23f   : > { %1303 = vst [vmem:[%s3268_s6 + $0x3a0] sm:$0xff] %v659_v24  ;;  %1305 = vst [vmem:[%s3268_s6 + $0x3b0] sm:$0xff] %v1012_v25  ;;  %v661_v26 = vpop.f32.mrb[63].mxu0  ;;  %v1014_v27 = vpop.f32.mrb[63].mxu1 }
 0x240   : > { %1304 = vst [vmem:[%s3268_s6 + $0x3a8] sm:$0xff] %v661_v26  ;;  %1306 = vst [vmem:[%s3268_s6 + $0x3b8] sm:$0xff] %v1014_v27 }
 0x244   : > { %v665_v28 = vpop.f32.mrb[64].mxu0  ;;  %v1018_v29 = vpop.f32.mrb[64].mxu1 }
 0x245   : > { %1307 = vst [vmem:[%s3268_s6 + $0x3c0] sm:$0xff] %v665_v28  ;;  %1309 = vst [vmem:[%s3268_s6 + $0x3d0] sm:$0xff] %v1018_v29  ;;  %v667_v30 = vpop.f32.mrb[65].mxu0  ;;  %v1020_v60 = vpop.f32.mrb[65].mxu1 }
 0x246   : > { %1308 = vst [vmem:[%s3268_s6 + $0x3c8] sm:$0xff] %v667_v30  ;;  %1310 = vst [vmem:[%s3268_s6 + $0x3d8] sm:$0xff] %v1020_v60  ;;  %v669_v61 = vpop.f32.mrb[66].mxu0  ;;  %v1022_v62 = vpop.f32.mrb[66].mxu1 }
 0x247   : > { %1311 = vst [vmem:[%s3268_s6 + $0x3e0] sm:$0xff] %v669_v61  ;;  %1313 = vst [vmem:[%s3268_s6 + $0x3f0] sm:$0xff] %v1022_v62  ;;  %v671_v63 = vpop.f32.mrb[67].mxu0  ;;  %v1024_v0 = vpop.f32.mrb[67].mxu1 }
 0x248   : > { %1312 = vst [vmem:[%s3268_s6 + $0x3e8] sm:$0xff] %v671_v63  ;;  %1314 = vst [vmem:[%s3268_s6 + $0x3f8] sm:$0xff] %v1024_v0 }
 0x24c   : > { %v675_v1 = vpop.f32.mrb[68].mxu0  ;;  %v1028_v2 = vpop.f32.mrb[68].mxu1 }
 0x24d   : > { %1315 = vst [vmem:[%s3268_s6 + $0x400] sm:$0xff] %v675_v1  ;;  %1317 = vst [vmem:[%s3268_s6 + $0x410] sm:$0xff] %v1028_v2  ;;  %v677_v5 = vpop.f32.mrb[69].mxu0  ;;  %v1030_v6 = vpop.f32.mrb[69].mxu1 }
 0x24e   : > { %1316 = vst [vmem:[%s3268_s6 + $0x408] sm:$0xff] %v677_v5  ;;  %1318 = vst [vmem:[%s3268_s6 + $0x418] sm:$0xff] %v1030_v6  ;;  %v679_v7 = vpop.f32.mrb[70].mxu0  ;;  %v1032_v8 = vpop.f32.mrb[70].mxu1 }
 0x24f   : > { %1319 = vst [vmem:[%s3268_s6 + $0x420] sm:$0xff] %v679_v7  ;;  %1321 = vst [vmem:[%s3268_s6 + $0x430] sm:$0xff] %v1032_v8  ;;  %v681_v9 = vpop.f32.mrb[71].mxu0  ;;  %v1034_v10 = vpop.f32.mrb[71].mxu1 }
 0x250   : > { %1320 = vst [vmem:[%s3268_s6 + $0x428] sm:$0xff] %v681_v9  ;;  %1322 = vst [vmem:[%s3268_s6 + $0x438] sm:$0xff] %v1034_v10 }
 0x254   : > { %v685_v11 = vpop.f32.mrb[72].mxu0  ;;  %v1038_v12 = vpop.f32.mrb[72].mxu1 }
 0x255   : > { %1323 = vst [vmem:[%s3268_s6 + $0x440] sm:$0xff] %v685_v11  ;;  %1325 = vst [vmem:[%s3268_s6 + $0x450] sm:$0xff] %v1038_v12  ;;  %v687_v14 = vpop.f32.mrb[73].mxu0  ;;  %v1040_v15 = vpop.f32.mrb[73].mxu1 }
 0x256   : > { %1324 = vst [vmem:[%s3268_s6 + $0x448] sm:$0xff] %v687_v14  ;;  %1326 = vst [vmem:[%s3268_s6 + $0x458] sm:$0xff] %v1040_v15  ;;  %v689_v16 = vpop.f32.mrb[74].mxu0  ;;  %v1042_v17 = vpop.f32.mrb[74].mxu1 }
 0x257   : > { %1327 = vst [vmem:[%s3268_s6 + $0x460] sm:$0xff] %v689_v16  ;;  %1329 = vst [vmem:[%s3268_s6 + $0x470] sm:$0xff] %v1042_v17  ;;  %v691_v18 = vpop.f32.mrb[75].mxu0  ;;  %v1044_v19 = vpop.f32.mrb[75].mxu1 }
 0x258   : > { %1328 = vst [vmem:[%s3268_s6 + $0x468] sm:$0xff] %v691_v18  ;;  %1330 = vst [vmem:[%s3268_s6 + $0x478] sm:$0xff] %v1044_v19 }
 0x25c   : > { %v695_v20 = vpop.f32.mrb[76].mxu0  ;;  %v1048_v21 = vpop.f32.mrb[76].mxu1 }
 0x25d   : > { %1331 = vst [vmem:[%s3268_s6 + $0x480] sm:$0xff] %v695_v20  ;;  %1333 = vst [vmem:[%s3268_s6 + $0x490] sm:$0xff] %v1048_v21  ;;  %v697_v23 = vpop.f32.mrb[77].mxu0  ;;  %v1050_v24 = vpop.f32.mrb[77].mxu1 }
 0x25e   : > { %1332 = vst [vmem:[%s3268_s6 + $0x488] sm:$0xff] %v697_v23  ;;  %1334 = vst [vmem:[%s3268_s6 + $0x498] sm:$0xff] %v1050_v24  ;;  %v699_v25 = vpop.f32.mrb[78].mxu0  ;;  %v1052_v26 = vpop.f32.mrb[78].mxu1 }
 0x25f   : > { %1335 = vst [vmem:[%s3268_s6 + $0x4a0] sm:$0xff] %v699_v25  ;;  %1337 = vst [vmem:[%s3268_s6 + $0x4b0] sm:$0xff] %v1052_v26  ;;  %v701_v27 = vpop.f32.mrb[79].mxu0  ;;  %v1054_v28 = vpop.f32.mrb[79].mxu1 }
 0x260   : > { %1336 = vst [vmem:[%s3268_s6 + $0x4a8] sm:$0xff] %v701_v27  ;;  %1338 = vst [vmem:[%s3268_s6 + $0x4b8] sm:$0xff] %v1054_v28 }
 0x264   : > { %v705_v29 = vpop.f32.mrb[80].mxu0  ;;  %v1058_v30 = vpop.f32.mrb[80].mxu1 }
 0x265   : > { %1339 = vst [vmem:[%s3268_s6 + $0x4c0] sm:$0xff] %v705_v29  ;;  %1341 = vst [vmem:[%s3268_s6 + $0x4d0] sm:$0xff] %v1058_v30  ;;  %v707_v60 = vpop.f32.mrb[81].mxu0  ;;  %v1060_v61 = vpop.f32.mrb[81].mxu1 }
 0x266   : > { %1340 = vst [vmem:[%s3268_s6 + $0x4c8] sm:$0xff] %v707_v60  ;;  %1342 = vst [vmem:[%s3268_s6 + $0x4d8] sm:$0xff] %v1060_v61  ;;  %v709_v62 = vpop.f32.mrb[82].mxu0  ;;  %v1062_v63 = vpop.f32.mrb[82].mxu1 }
 0x267   : > { %1343 = vst [vmem:[%s3268_s6 + $0x4e0] sm:$0xff] %v709_v62  ;;  %1345 = vst [vmem:[%s3268_s6 + $0x4f0] sm:$0xff] %v1062_v63  ;;  %v711_v0 = vpop.f32.mrb[83].mxu0  ;;  %v1064_v1 = vpop.f32.mrb[83].mxu1 }
 0x268   : > { %1344 = vst [vmem:[%s3268_s6 + $0x4e8] sm:$0xff] %v711_v0  ;;  %1346 = vst [vmem:[%s3268_s6 + $0x4f8] sm:$0xff] %v1064_v1 }
 0x26c   : > { %v715_v2 = vpop.f32.mrb[84].mxu0  ;;  %v1068_v5 = vpop.f32.mrb[84].mxu1 }
 0x26d   : > { %1347 = vst [vmem:[%s3268_s6 + $0x500] sm:$0xff] %v715_v2  ;;  %1349 = vst [vmem:[%s3268_s6 + $0x510] sm:$0xff] %v1068_v5  ;;  %v717_v6 = vpop.f32.mrb[85].mxu0  ;;  %v1070_v7 = vpop.f32.mrb[85].mxu1 }
 0x26e   : > { %1348 = vst [vmem:[%s3268_s6 + $0x508] sm:$0xff] %v717_v6  ;;  %1350 = vst [vmem:[%s3268_s6 + $0x518] sm:$0xff] %v1070_v7  ;;  %v719_v8 = vpop.f32.mrb[86].mxu0  ;;  %v1072_v9 = vpop.f32.mrb[86].mxu1 }
 0x26f   : > { %1351 = vst [vmem:[%s3268_s6 + $0x520] sm:$0xff] %v719_v8  ;;  %1353 = vst [vmem:[%s3268_s6 + $0x530] sm:$0xff] %v1072_v9  ;;  %v721_v10 = vpop.f32.mrb[87].mxu0  ;;  %v1074_v11 = vpop.f32.mrb[87].mxu1 }
 0x270   : > { %1352 = vst [vmem:[%s3268_s6 + $0x528] sm:$0xff] %v721_v10  ;;  %1354 = vst [vmem:[%s3268_s6 + $0x538] sm:$0xff] %v1074_v11 }
 0x274   : > { %v725_v12 = vpop.f32.mrb[88].mxu0  ;;  %v1078_v14 = vpop.f32.mrb[88].mxu1 }
 0x275   : > { %1355 = vst [vmem:[%s3268_s6 + $0x540] sm:$0xff] %v725_v12  ;;  %1357 = vst [vmem:[%s3268_s6 + $0x550] sm:$0xff] %v1078_v14  ;;  %v727_v15 = vpop.f32.mrb[89].mxu0  ;;  %v1080_v16 = vpop.f32.mrb[89].mxu1 }
 0x276   : > { %1356 = vst [vmem:[%s3268_s6 + $0x548] sm:$0xff] %v727_v15  ;;  %1358 = vst [vmem:[%s3268_s6 + $0x558] sm:$0xff] %v1080_v16  ;;  %v729_v17 = vpop.f32.mrb[90].mxu0  ;;  %v1082_v18 = vpop.f32.mrb[90].mxu1 }
 0x277   : > { %1359 = vst [vmem:[%s3268_s6 + $0x560] sm:$0xff] %v729_v17  ;;  %1361 = vst [vmem:[%s3268_s6 + $0x570] sm:$0xff] %v1082_v18  ;;  %v731_v19 = vpop.f32.mrb[91].mxu0  ;;  %v1084_v20 = vpop.f32.mrb[91].mxu1 }
 0x278   : > { %1360 = vst [vmem:[%s3268_s6 + $0x568] sm:$0xff] %v731_v19  ;;  %1362 = vst [vmem:[%s3268_s6 + $0x578] sm:$0xff] %v1084_v20 }
 0x27c   : > { %v735_v21 = vpop.f32.mrb[92].mxu0  ;;  %v1088_v23 = vpop.f32.mrb[92].mxu1 }
 0x27d   : > { %1363 = vst [vmem:[%s3268_s6 + $0x580] sm:$0xff] %v735_v21  ;;  %1365 = vst [vmem:[%s3268_s6 + $0x590] sm:$0xff] %v1088_v23  ;;  %v737_v24 = vpop.f32.mrb[93].mxu0  ;;  %v1090_v25 = vpop.f32.mrb[93].mxu1 }
 0x27e   : > { %1364 = vst [vmem:[%s3268_s6 + $0x588] sm:$0xff] %v737_v24  ;;  %1366 = vst [vmem:[%s3268_s6 + $0x598] sm:$0xff] %v1090_v25  ;;  %v739_v26 = vpop.f32.mrb[94].mxu0  ;;  %v1092_v27 = vpop.f32.mrb[94].mxu1 }
 0x27f   : > { %1367 = vst [vmem:[%s3268_s6 + $0x5a0] sm:$0xff] %v739_v26  ;;  %1369 = vst [vmem:[%s3268_s6 + $0x5b0] sm:$0xff] %v1092_v27  ;;  %v741_v28 = vpop.f32.mrb[95].mxu0  ;;  %v1094_v29 = vpop.f32.mrb[95].mxu1 }
 0x280   : > { %1368 = vst [vmem:[%s3268_s6 + $0x5a8] sm:$0xff] %v741_v28  ;;  %1370 = vst [vmem:[%s3268_s6 + $0x5b8] sm:$0xff] %v1094_v29 }
 0x284   : > { %v745_v30 = vpop.f32.mrb[96].mxu0  ;;  %v1098_v60 = vpop.f32.mrb[96].mxu1 }
 0x285   : > { %1371 = vst [vmem:[%s3268_s6 + $0x5c0] sm:$0xff] %v745_v30  ;;  %1373 = vst [vmem:[%s3268_s6 + $0x5d0] sm:$0xff] %v1098_v60  ;;  %v747_v61 = vpop.f32.mrb[97].mxu0  ;;  %v1100_v62 = vpop.f32.mrb[97].mxu1 }
 0x286   : > { %1372 = vst [vmem:[%s3268_s6 + $0x5c8] sm:$0xff] %v747_v61  ;;  %1374 = vst [vmem:[%s3268_s6 + $0x5d8] sm:$0xff] %v1100_v62  ;;  %v749_v63 = vpop.f32.mrb[98].mxu0  ;;  %v1102_v0 = vpop.f32.mrb[98].mxu1 }
 0x287   : > { %1375 = vst [vmem:[%s3268_s6 + $0x5e0] sm:$0xff] %v749_v63  ;;  %1377 = vst [vmem:[%s3268_s6 + $0x5f0] sm:$0xff] %v1102_v0  ;;  %v751_v1 = vpop.f32.mrb[99].mxu0  ;;  %v1104_v2 = vpop.f32.mrb[99].mxu1 }
 0x288   : > { %1376 = vst [vmem:[%s3268_s6 + $0x5e8] sm:$0xff] %v751_v1  ;;  %1378 = vst [vmem:[%s3268_s6 + $0x5f8] sm:$0xff] %v1104_v2 }
 0x28c   : > { %v755_v5 = vpop.f32.mrb[100].mxu0  ;;  %v1108_v6 = vpop.f32.mrb[100].mxu1 }
 0x28d   : > { %1379 = vst [vmem:[%s3268_s6 + $0x600] sm:$0xff] %v755_v5  ;;  %1381 = vst [vmem:[%s3268_s6 + $0x610] sm:$0xff] %v1108_v6  ;;  %v757_v7 = vpop.f32.mrb[101].mxu0  ;;  %v1110_v8 = vpop.f32.mrb[101].mxu1 }
 0x28e   : > { %1380 = vst [vmem:[%s3268_s6 + $0x608] sm:$0xff] %v757_v7  ;;  %1382 = vst [vmem:[%s3268_s6 + $0x618] sm:$0xff] %v1110_v8  ;;  %v759_v9 = vpop.f32.mrb[102].mxu0  ;;  %v1112_v10 = vpop.f32.mrb[102].mxu1 }
 0x28f   : > { %1383 = vst [vmem:[%s3268_s6 + $0x620] sm:$0xff] %v759_v9  ;;  %1385 = vst [vmem:[%s3268_s6 + $0x630] sm:$0xff] %v1112_v10  ;;  %v761_v11 = vpop.f32.mrb[103].mxu0  ;;  %v1114_v12 = vpop.f32.mrb[103].mxu1 }
 0x290   : > { %1384 = vst [vmem:[%s3268_s6 + $0x628] sm:$0xff] %v761_v11  ;;  %1386 = vst [vmem:[%s3268_s6 + $0x638] sm:$0xff] %v1114_v12 }
 0x294   : > { %v765_v14 = vpop.f32.mrb[104].mxu0  ;;  %v1118_v15 = vpop.f32.mrb[104].mxu1 }
 0x295   : > { %1387 = vst [vmem:[%s3268_s6 + $0x640] sm:$0xff] %v765_v14  ;;  %1389 = vst [vmem:[%s3268_s6 + $0x650] sm:$0xff] %v1118_v15  ;;  %v767_v16 = vpop.f32.mrb[105].mxu0  ;;  %v1120_v17 = vpop.f32.mrb[105].mxu1 }
 0x296   : > { %1388 = vst [vmem:[%s3268_s6 + $0x648] sm:$0xff] %v767_v16  ;;  %1390 = vst [vmem:[%s3268_s6 + $0x658] sm:$0xff] %v1120_v17  ;;  %v769_v18 = vpop.f32.mrb[106].mxu0  ;;  %v1122_v19 = vpop.f32.mrb[106].mxu1 }
 0x297   : > { %1391 = vst [vmem:[%s3268_s6 + $0x660] sm:$0xff] %v769_v18  ;;  %1393 = vst [vmem:[%s3268_s6 + $0x670] sm:$0xff] %v1122_v19  ;;  %v771_v20 = vpop.f32.mrb[107].mxu0  ;;  %v1124_v21 = vpop.f32.mrb[107].mxu1 }
 0x298   : > { %1392 = vst [vmem:[%s3268_s6 + $0x668] sm:$0xff] %v771_v20  ;;  %1394 = vst [vmem:[%s3268_s6 + $0x678] sm:$0xff] %v1124_v21 }
 0x29c   : > { %v775_v23 = vpop.f32.mrb[108].mxu0  ;;  %v1128_v24 = vpop.f32.mrb[108].mxu1 }
 0x29d   : > { %1395 = vst [vmem:[%s3268_s6 + $0x680] sm:$0xff] %v775_v23  ;;  %1397 = vst [vmem:[%s3268_s6 + $0x690] sm:$0xff] %v1128_v24  ;;  %v777_v25 = vpop.f32.mrb[109].mxu0  ;;  %v1130_v26 = vpop.f32.mrb[109].mxu1 }
 0x29e   : > { %1396 = vst [vmem:[%s3268_s6 + $0x688] sm:$0xff] %v777_v25  ;;  %1398 = vst [vmem:[%s3268_s6 + $0x698] sm:$0xff] %v1130_v26  ;;  %v779_v27 = vpop.f32.mrb[110].mxu0  ;;  %v1132_v28 = vpop.f32.mrb[110].mxu1 }
 0x29f   : > { %1399 = vst [vmem:[%s3268_s6 + $0x6a0] sm:$0xff] %v779_v27  ;;  %1401 = vst [vmem:[%s3268_s6 + $0x6b0] sm:$0xff] %v1132_v28  ;;  %v781_v29 = vpop.f32.mrb[111].mxu0  ;;  %v1134_v30 = vpop.f32.mrb[111].mxu1 }
 0x2a0   : > { %1400 = vst [vmem:[%s3268_s6 + $0x6a8] sm:$0xff] %v781_v29  ;;  %1402 = vst [vmem:[%s3268_s6 + $0x6b8] sm:$0xff] %v1134_v30 }
 0x2a4   : > { %v785_v60 = vpop.f32.mrb[112].mxu0  ;;  %v1138_v61 = vpop.f32.mrb[112].mxu1 }
 0x2a5   : > { %1403 = vst [vmem:[%s3268_s6 + $0x6c0] sm:$0xff] %v785_v60  ;;  %1405 = vst [vmem:[%s3268_s6 + $0x6d0] sm:$0xff] %v1138_v61  ;;  %v787_v62 = vpop.f32.mrb[113].mxu0  ;;  %v1140_v63 = vpop.f32.mrb[113].mxu1 }
 0x2a6   : > { %1404 = vst [vmem:[%s3268_s6 + $0x6c8] sm:$0xff] %v787_v62  ;;  %1406 = vst [vmem:[%s3268_s6 + $0x6d8] sm:$0xff] %v1140_v63  ;;  %v789_v0 = vpop.f32.mrb[114].mxu0  ;;  %v1142_v1 = vpop.f32.mrb[114].mxu1 }
 0x2a7   : > { %1407 = vst [vmem:[%s3268_s6 + $0x6e0] sm:$0xff] %v789_v0  ;;  %1409 = vst [vmem:[%s3268_s6 + $0x6f0] sm:$0xff] %v1142_v1  ;;  %v791_v2 = vpop.f32.mrb[115].mxu0  ;;  %v1144_v5 = vpop.f32.mrb[115].mxu1 }
 0x2a8   : > { %1408 = vst [vmem:[%s3268_s6 + $0x6e8] sm:$0xff] %v791_v2  ;;  %1410 = vst [vmem:[%s3268_s6 + $0x6f8] sm:$0xff] %v1144_v5 }
 0x2ac   : > { %v795_v6 = vpop.f32.mrb[116].mxu0  ;;  %v1148_v7 = vpop.f32.mrb[116].mxu1 }
 0x2ad   : > { %1411 = vst [vmem:[%s3268_s6 + $0x700] sm:$0xff] %v795_v6  ;;  %1413 = vst [vmem:[%s3268_s6 + $0x710] sm:$0xff] %v1148_v7  ;;  %v797_v8 = vpop.f32.mrb[117].mxu0  ;;  %v1150_v9 = vpop.f32.mrb[117].mxu1 }
 0x2ae   : > { %1412 = vst [vmem:[%s3268_s6 + $0x708] sm:$0xff] %v797_v8  ;;  %1414 = vst [vmem:[%s3268_s6 + $0x718] sm:$0xff] %v1150_v9  ;;  %v799_v10 = vpop.f32.mrb[118].mxu0  ;;  %v1152_v11 = vpop.f32.mrb[118].mxu1 }
 0x2af   : > { %1415 = vst [vmem:[%s3268_s6 + $0x720] sm:$0xff] %v799_v10  ;;  %1417 = vst [vmem:[%s3268_s6 + $0x730] sm:$0xff] %v1152_v11  ;;  %v801_v12 = vpop.f32.mrb[119].mxu0  ;;  %v1154_v14 = vpop.f32.mrb[119].mxu1 }
 0x2b0   : > { %1416 = vst [vmem:[%s3268_s6 + $0x728] sm:$0xff] %v801_v12  ;;  %1418 = vst [vmem:[%s3268_s6 + $0x738] sm:$0xff] %v1154_v14 }
 0x2b4   : > { %v805_v15 = vpop.f32.mrb[120].mxu0  ;;  %v1158_v16 = vpop.f32.mrb[120].mxu1 }
 0x2b5   : > { %1419 = vst [vmem:[%s3268_s6 + $0x740] sm:$0xff] %v805_v15  ;;  %1421 = vst [vmem:[%s3268_s6 + $0x750] sm:$0xff] %v1158_v16  ;;  %v807_v17 = vpop.f32.mrb[121].mxu0  ;;  %v1160_v18 = vpop.f32.mrb[121].mxu1 }
 0x2b6   : > { %1420 = vst [vmem:[%s3268_s6 + $0x748] sm:$0xff] %v807_v17  ;;  %1422 = vst [vmem:[%s3268_s6 + $0x758] sm:$0xff] %v1160_v18  ;;  %v809_v19 = vpop.f32.mrb[122].mxu0  ;;  %v1162_v20 = vpop.f32.mrb[122].mxu1 }
 0x2b7   : > { %1423 = vst [vmem:[%s3268_s6 + $0x760] sm:$0xff] %v809_v19  ;;  %1425 = vst [vmem:[%s3268_s6 + $0x770] sm:$0xff] %v1162_v20  ;;  %v811_v21 = vpop.f32.mrb[123].mxu0  ;;  %v1164_v23 = vpop.f32.mrb[123].mxu1 }
 0x2b8   : > { %1424 = vst [vmem:[%s3268_s6 + $0x768] sm:$0xff] %v811_v21  ;;  %1426 = vst [vmem:[%s3268_s6 + $0x778] sm:$0xff] %v1164_v23 }
 0x2bc   : > { %v815_v24 = vpop.f32.mrb[124].mxu0  ;;  %v1168_v25 = vpop.f32.mrb[124].mxu1 }
 0x2bd   : > { %1427 = vst [vmem:[%s3268_s6 + $0x780] sm:$0xff] %v815_v24  ;;  %1429 = vst [vmem:[%s3268_s6 + $0x790] sm:$0xff] %v1168_v25  ;;  %v817_v26 = vpop.f32.mrb[125].mxu0  ;;  %v1170_v27 = vpop.f32.mrb[125].mxu1 }
 0x2be   : > { %1428 = vst [vmem:[%s3268_s6 + $0x788] sm:$0xff] %v817_v26  ;;  %1430 = vst [vmem:[%s3268_s6 + $0x798] sm:$0xff] %v1170_v27  ;;  %v819_v28 = vpop.f32.mrb[126].mxu0  ;;  %v1172_v29 = vpop.f32.mrb[126].mxu1 }
 0x2bf   : > { %1431 = vst [vmem:[%s3268_s6 + $0x7a0] sm:$0xff] %v819_v28  ;;  %1433 = vst [vmem:[%s3268_s6 + $0x7b0] sm:$0xff] %v1172_v29  ;;  %v821_v30 = vpop.f32.mrb[127].mxu0  ;;  %v1174_v60 = vpop.f32.mrb[127].mxu1 }
 0x2c0   : > { %1432 = vst [vmem:[%s3268_s6 + $0x7a8] sm:$0xff] %v821_v30  ;;  %1434 = vst [vmem:[%s3268_s6 + $0x7b8] sm:$0xff] %v1174_v60 }
 0x2c4   : > { %v825_v61 = vpop.f32.mrb[128].mxu0  ;;  %v1178_v62 = vpop.f32.mrb[128].mxu1 }
 0x2c5   : > { %1435 = vst [vmem:[%s3268_s6 + $0x7c0] sm:$0xff] %v825_v61  ;;  %1437 = vst [vmem:[%s3268_s6 + $0x7d0] sm:$0xff] %v1178_v62  ;;  %v827_v63 = vpop.f32.mrb[129].mxu0  ;;  %v1180_v0 = vpop.f32.mrb[129].mxu1 }
 0x2c6   : > { %1436 = vst [vmem:[%s3268_s6 + $0x7c8] sm:$0xff] %v827_v63  ;;  %1438 = vst [vmem:[%s3268_s6 + $0x7d8] sm:$0xff] %v1180_v0  ;;  %v829_v1 = vpop.f32.mrb[130].mxu0  ;;  %v1182_v2 = vpop.f32.mrb[130].mxu1 }
 0x2c7   : > { %1439 = vst [vmem:[%s3268_s6 + $0x7e0] sm:$0xff] %v829_v1  ;;  %1441 = vst [vmem:[%s3268_s6 + $0x7f0] sm:$0xff] %v1182_v2  ;;  %v831_v5 = vpop.f32.mrb[131].mxu0  ;;  %v1184_v6 = vpop.f32.mrb[131].mxu1 }
 0x2c8   : > { %1440 = vst [vmem:[%s3268_s6 + $0x7e8] sm:$0xff] %v831_v5  ;;  %1442 = vst [vmem:[%s3268_s6 + $0x7f8] sm:$0xff] %v1184_v6 }
 0x2cc   : > { %v1483_v7 = vpop.f32.mrb[132].mxu0  ;;  %v1524_v8 = vpop.f32.mrb[132].mxu1 }
 0x2cd   : > { %v1531_v9 = vpack.c.bf16 %v1483_v7, %v1483_v7  ;;  %v1533_v10 = vpack.c.bf16 %v1524_v8, %v1524_v8  ;;  %v1485_v11 = vpop.f32.mrb[133].mxu0  ;;  %v1526_v12 = vpop.f32.mrb[133].mxu1 }
 0x2ce   : > { %v1532_v14 = vpack.c.bf16 %v1485_v11, %v1485_v11  ;;  %v1534_v15 = vpack.c.bf16 %v1526_v12, %v1526_v12  ;;  %v1487_v16 = vpop.f32.mrb[134].mxu0  ;;  %v1528_v17 = vpop.f32.mrb[134].mxu1 }
 0x2cf   : > { %v1536_v18 = vsel %vm206_vm0, %v1531_v9, 0  ;;  %v1542_v19 = vsel %vm206_vm0, %v1533_v10, 0  ;;  %v1488_v20 = vpop.f32.mrb[135].mxu0  ;;  %v1529_v21 = vpop.f32.mrb[135].mxu1 }
 0x2d0   : > { %2721 = vmatprep.subr.msk.bf16.mxu0 %vm206_vm0, %v1532_v14  ;;  %2754 = vmatprep.subr.msk.bf16.mxu1 %vm206_vm0, %v1534_v15 }
 0x2d1   : > { %1548 = vmatpush1.bf16.msra.mxu0 %v1536_v18  ;;  %1901 = vmatpush1.bf16.msra.mxu1 %v1542_v19 }
 0x2d4   : > { %2722 = vmatmul.mubr.msk.bf16.vlgmr.msra.gmra.mrb[136].mxu0 %vm202_vm1, %v3042_v31  ;;  %2755 = vmatmul.mubr.msk.bf16.vlgmr.msra.gmra.mrb[136].mxu1 %vm202_vm1, %v3042_v31 }
 0x2d5   : > { %1589 = vmatprep.mubr.bf16.mxu0 %v2944_v4  ;;  %1942 = vmatprep.mubr.bf16.mxu1 %v2944_v4 }
 0x2dc   : > { %2723 = vmatmul.mubr.msk.bf16.gmra.mrb[140].mxu0 %vm202_vm1, %v3052_v32  ;;  %2756 = vmatmul.mubr.msk.bf16.gmra.mrb[140].mxu1 %vm202_vm1, %v3052_v32 }
 0x2dd   : > { %1599 = vmatprep.mubr.bf16.mxu0 %v2944_v4  ;;  %1952 = vmatprep.mubr.bf16.mxu1 %v2944_v4 }
 0x2e4   : > { %2724 = vmatmul.mubr.msk.bf16.gmra.mrb[144].mxu0 %vm202_vm1, %v3060_v33  ;;  %2757 = vmatmul.mubr.msk.bf16.gmra.mrb[144].mxu1 %vm202_vm1, %v3060_v33 }
 0x2e5   : > { %1609 = vmatprep.mubr.bf16.mxu0 %v2944_v4  ;;  %1962 = vmatprep.mubr.bf16.mxu1 %v2944_v4 }
 0x2ec   : > { %2725 = vmatmul.mubr.msk.bf16.gmra.mrb[148].mxu0 %vm202_vm1, %v3068_v34  ;;  %2758 = vmatmul.mubr.msk.bf16.gmra.mrb[148].mxu1 %vm202_vm1, %v3068_v34 }
 0x2ed   : > { %1619 = vmatprep.mubr.bf16.mxu0 %v2944_v4  ;;  %1972 = vmatprep.mubr.bf16.mxu1 %v2944_v4 }
 0x2f4   : > { %2726 = vmatmul.mubr.msk.bf16.gmra.mrb[152].mxu0 %vm202_vm1, %v3076_v35  ;;  %2759 = vmatmul.mubr.msk.bf16.gmra.mrb[152].mxu1 %vm202_vm1, %v3076_v35 }
 0x2f5   : > { %1629 = vmatprep.mubr.bf16.mxu0 %v2944_v4  ;;  %1982 = vmatprep.mubr.bf16.mxu1 %v2944_v4 }
 0x2fc   : > { %2727 = vmatmul.mubr.msk.bf16.gmra.mrb[156].mxu0 %vm202_vm1, %v3084_v36  ;;  %2760 = vmatmul.mubr.msk.bf16.gmra.mrb[156].mxu1 %vm202_vm1, %v3084_v36 }
 0x2fd   : > { %1639 = vmatprep.mubr.bf16.mxu0 %v2944_v4  ;;  %1992 = vmatprep.mubr.bf16.mxu1 %v2944_v4 }
 0x304   : > { %2728 = vmatmul.mubr.msk.bf16.gmra.mrb[160].mxu0 %vm202_vm1, %v3092_v37  ;;  %2761 = vmatmul.mubr.msk.bf16.gmra.mrb[160].mxu1 %vm202_vm1, %v3092_v37 }
 0x305   : > { %1649 = vmatprep.mubr.bf16.mxu0 %v2944_v4  ;;  %2002 = vmatprep.mubr.bf16.mxu1 %v2944_v4 }
 0x30c   : > { %2729 = vmatmul.mubr.msk.bf16.gmra.mrb[164].mxu0 %vm202_vm1, %v3100_v38  ;;  %2762 = vmatmul.mubr.msk.bf16.gmra.mrb[164].mxu1 %vm202_vm1, %v3100_v38 }
 0x30d   : > { %1659 = vmatprep.mubr.bf16.mxu0 %v2944_v4  ;;  %2012 = vmatprep.mubr.bf16.mxu1 %v2944_v4 }
 0x314   : > { %2730 = vmatmul.mubr.msk.bf16.gmra.mrb[168].mxu0 %vm202_vm1, %v3108_v39  ;;  %2763 = vmatmul.mubr.msk.bf16.gmra.mrb[168].mxu1 %vm202_vm1, %v3108_v39 }
 0x315   : > { %1669 = vmatprep.mubr.bf16.mxu0 %v2944_v4  ;;  %2022 = vmatprep.mubr.bf16.mxu1 %v2944_v4 }
 0x31c   : > { %2731 = vmatmul.mubr.msk.bf16.gmra.mrb[172].mxu0 %vm202_vm1, %v3116_v40  ;;  %2764 = vmatmul.mubr.msk.bf16.gmra.mrb[172].mxu1 %vm202_vm1, %v3116_v40 }
 0x31d   : > { %1679 = vmatprep.mubr.bf16.mxu0 %v2944_v4  ;;  %2032 = vmatprep.mubr.bf16.mxu1 %v2944_v4 }
 0x324   : > { %2732 = vmatmul.mubr.msk.bf16.gmra.mrb[176].mxu0 %vm202_vm1, %v3124_v41  ;;  %2765 = vmatmul.mubr.msk.bf16.gmra.mrb[176].mxu1 %vm202_vm1, %v3124_v41 }
 0x325   : > { %1689 = vmatprep.mubr.bf16.mxu0 %v2944_v4  ;;  %2042 = vmatprep.mubr.bf16.mxu1 %v2944_v4 }
 0x32c   : > { %2733 = vmatmul.mubr.msk.bf16.gmra.mrb[180].mxu0 %vm202_vm1, %v3132_v42  ;;  %2766 = vmatmul.mubr.msk.bf16.gmra.mrb[180].mxu1 %vm202_vm1, %v3132_v42 }
 0x32d   : > { %1699 = vmatprep.mubr.bf16.mxu0 %v2944_v4  ;;  %2052 = vmatprep.mubr.bf16.mxu1 %v2944_v4 }
 0x334   : > { %2734 = vmatmul.mubr.msk.bf16.gmra.mrb[184].mxu0 %vm202_vm1, %v3140_v43  ;;  %2767 = vmatmul.mubr.msk.bf16.gmra.mrb[184].mxu1 %vm202_vm1, %v3140_v43 }
 0x335   : > { %1709 = vmatprep.mubr.bf16.mxu0 %v2944_v4  ;;  %2062 = vmatprep.mubr.bf16.mxu1 %v2944_v4 }
 0x33c   : > { %2735 = vmatmul.mubr.msk.bf16.gmra.mrb[188].mxu0 %vm202_vm1, %v3148_v44  ;;  %2768 = vmatmul.mubr.msk.bf16.gmra.mrb[188].mxu1 %vm202_vm1, %v3148_v44 }
 0x33d   : > { %1719 = vmatprep.mubr.bf16.mxu0 %v2944_v4  ;;  %2072 = vmatprep.mubr.bf16.mxu1 %v2944_v4 }
 0x344   : > { %2736 = vmatmul.mubr.msk.bf16.gmra.mrb[192].mxu0 %vm202_vm1, %v3156_v45  ;;  %2769 = vmatmul.mubr.msk.bf16.gmra.mrb[192].mxu1 %vm202_vm1, %v3156_v45 }
 0x345   : > { %1729 = vmatprep.mubr.bf16.mxu0 %v2944_v4  ;;  %2082 = vmatprep.mubr.bf16.mxu1 %v2944_v4 }
 0x34c   : > { %2737 = vmatmul.mubr.msk.bf16.gmra.mrb[196].mxu0 %vm202_vm1, %v3164_v46  ;;  %2770 = vmatmul.mubr.msk.bf16.gmra.mrb[196].mxu1 %vm202_vm1, %v3164_v46 }
 0x34d   : > { %1739 = vmatprep.mubr.bf16.mxu0 %v2944_v4  ;;  %2092 = vmatprep.mubr.bf16.mxu1 %v2944_v4 }
 0x354   : > { %2738 = vmatmul.mubr.msk.bf16.gmra.mrb[200].mxu0 %vm202_vm1, %v3172_v47  ;;  %2771 = vmatmul.mubr.msk.bf16.gmra.mrb[200].mxu1 %vm202_vm1, %v3172_v47 }
 0x355   : > { %1749 = vmatprep.mubr.bf16.mxu0 %v2944_v4  ;;  %2102 = vmatprep.mubr.bf16.mxu1 %v2944_v4 }
 0x35c   : > { %2739 = vmatmul.mubr.msk.bf16.gmra.mrb[204].mxu0 %vm202_vm1, %v3180_v48  ;;  %2772 = vmatmul.mubr.msk.bf16.gmra.mrb[204].mxu1 %vm202_vm1, %v3180_v48 }
 0x35d   : > { %1759 = vmatprep.mubr.bf16.mxu0 %v2944_v4  ;;  %2112 = vmatprep.mubr.bf16.mxu1 %v2944_v4 }
 0x364   : > { %2740 = vmatmul.mubr.msk.bf16.gmra.mrb[208].mxu0 %vm202_vm1, %v3188_v49  ;;  %2773 = vmatmul.mubr.msk.bf16.gmra.mrb[208].mxu1 %vm202_vm1, %v3188_v49 }
 0x365   : > { %1769 = vmatprep.mubr.bf16.mxu0 %v2944_v4  ;;  %2122 = vmatprep.mubr.bf16.mxu1 %v2944_v4 }
 0x36c   : > { %2741 = vmatmul.mubr.msk.bf16.gmra.mrb[212].mxu0 %vm202_vm1, %v3196_v50  ;;  %2774 = vmatmul.mubr.msk.bf16.gmra.mrb[212].mxu1 %vm202_vm1, %v3196_v50 }
 0x36d   : > { %1779 = vmatprep.mubr.bf16.mxu0 %v2944_v4  ;;  %2132 = vmatprep.mubr.bf16.mxu1 %v2944_v4 }
 0x374   : > { %2742 = vmatmul.mubr.msk.bf16.gmra.mrb[216].mxu0 %vm202_vm1, %v3204_v51  ;;  %2775 = vmatmul.mubr.msk.bf16.gmra.mrb[216].mxu1 %vm202_vm1, %v3204_v51 }
 0x375   : > { %1789 = vmatprep.mubr.bf16.mxu0 %v2944_v4  ;;  %2142 = vmatprep.mubr.bf16.mxu1 %v2944_v4 }
 0x37c   : > { %2743 = vmatmul.mubr.msk.bf16.gmra.mrb[220].mxu0 %vm202_vm1, %v3212_v52  ;;  %2776 = vmatmul.mubr.msk.bf16.gmra.mrb[220].mxu1 %vm202_vm1, %v3212_v52 }
 0x37d   : > { %1799 = vmatprep.mubr.bf16.mxu0 %v2944_v4  ;;  %2152 = vmatprep.mubr.bf16.mxu1 %v2944_v4 }
 0x384   : > { %2744 = vmatmul.mubr.msk.bf16.gmra.mrb[224].mxu0 %vm202_vm1, %v3220_v53  ;;  %2777 = vmatmul.mubr.msk.bf16.gmra.mrb[224].mxu1 %vm202_vm1, %v3220_v53 }
 0x385   : > { %1809 = vmatprep.mubr.bf16.mxu0 %v2944_v4  ;;  %2162 = vmatprep.mubr.bf16.mxu1 %v2944_v4 }
 0x38c   : > { %2745 = vmatmul.mubr.msk.bf16.gmra.mrb[228].mxu0 %vm202_vm1, %v3228_v54  ;;  %2778 = vmatmul.mubr.msk.bf16.gmra.mrb[228].mxu1 %vm202_vm1, %v3228_v54 }
 0x38d   : > { %1819 = vmatprep.mubr.bf16.mxu0 %v2944_v4  ;;  %2172 = vmatprep.mubr.bf16.mxu1 %v2944_v4 }
 0x394   : > { %2746 = vmatmul.mubr.msk.bf16.gmra.mrb[232].mxu0 %vm202_vm1, %v3236_v55  ;;  %2779 = vmatmul.mubr.msk.bf16.gmra.mrb[232].mxu1 %vm202_vm1, %v3236_v55 }
 0x395   : > { %1829 = vmatprep.mubr.bf16.mxu0 %v2944_v4  ;;  %2182 = vmatprep.mubr.bf16.mxu1 %v2944_v4 }
 0x39c   : > { %2747 = vmatmul.mubr.msk.bf16.gmra.mrb[236].mxu0 %vm202_vm1, %v3244_v56  ;;  %2780 = vmatmul.mubr.msk.bf16.gmra.mrb[236].mxu1 %vm202_vm1, %v3244_v56 }
 0x39d   : > { %1839 = vmatprep.mubr.bf16.mxu0 %v2944_v4  ;;  %2192 = vmatprep.mubr.bf16.mxu1 %v2944_v4 }
 0x3a4   : > { %2748 = vmatmul.mubr.msk.bf16.gmra.mrb[240].mxu0 %vm202_vm1, %v3255_v57  ;;  %2781 = vmatmul.mubr.msk.bf16.gmra.mrb[240].mxu1 %vm202_vm1, %v3255_v57 }
 0x3a5   : > { %1849 = vmatprep.mubr.bf16.mxu0 %v2944_v4  ;;  %2202 = vmatprep.mubr.bf16.mxu1 %v2944_v4 }
 0x3a7   : > { %v1581_v31 = vpop.f32.mrb[136].mxu0  ;;  %v1934_v32 = vpop.f32.mrb[136].mxu1 }
 0x3a8   : > { %2253 = vst [vmem:[%s3737_s7] sm:$0xff] %v1581_v31  ;;  %2255 = vst [vmem:[%s3737_s7 + $0x10] sm:$0xff] %v1934_v32  ;;  %v1583_v33 = vpop.f32.mrb[137].mxu0  ;;  %v1936_v34 = vpop.f32.mrb[137].mxu1 }
 0x3a9   : > { %2254 = vst [vmem:[%s3737_s7 + $0x8] sm:$0xff] %v1583_v33  ;;  %2256 = vst [vmem:[%s3737_s7 + $0x18] sm:$0xff] %v1936_v34  ;;  %v1585_v35 = vpop.f32.mrb[138].mxu0  ;;  %v1938_v36 = vpop.f32.mrb[138].mxu1 }
 0x3aa   : > { %2257 = vst [vmem:[%s3737_s7 + $0x20] sm:$0xff] %v1585_v35  ;;  %2259 = vst [vmem:[%s3737_s7 + $0x30] sm:$0xff] %v1938_v36  ;;  %v1587_v37 = vpop.f32.mrb[139].mxu0  ;;  %v1940_v38 = vpop.f32.mrb[139].mxu1 }
 0x3ab   : > { %2258 = vst [vmem:[%s3737_s7 + $0x28] sm:$0xff] %v1587_v37  ;;  %2260 = vst [vmem:[%s3737_s7 + $0x38] sm:$0xff] %v1940_v38 }
 0x3ac   : > { %2749 = vmatmul.mubr.msk.bf16.gmra.mrb[244].mxu0 %vm202_vm1, %v3264_v58  ;;  %2782 = vmatmul.mubr.msk.bf16.gmra.mrb[244].mxu1 %vm202_vm1, %v3264_v58 }
 0x3ad   : > { %1859 = vmatprep.mubr.bf16.mxu0 %v2944_v4  ;;  %2212 = vmatprep.mubr.bf16.mxu1 %v2944_v4 }
 0x3af   : > { %v1591_v39 = vpop.f32.mrb[140].mxu0  ;;  %v1944_v40 = vpop.f32.mrb[140].mxu1 }
 0x3b0   : > { %2261 = vst [vmem:[%s3737_s7 + $0x40] sm:$0xff] %v1591_v39  ;;  %2263 = vst [vmem:[%s3737_s7 + $0x50] sm:$0xff] %v1944_v40  ;;  %v1593_v41 = vpop.f32.mrb[141].mxu0  ;;  %v1946_v42 = vpop.f32.mrb[141].mxu1 }
 0x3b1   : > { %2262 = vst [vmem:[%s3737_s7 + $0x48] sm:$0xff] %v1593_v41  ;;  %2264 = vst [vmem:[%s3737_s7 + $0x58] sm:$0xff] %v1946_v42  ;;  %v1595_v43 = vpop.f32.mrb[142].mxu0  ;;  %v1948_v44 = vpop.f32.mrb[142].mxu1 }
 0x3b2   : > { %2265 = vst [vmem:[%s3737_s7 + $0x60] sm:$0xff] %v1595_v43  ;;  %2267 = vst [vmem:[%s3737_s7 + $0x70] sm:$0xff] %v1948_v44  ;;  %v1597_v45 = vpop.f32.mrb[143].mxu0  ;;  %v1950_v46 = vpop.f32.mrb[143].mxu1 }
 0x3b3   : > { %2266 = vst [vmem:[%s3737_s7 + $0x68] sm:$0xff] %v1597_v45  ;;  %2268 = vst [vmem:[%s3737_s7 + $0x78] sm:$0xff] %v1950_v46 }
 0x3b4   : > { %2750 = vmatmul.mubr.msk.bf16.gmra.mrb[248].mxu0 %vm202_vm1, %v3284_v3  ;;  %2783 = vmatmul.mubr.msk.bf16.gmra.mrb[248].mxu1 %vm202_vm1, %v3284_v3 }
 0x3b5   : > { %1869 = vmatprep.mubr.bf16.mxu0 %v2944_v4  ;;  %2222 = vmatprep.mubr.bf16.mxu1 %v2944_v4 }
 0x3b7   : > { %v1601_v47 = vpop.f32.mrb[144].mxu0  ;;  %v1954_v48 = vpop.f32.mrb[144].mxu1 }
 0x3b8   : > { %2269 = vst [vmem:[%s3737_s7 + $0x80] sm:$0xff] %v1601_v47  ;;  %2271 = vst [vmem:[%s3737_s7 + $0x90] sm:$0xff] %v1954_v48  ;;  %v1603_v49 = vpop.f32.mrb[145].mxu0  ;;  %v1956_v50 = vpop.f32.mrb[145].mxu1 }
 0x3b9   : > { %2270 = vst [vmem:[%s3737_s7 + $0x88] sm:$0xff] %v1603_v49  ;;  %2272 = vst [vmem:[%s3737_s7 + $0x98] sm:$0xff] %v1956_v50  ;;  %v1605_v51 = vpop.f32.mrb[146].mxu0  ;;  %v1958_v52 = vpop.f32.mrb[146].mxu1 }
 0x3ba   : > { %2273 = vst [vmem:[%s3737_s7 + $0xa0] sm:$0xff] %v1605_v51  ;;  %2275 = vst [vmem:[%s3737_s7 + $0xb0] sm:$0xff] %v1958_v52  ;;  %v1607_v53 = vpop.f32.mrb[147].mxu0  ;;  %v1960_v54 = vpop.f32.mrb[147].mxu1 }
 0x3bb   : > { %2274 = vst [vmem:[%s3737_s7 + $0xa8] sm:$0xff] %v1607_v53  ;;  %2276 = vst [vmem:[%s3737_s7 + $0xb8] sm:$0xff] %v1960_v54 }
 0x3bc   : > { %2751 = vmatmul.mubr.msk.bf16.gmra.mrb[252].mxu0 %vm202_vm1, %v3300_v13  ;;  %2784 = vmatmul.mubr.msk.bf16.gmra.mrb[252].mxu1 %vm202_vm1, %v3300_v13 }
 0x3bd   : > { %1879 = vmatprep.mubr.bf16.mxu0 %v2944_v4  ;;  %2232 = vmatprep.mubr.bf16.mxu1 %v2944_v4 }
 0x3bf   : > { %v1611_v55 = vpop.f32.mrb[148].mxu0  ;;  %v1964_v56 = vpop.f32.mrb[148].mxu1 }
 0x3c0   : > { %2277 = vst [vmem:[%s3737_s7 + $0xc0] sm:$0xff] %v1611_v55  ;;  %2279 = vst [vmem:[%s3737_s7 + $0xd0] sm:$0xff] %v1964_v56  ;;  %v1613_v57 = vpop.f32.mrb[149].mxu0  ;;  %v1966_v58 = vpop.f32.mrb[149].mxu1 }
 0x3c1   : > { %2278 = vst [vmem:[%s3737_s7 + $0xc8] sm:$0xff] %v1613_v57  ;;  %2280 = vst [vmem:[%s3737_s7 + $0xd8] sm:$0xff] %v1966_v58  ;;  %v1615_v3 = vpop.f32.mrb[150].mxu0  ;;  %v1968_v23 = vpop.f32.mrb[150].mxu1 }
 0x3c2   : > { %2281 = vst [vmem:[%s3737_s7 + $0xe0] sm:$0xff] %v1615_v3  ;;  %2283 = vst [vmem:[%s3737_s7 + $0xf0] sm:$0xff] %v1968_v23  ;;  %v1617_v13 = vpop.f32.mrb[151].mxu0  ;;  %v1970_v24 = vpop.f32.mrb[151].mxu1 }
 0x3c3   : > { %2282 = vst [vmem:[%s3737_s7 + $0xe8] sm:$0xff] %v1617_v13  ;;  %2284 = vst [vmem:[%s3737_s7 + $0xf8] sm:$0xff] %v1970_v24 }
 0x3c4   : > { %2752 = vmatmul.mubr.msk.bf16.gmra.mrb[0].mxu0 %vm202_vm1, %v3316_v22  ;;  %2785 = vmatmul.mubr.msk.bf16.gmra.mrb[0].mxu1 %vm202_vm1, %v3316_v22 }
 0x3c5   : > { %1889 = vmatprep.mubr.bf16.mxu0 %v2944_v4  ;;  %2242 = vmatprep.mubr.bf16.mxu1 %v2944_v4 }
 0x3c7   : > { %v1621_v25 = vpop.f32.mrb[152].mxu0  ;;  %v1974_v26 = vpop.f32.mrb[152].mxu1 }
 0x3c8   : > { %2285 = vst [vmem:[%s3737_s7 + $0x100] sm:$0xff] %v1621_v25  ;;  %2287 = vst [vmem:[%s3737_s7 + $0x110] sm:$0xff] %v1974_v26  ;;  %v1623_v27 = vpop.f32.mrb[153].mxu0  ;;  %v1976_v28 = vpop.f32.mrb[153].mxu1 }
 0x3c9   : > { %2286 = vst [vmem:[%s3737_s7 + $0x108] sm:$0xff] %v1623_v27  ;;  %2288 = vst [vmem:[%s3737_s7 + $0x118] sm:$0xff] %v1976_v28  ;;  %v1625_v29 = vpop.f32.mrb[154].mxu0  ;;  %v1978_v30 = vpop.f32.mrb[154].mxu1 }
 0x3ca   : > { %2289 = vst [vmem:[%s3737_s7 + $0x120] sm:$0xff] %v1625_v29  ;;  %2291 = vst [vmem:[%s3737_s7 + $0x130] sm:$0xff] %v1978_v30  ;;  %v1627_v22 = vpop.f32.mrb[155].mxu0  ;;  %v1980_v4 = vpop.f32.mrb[155].mxu1 }
 0x3cb   : > { %2290 = vst [vmem:[%s3737_s7 + $0x128] sm:$0xff] %v1627_v22  ;;  %2292 = vst [vmem:[%s3737_s7 + $0x138] sm:$0xff] %v1980_v4 }
 0x3cc   : > { %2753 = vmatmul.mubr.msk.bf16.gmra.mrb[4].mxu0 %vm202_vm1, %v3332_v59  ;;  %2786 = vmatmul.mubr.msk.bf16.gmra.mrb[4].mxu1 %vm202_vm1, %v3332_v59 }
 0x3cf   : > { %v1631_v60 = vpop.f32.mrb[156].mxu0  ;;  %v1984_v61 = vpop.f32.mrb[156].mxu1 }
 0x3d0   : > { %2293 = vst [vmem:[%s3737_s7 + $0x140] sm:$0xff] %v1631_v60  ;;  %2295 = vst [vmem:[%s3737_s7 + $0x150] sm:$0xff] %v1984_v61  ;;  %v1633_v62 = vpop.f32.mrb[157].mxu0  ;;  %v1986_v63 = vpop.f32.mrb[157].mxu1 }
 0x3d1   : > { %2294 = vst [vmem:[%s3737_s7 + $0x148] sm:$0xff] %v1633_v62  ;;  %2296 = vst [vmem:[%s3737_s7 + $0x158] sm:$0xff] %v1986_v63  ;;  %v1635_v0 = vpop.f32.mrb[158].mxu0  ;;  %v1988_v1 = vpop.f32.mrb[158].mxu1 }
 0x3d2   : > { %2297 = vst [vmem:[%s3737_s7 + $0x160] sm:$0xff] %v1635_v0  ;;  %2299 = vst [vmem:[%s3737_s7 + $0x170] sm:$0xff] %v1988_v1  ;;  %v1637_v59 = vpop.f32.mrb[159].mxu0  ;;  %v1990_v2 = vpop.f32.mrb[159].mxu1 }
 0x3d3   : > { %2298 = vst [vmem:[%s3737_s7 + $0x168] sm:$0xff] %v1637_v59  ;;  %2300 = vst [vmem:[%s3737_s7 + $0x178] sm:$0xff] %v1990_v2 }
 0x3d7   : > { %v1641_v5 = vpop.f32.mrb[160].mxu0  ;;  %v1994_v6 = vpop.f32.mrb[160].mxu1 }
 0x3d8   : > { %2301 = vst [vmem:[%s3737_s7 + $0x180] sm:$0xff] %v1641_v5  ;;  %2303 = vst [vmem:[%s3737_s7 + $0x190] sm:$0xff] %v1994_v6  ;;  %v1643_v7 = vpop.f32.mrb[161].mxu0  ;;  %v1996_v8 = vpop.f32.mrb[161].mxu1 }
 0x3d9   : > { %2302 = vst [vmem:[%s3737_s7 + $0x188] sm:$0xff] %v1643_v7  ;;  %2304 = vst [vmem:[%s3737_s7 + $0x198] sm:$0xff] %v1996_v8  ;;  %v1645_v9 = vpop.f32.mrb[162].mxu0  ;;  %v1998_v10 = vpop.f32.mrb[162].mxu1 }
 0x3da   : > { %2305 = vst [vmem:[%s3737_s7 + $0x1a0] sm:$0xff] %v1645_v9  ;;  %2307 = vst [vmem:[%s3737_s7 + $0x1b0] sm:$0xff] %v1998_v10  ;;  %v1647_v11 = vpop.f32.mrb[163].mxu0  ;;  %v2000_v12 = vpop.f32.mrb[163].mxu1 }
 0x3db   : > { %2306 = vst [vmem:[%s3737_s7 + $0x1a8] sm:$0xff] %v1647_v11  ;;  %2308 = vst [vmem:[%s3737_s7 + $0x1b8] sm:$0xff] %v2000_v12 }
 0x3df   : > { %v1651_v14 = vpop.f32.mrb[164].mxu0  ;;  %v2004_v15 = vpop.f32.mrb[164].mxu1 }
 0x3e0   : > { %2309 = vst [vmem:[%s3737_s7 + $0x1c0] sm:$0xff] %v1651_v14  ;;  %2311 = vst [vmem:[%s3737_s7 + $0x1d0] sm:$0xff] %v2004_v15  ;;  %v1653_v16 = vpop.f32.mrb[165].mxu0  ;;  %v2006_v17 = vpop.f32.mrb[165].mxu1 }
 0x3e1   : > { %2310 = vst [vmem:[%s3737_s7 + $0x1c8] sm:$0xff] %v1653_v16  ;;  %2312 = vst [vmem:[%s3737_s7 + $0x1d8] sm:$0xff] %v2006_v17  ;;  %v1655_v18 = vpop.f32.mrb[166].mxu0  ;;  %v2008_v19 = vpop.f32.mrb[166].mxu1 }
 0x3e2   : > { %2313 = vst [vmem:[%s3737_s7 + $0x1e0] sm:$0xff] %v1655_v18  ;;  %2315 = vst [vmem:[%s3737_s7 + $0x1f0] sm:$0xff] %v2008_v19  ;;  %v1657_v20 = vpop.f32.mrb[167].mxu0  ;;  %v2010_v21 = vpop.f32.mrb[167].mxu1 }
 0x3e3   : > { %2314 = vst [vmem:[%s3737_s7 + $0x1e8] sm:$0xff] %v1657_v20  ;;  %2316 = vst [vmem:[%s3737_s7 + $0x1f8] sm:$0xff] %v2010_v21 }
 0x3e7   : > { %v1661_v31 = vpop.f32.mrb[168].mxu0  ;;  %v2014_v32 = vpop.f32.mrb[168].mxu1 }
 0x3e8   : > { %2317 = vst [vmem:[%s3737_s7 + $0x200] sm:$0xff] %v1661_v31  ;;  %2319 = vst [vmem:[%s3737_s7 + $0x210] sm:$0xff] %v2014_v32  ;;  %v1663_v33 = vpop.f32.mrb[169].mxu0  ;;  %v2016_v34 = vpop.f32.mrb[169].mxu1 }
 0x3e9   : > { %2318 = vst [vmem:[%s3737_s7 + $0x208] sm:$0xff] %v1663_v33  ;;  %2320 = vst [vmem:[%s3737_s7 + $0x218] sm:$0xff] %v2016_v34  ;;  %v1665_v35 = vpop.f32.mrb[170].mxu0  ;;  %v2018_v36 = vpop.f32.mrb[170].mxu1 }
 0x3ea   : > { %2321 = vst [vmem:[%s3737_s7 + $0x220] sm:$0xff] %v1665_v35  ;;  %2323 = vst [vmem:[%s3737_s7 + $0x230] sm:$0xff] %v2018_v36  ;;  %v1667_v37 = vpop.f32.mrb[171].mxu0  ;;  %v2020_v38 = vpop.f32.mrb[171].mxu1 }
 0x3eb   : > { %2322 = vst [vmem:[%s3737_s7 + $0x228] sm:$0xff] %v1667_v37  ;;  %2324 = vst [vmem:[%s3737_s7 + $0x238] sm:$0xff] %v2020_v38 }
 0x3ef   : > { %v1671_v39 = vpop.f32.mrb[172].mxu0  ;;  %v2024_v40 = vpop.f32.mrb[172].mxu1 }
 0x3f0   : > { %2325 = vst [vmem:[%s3737_s7 + $0x240] sm:$0xff] %v1671_v39  ;;  %2327 = vst [vmem:[%s3737_s7 + $0x250] sm:$0xff] %v2024_v40  ;;  %v1673_v41 = vpop.f32.mrb[173].mxu0  ;;  %v2026_v42 = vpop.f32.mrb[173].mxu1 }
 0x3f1   : > { %2326 = vst [vmem:[%s3737_s7 + $0x248] sm:$0xff] %v1673_v41  ;;  %2328 = vst [vmem:[%s3737_s7 + $0x258] sm:$0xff] %v2026_v42  ;;  %v1675_v43 = vpop.f32.mrb[174].mxu0  ;;  %v2028_v44 = vpop.f32.mrb[174].mxu1 }
 0x3f2   : > { %2329 = vst [vmem:[%s3737_s7 + $0x260] sm:$0xff] %v1675_v43  ;;  %2331 = vst [vmem:[%s3737_s7 + $0x270] sm:$0xff] %v2028_v44  ;;  %v1677_v45 = vpop.f32.mrb[175].mxu0  ;;  %v2030_v46 = vpop.f32.mrb[175].mxu1 }
 0x3f3   : > { %2330 = vst [vmem:[%s3737_s7 + $0x268] sm:$0xff] %v1677_v45  ;;  %2332 = vst [vmem:[%s3737_s7 + $0x278] sm:$0xff] %v2030_v46 }
 0x3f7   : > { %v1681_v47 = vpop.f32.mrb[176].mxu0  ;;  %v2034_v48 = vpop.f32.mrb[176].mxu1 }
 0x3f8   : > { %2333 = vst [vmem:[%s3737_s7 + $0x280] sm:$0xff] %v1681_v47  ;;  %2335 = vst [vmem:[%s3737_s7 + $0x290] sm:$0xff] %v2034_v48  ;;  %v1683_v49 = vpop.f32.mrb[177].mxu0  ;;  %v2036_v50 = vpop.f32.mrb[177].mxu1 }
 0x3f9   : > { %2334 = vst [vmem:[%s3737_s7 + $0x288] sm:$0xff] %v1683_v49  ;;  %2336 = vst [vmem:[%s3737_s7 + $0x298] sm:$0xff] %v2036_v50  ;;  %v1685_v51 = vpop.f32.mrb[178].mxu0  ;;  %v2038_v52 = vpop.f32.mrb[178].mxu1 }
 0x3fa   : > { %2337 = vst [vmem:[%s3737_s7 + $0x2a0] sm:$0xff] %v1685_v51  ;;  %2339 = vst [vmem:[%s3737_s7 + $0x2b0] sm:$0xff] %v2038_v52  ;;  %v1687_v53 = vpop.f32.mrb[179].mxu0  ;;  %v2040_v54 = vpop.f32.mrb[179].mxu1 }
 0x3fb   : > { %2338 = vst [vmem:[%s3737_s7 + $0x2a8] sm:$0xff] %v1687_v53  ;;  %2340 = vst [vmem:[%s3737_s7 + $0x2b8] sm:$0xff] %v2040_v54 }
 0x3ff   : > { %v1691_v55 = vpop.f32.mrb[180].mxu0  ;;  %v2044_v56 = vpop.f32.mrb[180].mxu1 }
 0x400   : > { %2341 = vst [vmem:[%s3737_s7 + $0x2c0] sm:$0xff] %v1691_v55  ;;  %2343 = vst [vmem:[%s3737_s7 + $0x2d0] sm:$0xff] %v2044_v56  ;;  %v1693_v57 = vpop.f32.mrb[181].mxu0  ;;  %v2046_v58 = vpop.f32.mrb[181].mxu1 }
 0x401   : > { %2342 = vst [vmem:[%s3737_s7 + $0x2c8] sm:$0xff] %v1693_v57  ;;  %2344 = vst [vmem:[%s3737_s7 + $0x2d8] sm:$0xff] %v2046_v58  ;;  %v1695_v3 = vpop.f32.mrb[182].mxu0  ;;  %v2048_v23 = vpop.f32.mrb[182].mxu1 }
 0x402   : > { %2345 = vst [vmem:[%s3737_s7 + $0x2e0] sm:$0xff] %v1695_v3  ;;  %2347 = vst [vmem:[%s3737_s7 + $0x2f0] sm:$0xff] %v2048_v23  ;;  %v1697_v13 = vpop.f32.mrb[183].mxu0  ;;  %v2050_v24 = vpop.f32.mrb[183].mxu1 }
 0x403   : > { %2346 = vst [vmem:[%s3737_s7 + $0x2e8] sm:$0xff] %v1697_v13  ;;  %2348 = vst [vmem:[%s3737_s7 + $0x2f8] sm:$0xff] %v2050_v24 }
 0x407   : > { %v1701_v25 = vpop.f32.mrb[184].mxu0  ;;  %v2054_v26 = vpop.f32.mrb[184].mxu1 }
 0x408   : > { %2349 = vst [vmem:[%s3737_s7 + $0x300] sm:$0xff] %v1701_v25  ;;  %2351 = vst [vmem:[%s3737_s7 + $0x310] sm:$0xff] %v2054_v26  ;;  %v1703_v27 = vpop.f32.mrb[185].mxu0  ;;  %v2056_v28 = vpop.f32.mrb[185].mxu1 }
 0x409   : > { %2350 = vst [vmem:[%s3737_s7 + $0x308] sm:$0xff] %v1703_v27  ;;  %2352 = vst [vmem:[%s3737_s7 + $0x318] sm:$0xff] %v2056_v28  ;;  %v1705_v29 = vpop.f32.mrb[186].mxu0  ;;  %v2058_v30 = vpop.f32.mrb[186].mxu1 }
 0x40a   : > { %2353 = vst [vmem:[%s3737_s7 + $0x320] sm:$0xff] %v1705_v29  ;;  %2355 = vst [vmem:[%s3737_s7 + $0x330] sm:$0xff] %v2058_v30  ;;  %v1707_v22 = vpop.f32.mrb[187].mxu0  ;;  %v2060_v4 = vpop.f32.mrb[187].mxu1 }
 0x40b   : > { %2354 = vst [vmem:[%s3737_s7 + $0x328] sm:$0xff] %v1707_v22  ;;  %2356 = vst [vmem:[%s3737_s7 + $0x338] sm:$0xff] %v2060_v4 }
 0x40f   : > { %v1711_v60 = vpop.f32.mrb[188].mxu0  ;;  %v2064_v61 = vpop.f32.mrb[188].mxu1 }
 0x410   : > { %2357 = vst [vmem:[%s3737_s7 + $0x340] sm:$0xff] %v1711_v60  ;;  %2359 = vst [vmem:[%s3737_s7 + $0x350] sm:$0xff] %v2064_v61  ;;  %v1713_v62 = vpop.f32.mrb[189].mxu0  ;;  %v2066_v63 = vpop.f32.mrb[189].mxu1 }
 0x411   : > { %2358 = vst [vmem:[%s3737_s7 + $0x348] sm:$0xff] %v1713_v62  ;;  %2360 = vst [vmem:[%s3737_s7 + $0x358] sm:$0xff] %v2066_v63  ;;  %v1715_v0 = vpop.f32.mrb[190].mxu0  ;;  %v2068_v1 = vpop.f32.mrb[190].mxu1 }
 0x412   : > { %2361 = vst [vmem:[%s3737_s7 + $0x360] sm:$0xff] %v1715_v0  ;;  %2363 = vst [vmem:[%s3737_s7 + $0x370] sm:$0xff] %v2068_v1  ;;  %v1717_v59 = vpop.f32.mrb[191].mxu0  ;;  %v2070_v2 = vpop.f32.mrb[191].mxu1 }
 0x413   : > { %2362 = vst [vmem:[%s3737_s7 + $0x368] sm:$0xff] %v1717_v59  ;;  %2364 = vst [vmem:[%s3737_s7 + $0x378] sm:$0xff] %v2070_v2 }
 0x417   : > { %v1721_v5 = vpop.f32.mrb[192].mxu0  ;;  %v2074_v6 = vpop.f32.mrb[192].mxu1 }
 0x418   : > { %2365 = vst [vmem:[%s3737_s7 + $0x380] sm:$0xff] %v1721_v5  ;;  %2367 = vst [vmem:[%s3737_s7 + $0x390] sm:$0xff] %v2074_v6  ;;  %v1723_v7 = vpop.f32.mrb[193].mxu0  ;;  %v2076_v8 = vpop.f32.mrb[193].mxu1 }
 0x419   : > { %2366 = vst [vmem:[%s3737_s7 + $0x388] sm:$0xff] %v1723_v7  ;;  %2368 = vst [vmem:[%s3737_s7 + $0x398] sm:$0xff] %v2076_v8  ;;  %v1725_v9 = vpop.f32.mrb[194].mxu0  ;;  %v2078_v10 = vpop.f32.mrb[194].mxu1 }
 0x41a   : > { %2369 = vst [vmem:[%s3737_s7 + $0x3a0] sm:$0xff] %v1725_v9  ;;  %2371 = vst [vmem:[%s3737_s7 + $0x3b0] sm:$0xff] %v2078_v10  ;;  %v1727_v11 = vpop.f32.mrb[195].mxu0  ;;  %v2080_v12 = vpop.f32.mrb[195].mxu1 }
 0x41b   : > { %2370 = vst [vmem:[%s3737_s7 + $0x3a8] sm:$0xff] %v1727_v11  ;;  %2372 = vst [vmem:[%s3737_s7 + $0x3b8] sm:$0xff] %v2080_v12 }
 0x41f   : > { %v1731_v14 = vpop.f32.mrb[196].mxu0  ;;  %v2084_v15 = vpop.f32.mrb[196].mxu1 }
 0x420   : > { %2373 = vst [vmem:[%s3737_s7 + $0x3c0] sm:$0xff] %v1731_v14  ;;  %2375 = vst [vmem:[%s3737_s7 + $0x3d0] sm:$0xff] %v2084_v15  ;;  %v1733_v16 = vpop.f32.mrb[197].mxu0  ;;  %v2086_v17 = vpop.f32.mrb[197].mxu1 }
 0x421   : > { %2374 = vst [vmem:[%s3737_s7 + $0x3c8] sm:$0xff] %v1733_v16  ;;  %2376 = vst [vmem:[%s3737_s7 + $0x3d8] sm:$0xff] %v2086_v17  ;;  %v1735_v18 = vpop.f32.mrb[198].mxu0  ;;  %v2088_v19 = vpop.f32.mrb[198].mxu1 }
 0x422   : > { %2377 = vst [vmem:[%s3737_s7 + $0x3e0] sm:$0xff] %v1735_v18  ;;  %2379 = vst [vmem:[%s3737_s7 + $0x3f0] sm:$0xff] %v2088_v19  ;;  %v1737_v20 = vpop.f32.mrb[199].mxu0  ;;  %v2090_v21 = vpop.f32.mrb[199].mxu1 }
 0x423   : > { %2378 = vst [vmem:[%s3737_s7 + $0x3e8] sm:$0xff] %v1737_v20  ;;  %2380 = vst [vmem:[%s3737_s7 + $0x3f8] sm:$0xff] %v2090_v21 }
 0x424   : > { %2860 = shalt.err (!%p2857_p3)
}
 0x425   : > { %s2861_s27 = scalar_lea.hbm %s3902_s17, 32768  ;;  %s2865_s30 = scalar_lea.hbm %s4117_s2, 65536 }
 0x426   : > { %p2862_p4 = scmp.ne.s32.totalorder %s3902_s17, %s2861_s27  ;;  %p2866_p9 = scmp.lt.u32.totalorder %s3902_s17, %s4117_s2 }
 0x427   : > { %p2867_p10 = scmp.lt.u32.totalorder %s2865_s30, %s2861_s27  ;;  %p2869_p12 = scmp.lt.u32.totalorder %s2861_s27, %s3902_s17 }
 0x428   : > { %p2863_p7 = pnand %p2862_p4, %p3007_p5 }
 0x429   : > { %p2868_p11 = por %p2867_p10, %p2866_p9 }
 0x42a   : > { %p2864_p8 = pneg %p2863_p7 }
 0x42b   : > { %p2870_p13 = por %p2869_p12, %p2868_p11 }
 0x42d   : > { %p2871_p0 = pnand %p2870_p13, %p2864_p8 }
 0x42f   : > { %2874 = shalt.err (!%p2871_p0)
}
 0x430   : > { %s2946_s10 = smov 512   ;;  %s2947_s11 = smov 32   ;;  %v1741_v31 = vpop.f32.mrb[200].mxu0  ;;  %v2094_v32 = vpop.f32.mrb[200].mxu1 }
 0x431   : > { %2798 = dma.vmem_to_hbm [thread:$0]  (%p3007_p5), %s3904_s9, 32768, %s3902_s17, %s2510_s19, %s2946_s10, %s2946_s10, %s2947_s11   ;;  %v1743_v33 = vpop.f32.mrb[201].mxu0  ;;  %v2096_v34 = vpop.f32.mrb[201].mxu1 }
 0x432   : > { %2381 = vst [vmem:[%s3737_s7 + $0x400] sm:$0xff] %v1741_v31  ;;  %2383 = vst [vmem:[%s3737_s7 + $0x410] sm:$0xff] %v2094_v32  ;;  %v1745_v35 = vpop.f32.mrb[202].mxu0  ;;  %v2098_v36 = vpop.f32.mrb[202].mxu1  ;;  %s2544_s9 = sshll.u32 %s3737_s7, 4  ;;  %s4063_s20 = scalar_lea.hbm %s4118_s3, %s2796_s8  ;;  %s4065_s9 = int_to_ptr.vmem [resolvable:$true] %s2544_s9 }
 0x433   : > { %2382 = vst [vmem:[%s3737_s7 + $0x408] sm:$0xff] %v1743_v33  ;;  %2384 = vst [vmem:[%s3737_s7 + $0x418] sm:$0xff] %v2096_v34  ;;  %v1747_v37 = vpop.f32.mrb[203].mxu0  ;;  %v2100_v38 = vpop.f32.mrb[203].mxu1  ;;  %s2515_s24 = scalar_lea.sflag [#allocation5], %s3253_s4  ;;  %s2875_s25 = scalar_lea.vmem %s4065_s9, 32768 }
 0x434   : > { %2385 = vst [vmem:[%s3737_s7 + $0x420] sm:$0xff] %v1745_v35  ;;  %2387 = vst [vmem:[%s3737_s7 + $0x430] sm:$0xff] %v2098_v36  ;;  %v1751_v39 = vpop.f32.mrb[204].mxu0  ;;  %v2104_v40 = vpop.f32.mrb[204].mxu1  ;;  %p2876_p1 = scmp.ne.s32.totalorder %s4065_s9, %s2875_s25  ;;  %s2948_s16 = smov [#allocation4]  }
 0x435   : > { %2386 = vst [vmem:[%s3737_s7 + $0x428] sm:$0xff] %v1747_v37  ;;  %2388 = vst [vmem:[%s3737_s7 + $0x438] sm:$0xff] %v2100_v38  ;;  %v1753_v41 = vpop.f32.mrb[205].mxu0  ;;  %v2106_v42 = vpop.f32.mrb[205].mxu1  ;;  %s2879_s8 = sshll.u32 %s2948_s16, 4  ;;  %s2880_s8 = int_to_ptr.vmem [resolvable:$false] %s2879_s8 }
 0x436   : > { %2389 = vst [vmem:[%s3737_s7 + $0x440] sm:$0xff] %v1751_v39  ;;  %2391 = vst [vmem:[%s3737_s7 + $0x450] sm:$0xff] %v2104_v40  ;;  %v1755_v43 = vpop.f32.mrb[206].mxu0  ;;  %v2108_v44 = vpop.f32.mrb[206].mxu1  ;;  %p2877_p2 = pnand %p2876_p1, %p3007_p5  ;;  %s2881_s26 = scalar_lea.vmem %s2880_s8, 65536 }
 0x437   : > { %2390 = vst [vmem:[%s3737_s7 + $0x448] sm:$0xff] %v1753_v41  ;;  %2392 = vst [vmem:[%s3737_s7 + $0x458] sm:$0xff] %v2106_v42  ;;  %v1757_v45 = vpop.f32.mrb[207].mxu0  ;;  %v2110_v46 = vpop.f32.mrb[207].mxu1  ;;  %p2882_p4 = scmp.lt.s32.totalorder %s4065_s9, %s2880_s8  ;;  %p2883_p7 = scmp.lt.s32.totalorder %s2881_s26, %s2875_s25 }
 0x438   : > { %2393 = vst [vmem:[%s3737_s7 + $0x460] sm:$0xff] %v1755_v43  ;;  %2395 = vst [vmem:[%s3737_s7 + $0x470] sm:$0xff] %v2108_v44  ;;  %v1761_v47 = vpop.f32.mrb[208].mxu0  ;;  %v2114_v48 = vpop.f32.mrb[208].mxu1  ;;  %p2878_p3 = pneg %p2877_p2 }
 0x439   : > { %2394 = vst [vmem:[%s3737_s7 + $0x468] sm:$0xff] %v1757_v45  ;;  %2396 = vst [vmem:[%s3737_s7 + $0x478] sm:$0xff] %v2110_v46  ;;  %v1763_v49 = vpop.f32.mrb[209].mxu0  ;;  %v2116_v50 = vpop.f32.mrb[209].mxu1  ;;  %p2884_p8 = por %p2883_p7, %p2882_p4 }
 0x43a   : > { %2397 = vst [vmem:[%s3737_s7 + $0x480] sm:$0xff] %v1761_v47  ;;  %2399 = vst [vmem:[%s3737_s7 + $0x490] sm:$0xff] %v2114_v48  ;;  %v1765_v51 = vpop.f32.mrb[210].mxu0  ;;  %v2118_v52 = vpop.f32.mrb[210].mxu1 }
 0x43b   : > { %2398 = vst [vmem:[%s3737_s7 + $0x488] sm:$0xff] %v1763_v49  ;;  %2400 = vst [vmem:[%s3737_s7 + $0x498] sm:$0xff] %v2116_v50  ;;  %v1767_v53 = vpop.f32.mrb[211].mxu0  ;;  %v2120_v54 = vpop.f32.mrb[211].mxu1  ;;  %p2885_p9 = pnand %p2884_p8, %p2878_p3 }
 0x43c   : > { %2401 = vst [vmem:[%s3737_s7 + $0x4a0] sm:$0xff] %v1765_v51  ;;  %2403 = vst [vmem:[%s3737_s7 + $0x4b0] sm:$0xff] %v2118_v52 }
 0x43d   : > { %2402 = vst [vmem:[%s3737_s7 + $0x4a8] sm:$0xff] %v1767_v53  ;;  %2404 = vst [vmem:[%s3737_s7 + $0x4b8] sm:$0xff] %v2120_v54 }
 0x43f   : > { %v1771_v55 = vpop.f32.mrb[212].mxu0  ;;  %v2124_v56 = vpop.f32.mrb[212].mxu1 }
 0x440   : > { %2405 = vst [vmem:[%s3737_s7 + $0x4c0] sm:$0xff] %v1771_v55  ;;  %2407 = vst [vmem:[%s3737_s7 + $0x4d0] sm:$0xff] %v2124_v56  ;;  %v1773_v57 = vpop.f32.mrb[213].mxu0  ;;  %v2126_v58 = vpop.f32.mrb[213].mxu1 }
 0x441   : > { %2406 = vst [vmem:[%s3737_s7 + $0x4c8] sm:$0xff] %v1773_v57  ;;  %2408 = vst [vmem:[%s3737_s7 + $0x4d8] sm:$0xff] %v2126_v58  ;;  %v1775_v3 = vpop.f32.mrb[214].mxu0  ;;  %v2128_v23 = vpop.f32.mrb[214].mxu1 }
 0x442   : > { %2409 = vst [vmem:[%s3737_s7 + $0x4e0] sm:$0xff] %v1775_v3  ;;  %2411 = vst [vmem:[%s3737_s7 + $0x4f0] sm:$0xff] %v2128_v23  ;;  %v1777_v13 = vpop.f32.mrb[215].mxu0  ;;  %v2130_v24 = vpop.f32.mrb[215].mxu1 }
 0x443   : > { %2410 = vst [vmem:[%s3737_s7 + $0x4e8] sm:$0xff] %v1777_v13  ;;  %2412 = vst [vmem:[%s3737_s7 + $0x4f8] sm:$0xff] %v2130_v24 }
 0x447   : > { %v1781_v25 = vpop.f32.mrb[216].mxu0  ;;  %v2134_v26 = vpop.f32.mrb[216].mxu1 }
 0x448   : > { %2413 = vst [vmem:[%s3737_s7 + $0x500] sm:$0xff] %v1781_v25  ;;  %2415 = vst [vmem:[%s3737_s7 + $0x510] sm:$0xff] %v2134_v26  ;;  %v1783_v27 = vpop.f32.mrb[217].mxu0  ;;  %v2136_v28 = vpop.f32.mrb[217].mxu1 }
 0x449   : > { %2414 = vst [vmem:[%s3737_s7 + $0x508] sm:$0xff] %v1783_v27  ;;  %2416 = vst [vmem:[%s3737_s7 + $0x518] sm:$0xff] %v2136_v28  ;;  %v1785_v29 = vpop.f32.mrb[218].mxu0  ;;  %v2138_v30 = vpop.f32.mrb[218].mxu1 }
 0x44a   : > { %2417 = vst [vmem:[%s3737_s7 + $0x520] sm:$0xff] %v1785_v29  ;;  %2419 = vst [vmem:[%s3737_s7 + $0x530] sm:$0xff] %v2138_v30  ;;  %v1787_v22 = vpop.f32.mrb[219].mxu0  ;;  %v2140_v4 = vpop.f32.mrb[219].mxu1 }
 0x44b   : > { %2418 = vst [vmem:[%s3737_s7 + $0x528] sm:$0xff] %v1787_v22  ;;  %2420 = vst [vmem:[%s3737_s7 + $0x538] sm:$0xff] %v2140_v4 }
 0x44f   : > { %v1791_v60 = vpop.f32.mrb[220].mxu0  ;;  %v2144_v61 = vpop.f32.mrb[220].mxu1 }
 0x450   : > { %2421 = vst [vmem:[%s3737_s7 + $0x540] sm:$0xff] %v1791_v60  ;;  %2423 = vst [vmem:[%s3737_s7 + $0x550] sm:$0xff] %v2144_v61  ;;  %v1793_v62 = vpop.f32.mrb[221].mxu0  ;;  %v2146_v63 = vpop.f32.mrb[221].mxu1 }
 0x451   : > { %2422 = vst [vmem:[%s3737_s7 + $0x548] sm:$0xff] %v1793_v62  ;;  %2424 = vst [vmem:[%s3737_s7 + $0x558] sm:$0xff] %v2146_v63  ;;  %v1795_v0 = vpop.f32.mrb[222].mxu0  ;;  %v2148_v1 = vpop.f32.mrb[222].mxu1 }
 0x452   : > { %2425 = vst [vmem:[%s3737_s7 + $0x560] sm:$0xff] %v1795_v0  ;;  %2427 = vst [vmem:[%s3737_s7 + $0x570] sm:$0xff] %v2148_v1  ;;  %v1797_v59 = vpop.f32.mrb[223].mxu0  ;;  %v2150_v2 = vpop.f32.mrb[223].mxu1 }
 0x453   : > { %2426 = vst [vmem:[%s3737_s7 + $0x568] sm:$0xff] %v1797_v59  ;;  %2428 = vst [vmem:[%s3737_s7 + $0x578] sm:$0xff] %v2150_v2 }
 0x457   : > { %v1801_v5 = vpop.f32.mrb[224].mxu0  ;;  %v2154_v6 = vpop.f32.mrb[224].mxu1 }
 0x458   : > { %2429 = vst [vmem:[%s3737_s7 + $0x580] sm:$0xff] %v1801_v5  ;;  %2431 = vst [vmem:[%s3737_s7 + $0x590] sm:$0xff] %v2154_v6  ;;  %v1803_v7 = vpop.f32.mrb[225].mxu0  ;;  %v2156_v8 = vpop.f32.mrb[225].mxu1 }
 0x459   : > { %2430 = vst [vmem:[%s3737_s7 + $0x588] sm:$0xff] %v1803_v7  ;;  %2432 = vst [vmem:[%s3737_s7 + $0x598] sm:$0xff] %v2156_v8  ;;  %v1805_v9 = vpop.f32.mrb[226].mxu0  ;;  %v2158_v10 = vpop.f32.mrb[226].mxu1 }
 0x45a   : > { %2433 = vst [vmem:[%s3737_s7 + $0x5a0] sm:$0xff] %v1805_v9  ;;  %2435 = vst [vmem:[%s3737_s7 + $0x5b0] sm:$0xff] %v2158_v10  ;;  %v1807_v11 = vpop.f32.mrb[227].mxu0  ;;  %v2160_v12 = vpop.f32.mrb[227].mxu1 }
 0x45b   : > { %2434 = vst [vmem:[%s3737_s7 + $0x5a8] sm:$0xff] %v1807_v11  ;;  %2436 = vst [vmem:[%s3737_s7 + $0x5b8] sm:$0xff] %v2160_v12 }
 0x45f   : > { %v1811_v14 = vpop.f32.mrb[228].mxu0  ;;  %v2164_v15 = vpop.f32.mrb[228].mxu1 }
 0x460   : > { %2437 = vst [vmem:[%s3737_s7 + $0x5c0] sm:$0xff] %v1811_v14  ;;  %2439 = vst [vmem:[%s3737_s7 + $0x5d0] sm:$0xff] %v2164_v15  ;;  %v1813_v16 = vpop.f32.mrb[229].mxu0  ;;  %v2166_v17 = vpop.f32.mrb[229].mxu1 }
 0x461   : > { %2438 = vst [vmem:[%s3737_s7 + $0x5c8] sm:$0xff] %v1813_v16  ;;  %2440 = vst [vmem:[%s3737_s7 + $0x5d8] sm:$0xff] %v2166_v17  ;;  %v1815_v18 = vpop.f32.mrb[230].mxu0  ;;  %v2168_v19 = vpop.f32.mrb[230].mxu1 }
 0x462   : > { %2441 = vst [vmem:[%s3737_s7 + $0x5e0] sm:$0xff] %v1815_v18  ;;  %2443 = vst [vmem:[%s3737_s7 + $0x5f0] sm:$0xff] %v2168_v19  ;;  %v1817_v20 = vpop.f32.mrb[231].mxu0  ;;  %v2170_v21 = vpop.f32.mrb[231].mxu1 }
 0x463   : > { %2442 = vst [vmem:[%s3737_s7 + $0x5e8] sm:$0xff] %v1817_v20  ;;  %2444 = vst [vmem:[%s3737_s7 + $0x5f8] sm:$0xff] %v2170_v21 }
 0x467   : > { %v1821_v31 = vpop.f32.mrb[232].mxu0  ;;  %v2174_v32 = vpop.f32.mrb[232].mxu1 }
 0x468   : > { %2445 = vst [vmem:[%s3737_s7 + $0x600] sm:$0xff] %v1821_v31  ;;  %2447 = vst [vmem:[%s3737_s7 + $0x610] sm:$0xff] %v2174_v32  ;;  %v1823_v33 = vpop.f32.mrb[233].mxu0  ;;  %v2176_v34 = vpop.f32.mrb[233].mxu1 }
 0x469   : > { %2446 = vst [vmem:[%s3737_s7 + $0x608] sm:$0xff] %v1823_v33  ;;  %2448 = vst [vmem:[%s3737_s7 + $0x618] sm:$0xff] %v2176_v34  ;;  %v1825_v35 = vpop.f32.mrb[234].mxu0  ;;  %v2178_v36 = vpop.f32.mrb[234].mxu1 }
 0x46a   : > { %2449 = vst [vmem:[%s3737_s7 + $0x620] sm:$0xff] %v1825_v35  ;;  %2451 = vst [vmem:[%s3737_s7 + $0x630] sm:$0xff] %v2178_v36  ;;  %v1827_v37 = vpop.f32.mrb[235].mxu0  ;;  %v2180_v38 = vpop.f32.mrb[235].mxu1 }
 0x46b   : > { %2450 = vst [vmem:[%s3737_s7 + $0x628] sm:$0xff] %v1827_v37  ;;  %2452 = vst [vmem:[%s3737_s7 + $0x638] sm:$0xff] %v2180_v38 }
 0x46f   : > { %v1831_v39 = vpop.f32.mrb[236].mxu0  ;;  %v2184_v40 = vpop.f32.mrb[236].mxu1 }
 0x470   : > { %2453 = vst [vmem:[%s3737_s7 + $0x640] sm:$0xff] %v1831_v39  ;;  %2455 = vst [vmem:[%s3737_s7 + $0x650] sm:$0xff] %v2184_v40  ;;  %v1833_v41 = vpop.f32.mrb[237].mxu0  ;;  %v2186_v42 = vpop.f32.mrb[237].mxu1 }
 0x471   : > { %2454 = vst [vmem:[%s3737_s7 + $0x648] sm:$0xff] %v1833_v41  ;;  %2456 = vst [vmem:[%s3737_s7 + $0x658] sm:$0xff] %v2186_v42  ;;  %v1835_v43 = vpop.f32.mrb[238].mxu0  ;;  %v2188_v44 = vpop.f32.mrb[238].mxu1 }
 0x472   : > { %2457 = vst [vmem:[%s3737_s7 + $0x660] sm:$0xff] %v1835_v43  ;;  %2459 = vst [vmem:[%s3737_s7 + $0x670] sm:$0xff] %v2188_v44  ;;  %v1837_v45 = vpop.f32.mrb[239].mxu0  ;;  %v2190_v46 = vpop.f32.mrb[239].mxu1 }
 0x473   : > { %2458 = vst [vmem:[%s3737_s7 + $0x668] sm:$0xff] %v1837_v45  ;;  %2460 = vst [vmem:[%s3737_s7 + $0x678] sm:$0xff] %v2190_v46 }
 0x477   : > { %v1841_v47 = vpop.f32.mrb[240].mxu0  ;;  %v2194_v48 = vpop.f32.mrb[240].mxu1 }
 0x478   : > { %2461 = vst [vmem:[%s3737_s7 + $0x680] sm:$0xff] %v1841_v47  ;;  %2463 = vst [vmem:[%s3737_s7 + $0x690] sm:$0xff] %v2194_v48  ;;  %v1843_v49 = vpop.f32.mrb[241].mxu0  ;;  %v2196_v50 = vpop.f32.mrb[241].mxu1 }
 0x479   : > { %2462 = vst [vmem:[%s3737_s7 + $0x688] sm:$0xff] %v1843_v49  ;;  %2464 = vst [vmem:[%s3737_s7 + $0x698] sm:$0xff] %v2196_v50  ;;  %v1845_v51 = vpop.f32.mrb[242].mxu0  ;;  %v2198_v52 = vpop.f32.mrb[242].mxu1 }
 0x47a   : > { %2465 = vst [vmem:[%s3737_s7 + $0x6a0] sm:$0xff] %v1845_v51  ;;  %2467 = vst [vmem:[%s3737_s7 + $0x6b0] sm:$0xff] %v2198_v52  ;;  %v1847_v53 = vpop.f32.mrb[243].mxu0  ;;  %v2200_v54 = vpop.f32.mrb[243].mxu1 }
 0x47b   : > { %2466 = vst [vmem:[%s3737_s7 + $0x6a8] sm:$0xff] %v1847_v53  ;;  %2468 = vst [vmem:[%s3737_s7 + $0x6b8] sm:$0xff] %v2200_v54 }
 0x47f   : > { %v1851_v55 = vpop.f32.mrb[244].mxu0  ;;  %v2204_v56 = vpop.f32.mrb[244].mxu1 }
 0x480   : > { %2469 = vst [vmem:[%s3737_s7 + $0x6c0] sm:$0xff] %v1851_v55  ;;  %2471 = vst [vmem:[%s3737_s7 + $0x6d0] sm:$0xff] %v2204_v56  ;;  %v1853_v57 = vpop.f32.mrb[245].mxu0  ;;  %v2206_v58 = vpop.f32.mrb[245].mxu1 }
 0x481   : > { %2470 = vst [vmem:[%s3737_s7 + $0x6c8] sm:$0xff] %v1853_v57  ;;  %2472 = vst [vmem:[%s3737_s7 + $0x6d8] sm:$0xff] %v2206_v58  ;;  %v1855_v3 = vpop.f32.mrb[246].mxu0  ;;  %v2208_v23 = vpop.f32.mrb[246].mxu1 }
 0x482   : > { %2473 = vst [vmem:[%s3737_s7 + $0x6e0] sm:$0xff] %v1855_v3  ;;  %2475 = vst [vmem:[%s3737_s7 + $0x6f0] sm:$0xff] %v2208_v23  ;;  %v1857_v13 = vpop.f32.mrb[247].mxu0  ;;  %v2210_v24 = vpop.f32.mrb[247].mxu1 }
 0x483   : > { %2474 = vst [vmem:[%s3737_s7 + $0x6e8] sm:$0xff] %v1857_v13  ;;  %2476 = vst [vmem:[%s3737_s7 + $0x6f8] sm:$0xff] %v2210_v24 }
 0x487   : > { %v1861_v25 = vpop.f32.mrb[248].mxu0  ;;  %v2214_v26 = vpop.f32.mrb[248].mxu1 }
 0x488   : > { %2477 = vst [vmem:[%s3737_s7 + $0x700] sm:$0xff] %v1861_v25  ;;  %2479 = vst [vmem:[%s3737_s7 + $0x710] sm:$0xff] %v2214_v26  ;;  %v1863_v27 = vpop.f32.mrb[249].mxu0  ;;  %v2216_v28 = vpop.f32.mrb[249].mxu1 }
 0x489   : > { %2478 = vst [vmem:[%s3737_s7 + $0x708] sm:$0xff] %v1863_v27  ;;  %2480 = vst [vmem:[%s3737_s7 + $0x718] sm:$0xff] %v2216_v28  ;;  %v1865_v29 = vpop.f32.mrb[250].mxu0  ;;  %v2218_v30 = vpop.f32.mrb[250].mxu1 }
 0x48a   : > { %2481 = vst [vmem:[%s3737_s7 + $0x720] sm:$0xff] %v1865_v29  ;;  %2483 = vst [vmem:[%s3737_s7 + $0x730] sm:$0xff] %v2218_v30  ;;  %v1867_v22 = vpop.f32.mrb[251].mxu0  ;;  %v2220_v4 = vpop.f32.mrb[251].mxu1 }
 0x48b   : > { %2482 = vst [vmem:[%s3737_s7 + $0x728] sm:$0xff] %v1867_v22  ;;  %2484 = vst [vmem:[%s3737_s7 + $0x738] sm:$0xff] %v2220_v4 }
 0x48f   : > { %v1871_v60 = vpop.f32.mrb[252].mxu0  ;;  %v2224_v61 = vpop.f32.mrb[252].mxu1 }
 0x490   : > { %2485 = vst [vmem:[%s3737_s7 + $0x740] sm:$0xff] %v1871_v60  ;;  %2487 = vst [vmem:[%s3737_s7 + $0x750] sm:$0xff] %v2224_v61  ;;  %v1873_v62 = vpop.f32.mrb[253].mxu0  ;;  %v2226_v63 = vpop.f32.mrb[253].mxu1 }
 0x491   : > { %2486 = vst [vmem:[%s3737_s7 + $0x748] sm:$0xff] %v1873_v62  ;;  %2488 = vst [vmem:[%s3737_s7 + $0x758] sm:$0xff] %v2226_v63  ;;  %v1875_v0 = vpop.f32.mrb[254].mxu0  ;;  %v2228_v1 = vpop.f32.mrb[254].mxu1 }
 0x492   : > { %2489 = vst [vmem:[%s3737_s7 + $0x760] sm:$0xff] %v1875_v0  ;;  %2491 = vst [vmem:[%s3737_s7 + $0x770] sm:$0xff] %v2228_v1  ;;  %v1877_v59 = vpop.f32.mrb[255].mxu0  ;;  %v2230_v2 = vpop.f32.mrb[255].mxu1 }
 0x493   : > { %2490 = vst [vmem:[%s3737_s7 + $0x768] sm:$0xff] %v1877_v59  ;;  %2492 = vst [vmem:[%s3737_s7 + $0x778] sm:$0xff] %v2230_v2 }
 0x497   : > { %v1881_v5 = vpop.f32.mrb[0].mxu0  ;;  %v2234_v6 = vpop.f32.mrb[0].mxu1 }
 0x498   : > { %2493 = vst [vmem:[%s3737_s7 + $0x780] sm:$0xff] %v1881_v5  ;;  %2495 = vst [vmem:[%s3737_s7 + $0x790] sm:$0xff] %v2234_v6  ;;  %v1883_v7 = vpop.f32.mrb[1].mxu0  ;;  %v2236_v8 = vpop.f32.mrb[1].mxu1 }
 0x499   : > { %2494 = vst [vmem:[%s3737_s7 + $0x788] sm:$0xff] %v1883_v7  ;;  %2496 = vst [vmem:[%s3737_s7 + $0x798] sm:$0xff] %v2236_v8  ;;  %v1885_v9 = vpop.f32.mrb[2].mxu0  ;;  %v2238_v10 = vpop.f32.mrb[2].mxu1 }
 0x49a   : > { %2497 = vst [vmem:[%s3737_s7 + $0x7a0] sm:$0xff] %v1885_v9  ;;  %2499 = vst [vmem:[%s3737_s7 + $0x7b0] sm:$0xff] %v2238_v10  ;;  %v1887_v11 = vpop.f32.mrb[3].mxu0  ;;  %v2240_v12 = vpop.f32.mrb[3].mxu1 }
 0x49b   : > { %2498 = vst [vmem:[%s3737_s7 + $0x7a8] sm:$0xff] %v1887_v11  ;;  %2500 = vst [vmem:[%s3737_s7 + $0x7b8] sm:$0xff] %v2240_v12 }
 0x49f   : > { %v1891_v14 = vpop.f32.mrb[4].mxu0  ;;  %v2244_v15 = vpop.f32.mrb[4].mxu1 }
 0x4a0   : > { %2501 = vst [vmem:[%s3737_s7 + $0x7c0] sm:$0xff] %v1891_v14  ;;  %2503 = vst [vmem:[%s3737_s7 + $0x7d0] sm:$0xff] %v2244_v15  ;;  %v1893_v16 = vpop.f32.mrb[5].mxu0  ;;  %v2246_v17 = vpop.f32.mrb[5].mxu1 }
 0x4a1   : > { %2502 = vst [vmem:[%s3737_s7 + $0x7c8] sm:$0xff] %v1893_v16  ;;  %2504 = vst [vmem:[%s3737_s7 + $0x7d8] sm:$0xff] %v2246_v17  ;;  %v1895_v18 = vpop.f32.mrb[6].mxu0  ;;  %v2248_v19 = vpop.f32.mrb[6].mxu1 }
 0x4a2   : > { %2505 = vst [vmem:[%s3737_s7 + $0x7e0] sm:$0xff] %v1895_v18  ;;  %2507 = vst [vmem:[%s3737_s7 + $0x7f0] sm:$0xff] %v2248_v19  ;;  %v1897_v20 = vpop.f32.mrb[7].mxu0  ;;  %v2250_v21 = vpop.f32.mrb[7].mxu1 }
 0x4a3   : > { %2506 = vst [vmem:[%s3737_s7 + $0x7e8] sm:$0xff] %v1897_v20  ;;  %2508 = vst [vmem:[%s3737_s7 + $0x7f8] sm:$0xff] %v2250_v21 }
 0x4a4   : > { %2888 = shalt.err (!%p2885_p9)
}
 0x4a5   : > { %s2889_s7 = scalar_lea.hbm %s4063_s20, 32768  ;;  %s2893_s29 = scalar_lea.hbm %s4118_s3, 65536 }
 0x4a6   : > { %p2890_p10 = scmp.ne.s32.totalorder %s4063_s20, %s2889_s7  ;;  %p2894_p13 = scmp.lt.u32.totalorder %s4063_s20, %s4118_s3 }
 0x4a7   : > { %p2895_p0 = scmp.lt.u32.totalorder %s2893_s29, %s2889_s7  ;;  %p2897_p2 = scmp.lt.u32.totalorder %s2889_s7, %s4063_s20 }
 0x4a8   : > { %p2891_p11 = pnand %p2890_p10, %p3007_p5 }
 0x4a9   : > { %p2896_p1 = por %p2895_p0, %p2894_p13 }
 0x4aa   : > { %p2892_p12 = pneg %p2891_p11 }
 0x4ab   : > { %p2898_p3 = por %p2897_p2, %p2896_p1 }
 0x4ad   : > { %p2899_p4 = pnand %p2898_p3, %p2892_p12 }
 0x4af   : > { %2902 = shalt.err (!%p2899_p4)
}
 0x4b0   : > { %2799 = dma.vmem_to_hbm [thread:$0]  (%p3007_p5), %s4065_s9, 32768, %s4063_s20, %s2515_s24, %s2946_s10, %s2946_s10, %s2947_s11  }
 0x4b1 PF: > { %p2809_p7 = scmp.ge.s32.totalorder %s2941_s15, 2  ;;  %s2559_s6 = sand.u32 1, %s2929_s12  }
 0x4b2   : > { %s2560_s17 = scalar_lea.sflag [#allocation3], %s2559_s6 }
 0x4b3   : > { %p2803_p8 = pnand %p2809_p7, %p3011_p6 }
 0x4b5   : > { %2920 = dma.done.wait (!%p2803_p8), %s2560_s17, 32768  }
 0x4b6   : > { %2922 = vsyncadd (!%p2803_p8), %s2560_s17, 4294934528  ;;  %s2569_s22 = scalar_lea.sflag [#allocation5], %s2559_s6 }
 0x4b7   : > { %2924 = dma.done.wait (!%p2803_p8), %s2569_s22, 32768  }
 0x4b8   : > { %2926 = vsyncadd (!%p2803_p8), %s2569_s22, 4294934528  ;;  %p17_p5 = scmp.ge.s32.totalorder %s2994_s18, 4   ;;  %s4121_s12 = smov %s2933_s13 }
 0x4b9   : > { %s4122_s13 = smov %s2937_s14  ;;  %s4123_s14 = smov %s3005_s21 }
 0x4ba   : > { %s4124_s15 = smov %s2994_s18  ;;  %19 = sbr.rel (!%p17_p5) target bundleno = 5 (0x5), region = 81 }
 0x4c1   :  { %2574 = vsyncpa [#allocation3], 1 }
 0x4c2   :  { %2576 = vsyncpa [#allocation3 + $0x1], 1 }
 0x4c3   :  { %2577 = vsyncpa [#allocation5], 1 }
 0x4c4   :  { %2579 = vsyncpa [#allocation5 + $0x1], 1 }

</bundles_post_ra>
